<compile_context>
chip_gen: v7x
topology: tpu7x:2x2x1
jax: 0.10.0
libtpu: 0.0.40
codegen_flags: <defaults>
</compile_context>

<pallas_src>
import math
import functools

import jax
import jax.numpy as jnp
from jax import lax
from jax.experimental import pallas as pl
from jax.experimental.pallas import tpu as pltpu

_ROW_TILE = 1024                    # large-M row tile for the plain linear projections
_VMEM_LIMIT = 48 * 1024 * 1024      # fits default-scoped budgets with headroom on v5e/v6e/v7x
MXU_DTYPE = jnp.bfloat16            # operand dtype for the big projection matmuls (f32 accum)


# ----------------------------------------------------------------------------- Pallas kernels

def _linear_kernel(x_ref, w_ref, b_ref, o_ref):
    o_ref[...] = (jnp.dot(x_ref[...], w_ref[...], preferred_element_type=jnp.float32)
                  + b_ref[...])


def pallas_linear(x, w, b):
    """y = x @ w + b (w stored (in, out)).  Single-shot for small M; 1024-row tiles otherwise."""
    M, K = x.shape
    N = w.shape[1]
    b2 = b.reshape(1, N).astype(jnp.float32)
    xc = x.astype(MXU_DTYPE)
    wc = w.astype(MXU_DTYPE)
    if M <= _ROW_TILE:
        return pl.pallas_call(
            _linear_kernel,
            out_shape=jax.ShapeDtypeStruct((M, N), jnp.float32),
            compiler_params=pltpu.CompilerParams(vmem_limit_bytes=_VMEM_LIMIT),
        )(xc, wc, b2)
    # large-M path: ragged last block handled by Pallas block clipping (no pad / slice copies)
    return pl.pallas_call(
        _linear_kernel,
        out_shape=jax.ShapeDtypeStruct((M, N), jnp.float32),
        grid=(pl.cdiv(M, _ROW_TILE),),
        in_specs=[
            pl.BlockSpec((_ROW_TILE, K), lambda i: (i, 0)),
            pl.BlockSpec((K, N), lambda i: (0, 0)),
            pl.BlockSpec((1, N), lambda i: (0, 0)),
        ],
        out_specs=pl.BlockSpec((_ROW_TILE, N), lambda i: (i, 0)),
        compiler_params=pltpu.CompilerParams(
            dimension_semantics=("parallel",), vmem_limit_bytes=_VMEM_LIMIT),
    )(xc, wc, b2)


def _self_rel_kernel(ids_ref, relv_ref, o_ref):
    # one MXU pass: segment-sum of relation embeddings AND per-entity edge counts (ones column)
    S, D = o_ref.shape
    T = relv_ref.shape[0]
    iota = lax.broadcasted_iota(jnp.int32, (S, T), 0)
    onehot = jnp.where(iota == ids_ref[...], 1.0, 0.0)                   # (S, T), built in-kernel
    sums_aug = jnp.dot(onehot, relv_ref[...], preferred_element_type=jnp.float32)  # (S, D+1)
    counts = sums_aug[:, D:D + 1]                                        # folded count column
    o_ref[...] = sums_aug[:, :D] / (counts + 1e-16)


def pallas_self_rel(tail_ids, rel_embs, num_ent):
    T, D = rel_embs.shape
    relv_aug = jnp.concatenate(
        [rel_embs.astype(jnp.float32), jnp.ones((T, 1), jnp.float32)], axis=-1)
    return pl.pallas_call(
        _self_rel_kernel,
        out_shape=jax.ShapeDtypeStruct((num_ent, D), jnp.float32),
        compiler_params=pltpu.CompilerParams(vmem_limit_bytes=_VMEM_LIMIT),
    )(tail_ids.reshape(1, T).astype(jnp.int32), relv_aug)


def _fused_gat_layer_kernel(*refs, num_head, has_bin):
    if has_bin:
        (ids_row_ref, ids_col_ref, x_att_ref, w_att_ref, b_att_ref, p_ref, rep_ref, bin_ref,
         x_ag_ref, w_ag_ref, b_ag_ref, emb_ref, w_res_ref, b_res_ref, o_ref) = refs
    else:
        (ids_row_ref, ids_col_ref, x_att_ref, w_att_ref, b_att_ref, p_ref, rep_ref,
         x_ag_ref, w_ag_ref, b_ag_ref, emb_ref, w_res_ref, b_res_ref, o_ref) = refs
        bin_ref = None

    f32 = jnp.float32
    E = x_att_ref.shape[0]
    S, L = o_ref.shape
    dh = L // num_head
    neg = f32(-1e30)

    # ---- segment matrices built in-kernel from the ids (no O(S*E) HBM traffic) ----
    cmp = lax.broadcasted_iota(jnp.int32, (S, E), 0) == ids_row_ref[...]          # (S, E)
    onehot = jnp.where(cmp, 1.0, 0.0).astype(f32)                                 # (S, E)
    mask_bias = jnp.where(cmp, 0.0, neg).astype(f32)                              # (S, E)
    onehot_t = jnp.where(
        lax.broadcasted_iota(jnp.int32, (E, S), 1) == ids_col_ref[...], 1.0, 0.0
    ).astype(f32)                                                                 # (E, S)

    # ---- attention scores at full L width (attn_vec folded into the pooling matrix) ----
    z = jnp.dot(x_att_ref[...], w_att_ref[...], preferred_element_type=f32) + b_att_ref[...]
    z = jnp.where(z >= 0.0, z, 0.2 * z)                                           # LeakyReLU(0.2)
    attn_full = jnp.dot(z, p_ref[...], preferred_element_type=f32)                # (E, L)
    if bin_ref is not None:
        attn_full = attn_full + bin_ref[...]

    # ---- per-head scores in (H, E) orientation via one tiny contract-minor dot ----
    rep = rep_ref[...]                                                            # (H, L)
    attn_ht = lax.dot_general(rep * (1.0 / dh), attn_full,
                              dimension_numbers=(((1,), (1,)), ((), ())),
                              preferred_element_type=f32)                         # (H, E)

    # ---- per-segment max (softmax stabilizer), assembled at L width with block rows ----
    attn_max = jnp.zeros((S, L), f32)
    for h in range(num_head):                                                     # static, tiny H
        m_h = jnp.max(mask_bias + attn_ht[h:h + 1, :], axis=-1, keepdims=True)    # (S, 1)
        attn_max = attn_max + m_h * rep[h:h + 1, :]                               # fill block h

    # ---- segment softmax (f32 throughout, gathers as onehot_t matmuls) ----
    gath_max = jnp.dot(onehot_t, attn_max, preferred_element_type=f32)            # (E, L)
    attn_val = jnp.exp(attn_full - gath_max)                                      # (E, L)  EUP
    attn_sums = jnp.dot(onehot, attn_val, preferred_element_type=f32)             # (S, L)
    gath_sums = jnp.dot(onehot_t, attn_sums, preferred_element_type=f32)          # (E, L)
    beta = attn_val / (gath_sums + 1e-16)                                         # (E, L)

    # ---- aggregate, weighted segment sum, residual projection, ReLU ----
    aggr = jnp.dot(x_ag_ref[...], w_ag_ref[...], preferred_element_type=f32) + b_ag_ref[...]
    pooled = jnp.dot(onehot, beta * aggr, preferred_element_type=f32)             # (S, L)
    res = jnp.dot(emb_ref[...], w_res_ref[...], preferred_element_type=f32) + b_res_ref[...]
    o_ref[...] = jnp.maximum(pooled + res, 0.0).astype(o_ref.dtype)


def fused_gat_layer(seg_ids, x_att, w_att, b_att, p_scaled, rep, bin_full,
                    x_ag, w_ag, b_ag, emb, w_res, b_res, num_seg, num_head):
    """One InGram attention layer + residual projection + ReLU, fused into one pallas_call."""
    E = x_att.shape[0]
    L = w_ag.shape[1]
    din_att = x_att.shape[1]
    din_ag = x_ag.shape[1]
    has_bin = bin_full is not None

    operands = [
        seg_ids.reshape(1, E).astype(jnp.int32),
        seg_ids.reshape(E, 1).astype(jnp.int32),
        x_att.astype(MXU_DTYPE), w_att.astype(MXU_DTYPE),
        b_att.reshape(1, L).astype(jnp.float32),
        p_scaled.astype(jnp.float32), rep.astype(jnp.float32),
    ]
    if has_bin:
        operands.append(bin_full.astype(jnp.float32))
    operands += [
        x_ag.astype(MXU_DTYPE), w_ag.astype(MXU_DTYPE),
        b_ag.reshape(1, L).astype(jnp.float32),
        emb.astype(MXU_DTYPE), w_res.astype(MXU_DTYPE),
        b_res.reshape(1, L).astype(jnp.float32),
    ]

    flops = 2 * (E * din_att * L + E * L * L + num_head * L * E
                 + E * din_ag * L + num_seg * L * L + 4 * num_seg * E * L)
    bytes_accessed = 4 * (E * (din_att + din_ag + 4 * L) + num_seg * 2 * L
                          + (din_att + din_ag + 2 * L) * L + num_head * L + 2 * E)
    return pl.pallas_call(
        functools.partial(_fused_gat_layer_kernel, num_head=num_head, has_bin=has_bin),
        out_shape=jax.ShapeDtypeStruct((num_seg, L), jnp.float32),
        compiler_params=pltpu.CompilerParams(vmem_limit_bytes=_VMEM_LIMIT),
        cost_estimate=pl.CostEstimate(flops=flops, transcendentals=E * L,
                                      bytes_accessed=bytes_accessed),
    )(*operands)


# ----------------------------------------------------------------------------- small helpers

def _head_mats(dim_out, num_head, attn_vec):
    """(L,L) vec-scaled block pooling matrix (pool@rep fold) and (H,L) block indicator rows."""
    dh = dim_out // num_head
    col_head = jnp.arange(dim_out) // dh
    rep = (jnp.arange(num_head)[:, None] == col_head[None, :]).astype(jnp.float32)    # (H, L)
    block = (col_head[:, None] == col_head[None, :]).astype(jnp.float32)              # (L, L)
    p_scaled = attn_vec.reshape(-1, 1) * block
    return p_scaled, rep


# ----------------------------------------------------------------------------- parameter init

def _xavier_linear(key, fan_in, fan_out, gain):
    std = gain * math.sqrt(2.0 / (fan_in + fan_out))
    w = jax.random.normal(key, (fan_in, fan_out), jnp.float32) * std      # stored (in, out)
    b = jnp.zeros((fan_out,), jnp.float32)
    return w, b


def init_ingram_params(key, dim_ent, hid_ratio_ent, dim_rel, hid_ratio_rel,
                       num_bin, num_layer_ent, num_layer_rel, num_head):
    Lent = hid_ratio_ent * dim_ent
    Lrel = hid_ratio_rel * dim_rel
    gain = math.sqrt(2.0)                      # calculate_gain('relu')
    keys = iter(jax.random.split(key, 64))
    p = {}
    p["ent_proj1"] = _xavier_linear(next(keys), dim_ent, Lent, gain)
    p["ent_proj2"] = _xavier_linear(next(keys), Lent, dim_ent, gain)
    p["rel_proj1"] = _xavier_linear(next(keys), dim_rel, Lrel, gain)
    p["rel_proj2"] = _xavier_linear(next(keys), Lrel, dim_rel, gain)
    # rel_proj is only used by InGram.score() in the reference, never in forward(); kept for parity
    p["rel_proj"] = _xavier_linear(next(keys), dim_rel, dim_ent, gain)

    dh_ent = Lent // num_head
    dh_rel = Lrel // num_head
    ent_layers, rel_layers = [], []
    for _ in range(num_layer_ent):
        ent_layers.append({
            "attn_proj": _xavier_linear(next(keys), 2 * Lent + Lrel, Lent, gain),
            "aggr_proj": _xavier_linear(next(keys), Lent + Lrel, Lent, gain),
            "attn_vec": jax.random.normal(next(keys), (Lent,), jnp.float32)
                        * (gain * math.sqrt(2.0 / (num_head * dh_ent + dh_ent))),
        })
    for _ in range(num_layer_rel):
        rel_layers.append({
            "attn_proj": _xavier_linear(next(keys), 2 * Lrel, Lrel, gain),
            "aggr_proj": _xavier_linear(next(keys), Lrel, Lrel, gain),
            "attn_vec": jax.random.normal(next(keys), (Lrel,), jnp.float32)
                        * (gain * math.sqrt(2.0 / (num_head * dh_rel + dh_rel))),
            "attn_bin": jnp.zeros((num_bin, num_head), jnp.float32),   # torch init: zeros
        })
    p["layers_ent"] = ent_layers
    p["layers_rel"] = rel_layers
    p["res_proj_ent"] = [_xavier_linear(next(keys), Lent, Lent, gain) for _ in range(num_layer_ent)]
    p["res_proj_rel"] = [_xavier_linear(next(keys), Lrel, Lrel, gain) for _ in range(num_layer_rel)]
    return p


# ----------------------------------------------------------------------------- forward passes

def entity_layer_forward(lp, w_res, b_res, emb_ent, emb_rel, triplets, num_head):
    """One InGramEntityLayer + residual projection + ReLU (fused into one pallas_call)."""
    num_ent = emb_ent.shape[0]
    L = lp["aggr_proj"][0].shape[1]
    head, rel, tail = triplets[:, 0], triplets[:, 1], triplets[:, 2]

    rel_embs_edges = jnp.take(emb_rel, rel, axis=0)                       # (T, Lrel)
    self_rel = pallas_self_rel(tail, rel_embs_edges, num_ent)             # (num_ent, Lrel)

    emb_rels = jnp.concatenate([rel_embs_edges, self_rel], axis=0)        # (E, Lrel)
    self_idx = jnp.arange(num_ent, dtype=tail.dtype)
    head_all = jnp.concatenate([head, self_idx], axis=0)
    tail_all = jnp.concatenate([tail, self_idx], axis=0)

    ent_tail = jnp.take(emb_ent, tail_all, axis=0)
    ent_head = jnp.take(emb_ent, head_all, axis=0)
    x_att = jnp.concatenate([ent_tail, ent_head, emb_rels], axis=-1)      # (E, 2*Lent+Lrel)
    x_ag = jnp.concatenate([ent_head, emb_rels], axis=-1)                 # (E, Lent+Lrel)

    p_scaled, rep = _head_mats(L, num_head, lp["attn_vec"])
    w_att, b_att = lp["attn_proj"]
    w_ag, b_ag = lp["aggr_proj"]
    return fused_gat_layer(tail_all, x_att, w_att, b_att, p_scaled, rep, None,
                           x_ag, w_ag, b_ag, emb_ent, w_res, b_res, num_ent, num_head)


def relation_layer_forward(lp, w_res, b_res, emb_rel, rel_triplets, num_head):
    """One InGramRelationLayer + residual projection + ReLU (fused into one pallas_call)."""
    num_rel = emb_rel.shape[0]
    L = lp["aggr_proj"][0].shape[1]
    dh = L // num_head
    head, tail, bins = rel_triplets[:, 0], rel_triplets[:, 1], rel_triplets[:, 2]

    rel_head = jnp.take(emb_rel, head, axis=0)
    rel_tail = jnp.take(emb_rel, tail, axis=0)
    x_att = jnp.concatenate([rel_head, rel_tail], axis=-1)                # (T, 2*Lrel)
    x_ag = rel_tail                                                       # (T, Lrel)
    attn_bin_full = jnp.repeat(lp["attn_bin"], dh, axis=1)                # (num_bin, L) tiny table
    bin_full = jnp.take(attn_bin_full, bins, axis=0)                      # (T, L)

    p_scaled, rep = _head_mats(L, num_head, lp["attn_vec"])
    w_att, b_att = lp["attn_proj"]
    w_ag, b_ag = lp["aggr_proj"]
    return fused_gat_layer(head, x_att, w_att, b_att, p_scaled, rep, bin_full,
                           x_ag, w_ag, b_ag, emb_rel, w_res, b_res, num_rel, num_head)


def ingram_forward(params, emb_ent, emb_rel, triplets, relation_triplets, num_head):
    w, b = params["ent_proj1"]
    layer_emb_ent = pallas_linear(emb_ent, w, b)
    w, b = params["rel_proj1"]
    layer_emb_rel = pallas_linear(emb_rel, w, b)

    for lp, (wr, br) in zip(params["layers_rel"], params["res_proj_rel"]):
        layer_emb_rel = relation_layer_forward(lp, wr, br, layer_emb_rel,
                                               relation_triplets, num_head)

    for lp, (wr, br) in zip(params["layers_ent"], params["res_proj_ent"]):
        layer_emb_ent = entity_layer_forward(lp, wr, br, layer_emb_ent, layer_emb_rel,
                                             triplets, num_head)

    w, b = params["ent_proj2"]
    out_ent = pallas_linear(layer_emb_ent, w, b)
    w, b = params["rel_proj2"]
    out_rel = pallas_linear(layer_emb_rel, w, b)
    return out_ent, out_rel


# ----------------------------------------------------------------------------- main

if __name__ == "__main__":
    key = jax.random.PRNGKey(0)
    (k_ent, k_rel, k_h, k_r, k_t, k_rh, k_rt, k_rb, k_params) = jax.random.split(key, 9)

    dim_ent, dim_rel = 32, 32
    hid_ratio_ent, hid_ratio_rel = 4, 4       # hidden width 128 -> lane-dense layer outputs
    num_bin, num_head = 10, 8
    num_layer_ent, num_layer_rel = 2, 2
    num_ent, num_rel = 32, 16
    num_trip, num_rel_trip = 64, 32

    emb_ent = jax.random.normal(k_ent, (num_ent, dim_ent), jnp.float32)
    emb_rel = jax.random.normal(k_rel, (num_rel, dim_rel), jnp.float32)
    triplets = jnp.stack([
        jax.random.randint(k_h, (num_trip,), 0, num_ent, dtype=jnp.int32),
        jax.random.randint(k_r, (num_trip,), 0, num_rel, dtype=jnp.int32),
        jax.random.randint(k_t, (num_trip,), 0, num_ent, dtype=jnp.int32),
    ], axis=1)
    relation_triplets = jnp.stack([
        jax.random.randint(k_rh, (num_rel_trip,), 0, num_rel, dtype=jnp.int32),
        jax.random.randint(k_rt, (num_rel_trip,), 0, num_rel, dtype=jnp.int32),
        jax.random.randint(k_rb, (num_rel_trip,), 0, num_bin, dtype=jnp.int32),
    ], axis=1)

    params = init_ingram_params(k_params, dim_ent, hid_ratio_ent, dim_rel, hid_ratio_rel,
                                num_bin, num_layer_ent, num_layer_rel, num_head)

    fwd = jax.jit(ingram_forward, static_argnames=("num_head",))
    out_ent, out_rel = fwd(params, emb_ent, emb_rel, triplets, relation_triplets,
                           num_head=num_head)
    jax.block_until_ready((out_ent, out_rel))
    assert out_ent.shape == (num_ent, dim_ent) and out_rel.shape == (num_rel, dim_rel)
    assert bool(jnp.all(jnp.isfinite(out_ent))) and bool(jnp.all(jnp.isfinite(out_rel)))
    print("KERNEL_OK")
</pallas_src>

<mosaic_0001>
module attributes {stable_mosaic.version = 11 : i64} {
  func.func @_linear_kernel(%arg0: memref<16x32xbf16, #tpu.memory_space<vmem>>, %arg1: memref<32x128xbf16, #tpu.memory_space<vmem>>, %arg2: memref<1x128xf32, #tpu.memory_space<vmem>>, %arg3: memref<16x128xf32, #tpu.memory_space<vmem>>) attributes {dimension_semantics = [], scalar_prefetch = 0 : i64, scratch_operands = 0 : i64, tpu.core_type = #tpu.core_type<tc>} {
    %c0 = arith.constant 0 : index
    %c0_0 = arith.constant 0 : index
    %0 = vector.load %arg0[%c0, %c0_0] : memref<16x32xbf16, #tpu.memory_space<vmem>>, vector<16x32xbf16>
    %c0_1 = arith.constant 0 : index
    %c0_2 = arith.constant 0 : index
    %1 = vector.load %arg1[%c0_1, %c0_2] : memref<32x128xbf16, #tpu.memory_space<vmem>>, vector<32x128xbf16>
    %cst = arith.constant dense<0.000000e+00> : vector<16x128xf32>
    %2 = tpu.matmul %0, %1, %cst {dimension_numbers = #tpu.dot_dimension_numbers<[1], [0], [0], [1], [0, 0, 1, 1], [], []>} : vector<16x32xbf16>, vector<32x128xbf16>, vector<16x128xf32> -> vector<16x128xf32>
    %c0_3 = arith.constant 0 : index
    %c0_4 = arith.constant 0 : index
    %3 = vector.load %arg2[%c0_3, %c0_4] : memref<1x128xf32, #tpu.memory_space<vmem>>, vector<1x128xf32>
    %4 = vector.broadcast %3 : vector<1x128xf32> to vector<16x128xf32>
    %5 = arith.addf %2, %4 : vector<16x128xf32>
    %c0_5 = arith.constant 0 : index
    %c0_6 = arith.constant 0 : index
    %6 = vector.load %arg3[%c0_5, %c0_6] : memref<16x128xf32, #tpu.memory_space<vmem>>, vector<16x128xf32>
    tpu.vector_store %arg3[%c0_5, %c0_6], %5 {strides = array<i32>} : memref<16x128xf32, #tpu.memory_space<vmem>>, vector<16x128xf32>,
    return
  }
}

module attributes {stable_mosaic.version = 11 : i64} {
  func.func @_fused_gat_layer_kernel(%arg0: memref<1x32xi32, #tpu.memory_space<vmem>>, %arg1: memref<32x1xi32, #tpu.memory_space<vmem>>, %arg2: memref<32x256xbf16, #tpu.memory_space<vmem>>, %arg3: memref<256x128xbf16, #tpu.memory_space<vmem>>, %arg4: memref<1x128xf32, #tpu.memory_space<vmem>>, %arg5: memref<128x128xf32, #tpu.memory_space<vmem>>, %arg6: memref<8x128xf32, #tpu.memory_space<vmem>>, %arg7: memref<32x128xf32, #tpu.memory_space<vmem>>, %arg8: memref<32x128xbf16, #tpu.memory_space<vmem>>, %arg9: memref<128x128xbf16, #tpu.memory_space<vmem>>, %arg10: memref<1x128xf32, #tpu.memory_space<vmem>>, %arg11: memref<16x128xbf16, #tpu.memory_space<vmem>>, %arg12: memref<128x128xbf16, #tpu.memory_space<vmem>>, %arg13: memref<1x128xf32, #tpu.memory_space<vmem>>, %arg14: memref<16x128xf32, #tpu.memory_space<vmem>>) attributes {dimension_semantics = [], scalar_prefetch = 0 : i64, scratch_operands = 0 : i64, tpu.core_type = #tpu.core_type<tc>} {
    %0 = tpu.iota {dimensions = array<i32: 0>} : vector<16x32xi32>
    %c0 = arith.constant 0 : index
    %c0_0 = arith.constant 0 : index
    %1 = vector.load %arg0[%c0, %c0_0] : memref<1x32xi32, #tpu.memory_space<vmem>>, vector<1x32xi32>
    %2 = vector.broadcast %1 : vector<1x32xi32> to vector<16x32xi32>
    %3 = arith.cmpi eq, %0, %2 : vector<16x32xi32>
    %cst = arith.constant 1.000000e+00 : f32
    %cst_1 = arith.constant 0.000000e+00 : f32
    %4 = vector.broadcast %cst : f32 to vector<16x32xf32>
    %5 = vector.broadcast %cst_1 : f32 to vector<16x32xf32>
    %6 = arith.select %3, %4, %5 : vector<16x32xi1>, vector<16x32xf32>
    %cst_2 = arith.constant 0.000000e+00 : f32
    %cst_3 = arith.constant -1.000000e+30 : f32
    %7 = vector.broadcast %cst_2 : f32 to vector<16x32xf32>
    %8 = vector.broadcast %cst_3 : f32 to vector<16x32xf32>
    %9 = arith.select %3, %7, %8 : vector<16x32xi1>, vector<16x32xf32>
    %10 = tpu.iota {dimensions = array<i32: 1>} : vector<32x16xi32>
    %c0_4 = arith.constant 0 : index
    %c0_5 = arith.constant 0 : index
    %11 = vector.load %arg1[%c0_4, %c0_5] : memref<32x1xi32, #tpu.memory_space<vmem>>, vector<32x1xi32>
    %12 = vector.broadcast %11 : vector<32x1xi32> to vector<32x16xi32>
    %13 = arith.cmpi eq, %10, %12 : vector<32x16xi32>
    %cst_6 = arith.constant 1.000000e+00 : f32
    %cst_7 = arith.constant 0.000000e+00 : f32
    %14 = vector.broadcast %cst_6 : f32 to vector<32x16xf32>
    %15 = vector.broadcast %cst_7 : f32 to vector<32x16xf32>
    %16 = arith.select %13, %14, %15 : vector<32x16xi1>, vector<32x16xf32>
    %c0_8 = arith.constant 0 : index
    %c0_9 = arith.constant 0 : index
    %17 = vector.load %arg2[%c0_8, %c0_9] : memref<32x256xbf16, #tpu.memory_space<vmem>>, vector<32x256xbf16>
    %c0_10 = arith.constant 0 : index
    %c0_11 = arith.constant 0 : index
    %18 = vector.load %arg3[%c0_10, %c0_11] : memref<256x128xbf16, #tpu.memory_space<vmem>>, vector<256x128xbf16>
    %cst_12 = arith.constant dense<0.000000e+00> : vector<32x128xf32>
    %19 = tpu.matmul %17, %18, %cst_12 {dimension_numbers = #tpu.dot_dimension_numbers<[1], [0], [0], [1], [0, 0, 1, 1], [], []>} : vector<32x256xbf16>, vector<256x128xbf16>, vector<32x128xf32> -> vector<32x128xf32>
    %c0_13 = arith.constant 0 : index
    %c0_14 = arith.constant 0 : index
    %20 = vector.load %arg4[%c0_13, %c0_14] : memref<1x128xf32, #tpu.memory_space<vmem>>, vector<1x128xf32>
    %21 = vector.broadcast %20 : vector<1x128xf32> to vector<32x128xf32>
    %22 = arith.addf %19, %21 : vector<32x128xf32>
    %cst_15 = arith.constant 0.000000e+00 : f32
    %23 = vector.broadcast %cst_15 : f32 to vector<32x128xf32>
    %24 = arith.cmpf oge, %22, %23 : vector<32x128xf32>
    %cst_16 = arith.constant 2.000000e-01 : f32
    %25 = vector.broadcast %cst_16 : f32 to vector<32x128xf32>
    %26 = arith.mulf %25, %22 : vector<32x128xf32>
    %27 = arith.select %24, %22, %26 : vector<32x128xi1>, vector<32x128xf32>
    %c0_17 = arith.constant 0 : index
    %c0_18 = arith.constant 0 : index
    %28 = vector.load %arg5[%c0_17, %c0_18] : memref<128x128xf32, #tpu.memory_space<vmem>>, vector<128x128xf32>
    %cst_19 = arith.constant dense<0.000000e+00> : vector<32x128xf32>
    %29 = tpu.matmul %27, %28, %cst_19 {dimension_numbers = #tpu.dot_dimension_numbers<[1], [0], [0], [1], [0, 0, 1, 1], [], []>} : vector<32x128xf32>, vector<128x128xf32>, vector<32x128xf32> -> vector<32x128xf32>
    %c0_20 = arith.constant 0 : index
    %c0_21 = arith.constant 0 : index
    %30 = vector.load %arg7[%c0_20, %c0_21] : memref<32x128xf32, #tpu.memory_space<vmem>>, vector<32x128xf32>
    %31 = arith.addf %29, %30 : vector<32x128xf32>
    %c0_22 = arith.constant 0 : index
    %c0_23 = arith.constant 0 : index
    %32 = vector.load %arg6[%c0_22, %c0_23] : memref<8x128xf32, #tpu.memory_space<vmem>>, vector<8x128xf32>
    %cst_24 = arith.constant 6.250000e-02 : f32
    %33 = vector.broadcast %cst_24 : f32 to vector<8x128xf32>
    %34 = arith.mulf %32, %33 : vector<8x128xf32>
    %cst_25 = arith.constant dense<0.000000e+00> : vector<8x32xf32>
    %35 = tpu.matmul %34, %31, %cst_25 {dimension_numbers = #tpu.dot_dimension_numbers<[1], [1], [0], [0], [0, 0, 1, 0], [], []>} : vector<8x128xf32>, vector<32x128xf32>, vector<8x32xf32> -> vector<8x32xf32>
    %cst_26 = arith.constant 0.000000e+00 : f32
    %36 = vector.broadcast %cst_26 : f32 to vector<16x128xf32>
    %37 = vector.extract_strided_slice %35 {offsets = [0, 0], sizes = [1, 32], strides = [1, 1]} : vector<8x32xf32> to vector<1x32xf32>
    %38 = vector.broadcast %37 : vector<1x32xf32> to vector<16x32xf32>
    %39 = arith.addf %9, %38 : vector<16x32xf32>
    %cst_27 = arith.constant dense<0xFF800000> : vector<16xf32>
    %40 = vector.multi_reduction <maximumf>, %39, %cst_27 [1] : vector<16x32xf32> to vector<16xf32>
    %41 = vector.shape_cast %40 : vector<16xf32> to vector<16x1xf32>
    %42 = vector.extract_strided_slice %32 {offsets = [0, 0], sizes = [1, 128], strides = [1, 1]} : vector<8x128xf32> to vector<1x128xf32>
    %43 = vector.broadcast %41 : vector<16x1xf32> to vector<16x128xf32>
    %44 = vector.broadcast %42 : vector<1x128xf32> to vector<16x128xf32>
    %45 = arith.mulf %43, %44 : vector<16x128xf32>
    %46 = arith.addf %36, %45 : vector<16x128xf32>
    %47 = vector.extract_strided_slice %35 {offsets = [1, 0], sizes = [1, 32], strides = [1, 1]} : vector<8x32xf32> to vector<1x32xf32>
    %48 = vector.broadcast %47 : vector<1x32xf32> to vector<16x32xf32>
    %49 = arith.addf %9, %48 : vector<16x32xf32>
    %cst_28 = arith.constant dense<0xFF800000> : vector<16xf32>
    %50 = vector.multi_reduction <maximumf>, %49, %cst_28 [1] : vector<16x32xf32> to vector<16xf32>
    %51 = vector.shape_cast %50 : vector<16xf32> to vector<16x1xf32>
    %52 = vector.extract_strided_slice %32 {offsets = [1, 0], sizes = [1, 128], strides = [1, 1]} : vector<8x128xf32> to vector<1x128xf32>
    %53 = vector.broadcast %51 : vector<16x1xf32> to vector<16x128xf32>
    %54 = vector.broadcast %52 : vector<1x128xf32> to vector<16x128xf32>
    %55 = arith.mulf %53, %54 : vector<16x128xf32>
    %56 = arith.addf %46, %55 : vector<16x128xf32>
    %57 = vector.extract_strided_slice %35 {offsets = [2, 0], sizes = [1, 32], strides = [1, 1]} : vector<8x32xf32> to vector<1x32xf32>
    %58 = vector.broadcast %57 : vector<1x32xf32> to vector<16x32xf32>
    %59 = arith.addf %9, %58 : vector<16x32xf32>
    %cst_29 = arith.constant dense<0xFF800000> : vector<16xf32>
    %60 = vector.multi_reduction <maximumf>, %59, %cst_29 [1] : vector<16x32xf32> to vector<16xf32>
    %61 = vector.shape_cast %60 : vector<16xf32> to vector<16x1xf32>
    %62 = vector.extract_strided_slice %32 {offsets = [2, 0], sizes = [1, 128], strides = [1, 1]} : vector<8x128xf32> to vector<1x128xf32>
    %63 = vector.broadcast %61 : vector<16x1xf32> to vector<16x128xf32>
    %64 = vector.broadcast %62 : vector<1x128xf32> to vector<16x128xf32>
    %65 = arith.mulf %63, %64 : vector<16x128xf32>
    %66 = arith.addf %56, %65 : vector<16x128xf32>
    %67 = vector.extract_strided_slice %35 {offsets = [3, 0], sizes = [1, 32], strides = [1, 1]} : vector<8x32xf32> to vector<1x32xf32>
    %68 = vector.broadcast %67 : vector<1x32xf32> to vector<16x32xf32>
    %69 = arith.addf %9, %68 : vector<16x32xf32>
    %cst_30 = arith.constant dense<0xFF800000> : vector<16xf32>
    %70 = vector.multi_reduction <maximumf>, %69, %cst_30 [1] : vector<16x32xf32> to vector<16xf32>
    %71 = vector.shape_cast %70 : vector<16xf32> to vector<16x1xf32>
    %72 = vector.extract_strided_slice %32 {offsets = [3, 0], sizes = [1, 128], strides = [1, 1]} : vector<8x128xf32> to vector<1x128xf32>
    %73 = vector.broadcast %71 : vector<16x1xf32> to vector<16x128xf32>
    %74 = vector.broadcast %72 : vector<1x128xf32> to vector<16x128xf32>
    %75 = arith.mulf %73, %74 : vector<16x128xf32>
    %76 = arith.addf %66, %75 : vector<16x128xf32>
    %77 = vector.extract_strided_slice %35 {offsets = [4, 0], sizes = [1, 32], strides = [1, 1]} : vector<8x32xf32> to vector<1x32xf32>
    %78 = vector.broadcast %77 : vector<1x32xf32> to vector<16x32xf32>
    %79 = arith.addf %9, %78 : vector<16x32xf32>
    %cst_31 = arith.constant dense<0xFF800000> : vector<16xf32>
    %80 = vector.multi_reduction <maximumf>, %79, %cst_31 [1] : vector<16x32xf32> to vector<16xf32>
    %81 = vector.shape_cast %80 : vector<16xf32> to vector<16x1xf32>
    %82 = vector.extract_strided_slice %32 {offsets = [4, 0], sizes = [1, 128], strides = [1, 1]} : vector<8x128xf32> to vector<1x128xf32>
    %83 = vector.broadcast %81 : vector<16x1xf32> to vector<16x128xf32>
    %84 = vector.broadcast %82 : vector<1x128xf32> to vector<16x128xf32>
    %85 = arith.mulf %83, %84 : vector<16x128xf32>
    %86 = arith.addf %76, %85 : vector<16x128xf32>
    %87 = vector.extract_strided_slice %35 {offsets = [5, 0], sizes = [1, 32], strides = [1, 1]} : vector<8x32xf32> to vector<1x32xf32>
    %88 = vector.broadcast %87 : vector<1x32xf32> to vector<16x32xf32>
    %89 = arith.addf %9, %88 : vector<16x32xf32>
    %cst_32 = arith.constant dense<0xFF800000> : vector<16xf32>
    %90 = vector.multi_reduction <maximumf>, %89, %cst_32 [1] : vector<16x32xf32> to vector<16xf32>
    %91 = vector.shape_cast %90 : vector<16xf32> to vector<16x1xf32>
    %92 = vector.extract_strided_slice %32 {offsets = [5, 0], sizes = [1, 128], strides = [1, 1]} : vector<8x128xf32> to vector<1x128xf32>
    %93 = vector.broadcast %91 : vector<16x1xf32> to vector<16x128xf32>
    %94 = vector.broadcast %92 : vector<1x128xf32> to vector<16x128xf32>
    %95 = arith.mulf %93, %94 : vector<16x128xf32>
    %96 = arith.addf %86, %95 : vector<16x128xf32>
    %97 = vector.extract_strided_slice %35 {offsets = [6, 0], sizes = [1, 32], strides = [1, 1]} : vector<8x32xf32> to vector<1x32xf32>
    %98 = vector.broadcast %97 : vector<1x32xf32> to vector<16x32xf32>
    %99 = arith.addf %9, %98 : vector<16x32xf32>
    %cst_33 = arith.constant dense<0xFF800000> : vector<16xf32>
    %100 = vector.multi_reduction <maximumf>, %99, %cst_33 [1] : vector<16x32xf32> to vector<16xf32>
    %101 = vector.shape_cast %100 : vector<16xf32> to vector<16x1xf32>
    %102 = vector.extract_strided_slice %32 {offsets = [6, 0], sizes = [1, 128], strides = [1, 1]} : vector<8x128xf32> to vector<1x128xf32>
    %103 = vector.broadcast %101 : vector<16x1xf32> to vector<16x128xf32>
    %104 = vector.broadcast %102 : vector<1x128xf32> to vector<16x128xf32>
    %105 = arith.mulf %103, %104 : vector<16x128xf32>
    %106 = arith.addf %96, %105 : vector<16x128xf32>
    %107 = vector.extract_strided_slice %35 {offsets = [7, 0], sizes = [1, 32], strides = [1, 1]} : vector<8x32xf32> to vector<1x32xf32>
    %108 = vector.broadcast %107 : vector<1x32xf32> to vector<16x32xf32>
    %109 = arith.addf %9, %108 : vector<16x32xf32>
    %cst_34 = arith.constant dense<0xFF800000> : vector<16xf32>
    %110 = vector.multi_reduction <maximumf>, %109, %cst_34 [1] : vector<16x32xf32> to vector<16xf32>
    %111 = vector.shape_cast %110 : vector<16xf32> to vector<16x1xf32>
    %112 = vector.extract_strided_slice %32 {offsets = [7, 0], sizes = [1, 128], strides = [1, 1]} : vector<8x128xf32> to vector<1x128xf32>
    %113 = vector.broadcast %111 : vector<16x1xf32> to vector<16x128xf32>
    %114 = vector.broadcast %112 : vector<1x128xf32> to vector<16x128xf32>
    %115 = arith.mulf %113, %114 : vector<16x128xf32>
    %116 = arith.addf %106, %115 : vector<16x128xf32>
    %cst_35 = arith.constant dense<0.000000e+00> : vector<32x128xf32>
    %117 = tpu.matmul %16, %116, %cst_35 {dimension_numbers = #tpu.dot_dimension_numbers<[1], [0], [0], [1], [0, 0, 1, 1], [], []>} : vector<32x16xf32>, vector<16x128xf32>, vector<32x128xf32> -> vector<32x128xf32>
    %118 = arith.subf %31, %117 : vector<32x128xf32>
    %119 = math.exp %118 : vector<32x128xf32>
    %cst_36 = arith.constant dense<0.000000e+00> : vector<16x128xf32>
    %120 = tpu.matmul %6, %119, %cst_36 {dimension_numbers = #tpu.dot_dimension_numbers<[1], [0], [0], [1], [0, 0, 1, 1], [], []>} : vector<16x32xf32>, vector<32x128xf32>, vector<16x128xf32> -> vector<16x128xf32>
    %cst_37 = arith.constant dense<0.000000e+00> : vector<32x128xf32>
    %121 = tpu.matmul %16, %120, %cst_37 {dimension_numbers = #tpu.dot_dimension_numbers<[1], [0], [0], [1], [0, 0, 1, 1], [], []>} : vector<32x16xf32>, vector<16x128xf32>, vector<32x128xf32> -> vector<32x128xf32>
    %cst_38 = arith.constant 1.000000e-16 : f32
    %122 = vector.broadcast %cst_38 : f32 to vector<32x128xf32>
    %123 = arith.addf %121, %122 : vector<32x128xf32>
    %124 = arith.divf %119, %123 : vector<32x128xf32>
    %c0_39 = arith.constant 0 : index
    %c0_40 = arith.constant 0 : index
    %125 = vector.load %arg8[%c0_39, %c0_40] : memref<32x128xbf16, #tpu.memory_space<vmem>>, vector<32x128xbf16>
    %c0_41 = arith.constant 0 : index
    %c0_42 = arith.constant 0 : index
    %126 = vector.load %arg9[%c0_41, %c0_42] : memref<128x128xbf16, #tpu.memory_space<vmem>>, vector<128x128xbf16>
    %cst_43 = arith.constant dense<0.000000e+00> : vector<32x128xf32>
    %127 = tpu.matmul %125, %126, %cst_43 {dimension_numbers = #tpu.dot_dimension_numbers<[1], [0], [0], [1], [0, 0, 1, 1], [], []>} : vector<32x128xbf16>, vector<128x128xbf16>, vector<32x128xf32> -> vector<32x128xf32>
    %c0_44 = arith.constant 0 : index
    %c0_45 = arith.constant 0 : index
    %128 = vector.load %arg10[%c0_44, %c0_45] : memref<1x128xf32, #tpu.memory_space<vmem>>, vector<1x128xf32>
    %129 = vector.broadcast %128 : vector<1x128xf32> to vector<32x128xf32>
    %130 = arith.addf %127, %129 : vector<32x128xf32>
    %131 = arith.mulf %124, %130 : vector<32x128xf32>
    %cst_46 = arith.constant dense<0.000000e+00> : vector<16x128xf32>
    %132 = tpu.matmul %6, %131, %cst_46 {dimension_numbers = #tpu.dot_dimension_numbers<[1], [0], [0], [1], [0, 0, 1, 1], [], []>} : vector<16x32xf32>, vector<32x128xf32>, vector<16x128xf32> -> vector<16x128xf32>
    %c0_47 = arith.constant 0 : index
    %c0_48 = arith.constant 0 : index
    %133 = vector.load %arg11[%c0_47, %c0_48] : memref<16x128xbf16, #tpu.memory_space<vmem>>, vector<16x128xbf16>
    %c0_49 = arith.constant 0 : index
    %c0_50 = arith.constant 0 : index
    %134 = vector.load %arg12[%c0_49, %c0_50] : memref<128x128xbf16, #tpu.memory_space<vmem>>, vector<128x128xbf16>
    %cst_51 = arith.constant dense<0.000000e+00> : vector<16x128xf32>
    %135 = tpu.matmul %133, %134, %cst_51 {dimension_numbers = #tpu.dot_dimension_numbers<[1], [0], [0], [1], [0, 0, 1, 1], [], []>} : vector<16x128xbf16>, vector<128x128xbf16>, vector<16x128xf32> -> vector<16x128xf32>
    %c0_52 = arith.constant 0 : index
    %c0_53 = arith.constant 0 : index
    %136 = vector.load %arg13[%c0_52, %c0_53] : memref<1x128xf32, #tpu.memory_space<vmem>>, vector<1x128xf32>
    %137 = vector.broadcast %136 : vector<1x128xf32> to vector<16x128xf32>
    %138 = arith.addf %135, %137 : vector<16x128xf32>
    %139 = arith.addf %132, %138 : vector<16x128xf32>
    %cst_54 = arith.constant 0.000000e+00 : f32
    %140 = vector.broadcast %cst_54 : f32 to vector<16x128xf32>
    %141 = arith.maximumf %139, %140 : vector<16x128xf32>
    %c0_55 = arith.constant 0 : index
    %c0_56 = arith.constant 0 : index
    %142 = vector.load %arg14[%c0_55, %c0_56] : memref<16x128xf32, #tpu.memory_space<vmem>>, vector<16x128xf32>
    tpu.vector_store %arg14[%c0_55, %c0_56], %141 {strides = array<i32>} : memref<16x128xf32, #tpu.memory_space<vmem>>, vector<16x128xf32>,
    return
  }
}

module attributes {stable_mosaic.version = 11 : i64} {
  func.func @_self_rel_kernel(%arg0: memref<1x64xi32, #tpu.memory_space<vmem>>, %arg1: memref<64x129xf32, #tpu.memory_space<vmem>>, %arg2: memref<32x128xf32, #tpu.memory_space<vmem>>) attributes {dimension_semantics = [], scalar_prefetch = 0 : i64, scratch_operands = 0 : i64, tpu.core_type = #tpu.core_type<tc>} {
    %0 = tpu.iota {dimensions = array<i32: 0>} : vector<32x64xi32>
    %c0 = arith.constant 0 : index
    %c0_0 = arith.constant 0 : index
    %1 = vector.load %arg0[%c0, %c0_0] : memref<1x64xi32, #tpu.memory_space<vmem>>, vector<1x64xi32>
    %2 = vector.broadcast %1 : vector<1x64xi32> to vector<32x64xi32>
    %3 = arith.cmpi eq, %0, %2 : vector<32x64xi32>
    %cst = arith.constant 1.000000e+00 : f32
    %cst_1 = arith.constant 0.000000e+00 : f32
    %4 = vector.broadcast %cst : f32 to vector<32x64xf32>
    %5 = vector.broadcast %cst_1 : f32 to vector<32x64xf32>
    %6 = arith.select %3, %4, %5 : vector<32x64xi1>, vector<32x64xf32>
    %c0_2 = arith.constant 0 : index
    %c0_3 = arith.constant 0 : index
    %7 = vector.load %arg1[%c0_2, %c0_3] : memref<64x129xf32, #tpu.memory_space<vmem>>, vector<64x129xf32>
    %cst_4 = arith.constant dense<0.000000e+00> : vector<32x129xf32>
    %8 = tpu.matmul %6, %7, %cst_4 {dimension_numbers = #tpu.dot_dimension_numbers<[1], [0], [0], [1], [0, 0, 1, 1], [], []>} : vector<32x64xf32>, vector<64x129xf32>, vector<32x129xf32> -> vector<32x129xf32>
    %9 = vector.extract_strided_slice %8 {offsets = [0, 128], sizes = [32, 1], strides = [1, 1]} : vector<32x129xf32> to vector<32x1xf32>
    %10 = vector.extract_strided_slice %8 {offsets = [0, 0], sizes = [32, 128], strides = [1, 1]} : vector<32x129xf32> to vector<32x128xf32>
    %cst_5 = arith.constant 1.000000e-16 : f32
    %11 = vector.broadcast %cst_5 : f32 to vector<32x1xf32>
    %12 = arith.addf %9, %11 : vector<32x1xf32>
    %13 = vector.broadcast %12 : vector<32x1xf32> to vector<32x128xf32>
    %14 = arith.divf %10, %13 : vector<32x128xf32>
    %c0_6 = arith.constant 0 : index
    %c0_7 = arith.constant 0 : index
    %15 = vector.load %arg2[%c0_6, %c0_7] : memref<32x128xf32, #tpu.memory_space<vmem>>, vector<32x128xf32>
    tpu.vector_store %arg2[%c0_6, %c0_7], %14 {strides = array<i32>} : memref<32x128xf32, #tpu.memory_space<vmem>>, vector<32x128xf32>,
    return
  }
}

module attributes {stable_mosaic.version = 11 : i64} {
  func.func @_linear_kernel(%arg0: memref<32x32xbf16, #tpu.memory_space<vmem>>, %arg1: memref<32x128xbf16, #tpu.memory_space<vmem>>, %arg2: memref<1x128xf32, #tpu.memory_space<vmem>>, %arg3: memref<32x128xf32, #tpu.memory_space<vmem>>) attributes {dimension_semantics = [], scalar_prefetch = 0 : i64, scratch_operands = 0 : i64, tpu.core_type = #tpu.core_type<tc>} {
    %c0 = arith.constant 0 : index
    %c0_0 = arith.constant 0 : index
    %0 = vector.load %arg0[%c0, %c0_0] : memref<32x32xbf16, #tpu.memory_space<vmem>>, vector<32x32xbf16>
    %c0_1 = arith.constant 0 : index
    %c0_2 = arith.constant 0 : index
    %1 = vector.load %arg1[%c0_1, %c0_2] : memref<32x128xbf16, #tpu.memory_space<vmem>>, vector<32x128xbf16>
    %cst = arith.constant dense<0.000000e+00> : vector<32x128xf32>
    %2 = tpu.matmul %0, %1, %cst {dimension_numbers = #tpu.dot_dimension_numbers<[1], [0], [0], [1], [0, 0, 1, 1], [], []>} : vector<32x32xbf16>, vector<32x128xbf16>, vector<32x128xf32> -> vector<32x128xf32>
    %c0_3 = arith.constant 0 : index
    %c0_4 = arith.constant 0 : index
    %3 = vector.load %arg2[%c0_3, %c0_4] : memref<1x128xf32, #tpu.memory_space<vmem>>, vector<1x128xf32>
    %4 = vector.broadcast %3 : vector<1x128xf32> to vector<32x128xf32>
    %5 = arith.addf %2, %4 : vector<32x128xf32>
    %c0_5 = arith.constant 0 : index
    %c0_6 = arith.constant 0 : index
    %6 = vector.load %arg3[%c0_5, %c0_6] : memref<32x128xf32, #tpu.memory_space<vmem>>, vector<32x128xf32>
    tpu.vector_store %arg3[%c0_5, %c0_6], %5 {strides = array<i32>} : memref<32x128xf32, #tpu.memory_space<vmem>>, vector<32x128xf32>,
    return
  }
}

module attributes {stable_mosaic.version = 11 : i64} {
  func.func @_fused_gat_layer_kernel(%arg0: memref<1x96xi32, #tpu.memory_space<vmem>>, %arg1: memref<96x1xi32, #tpu.memory_space<vmem>>, %arg2: memref<96x384xbf16, #tpu.memory_space<vmem>>, %arg3: memref<384x128xbf16, #tpu.memory_space<vmem>>, %arg4: memref<1x128xf32, #tpu.memory_space<vmem>>, %arg5: memref<128x128xf32, #tpu.memory_space<vmem>>, %arg6: memref<8x128xf32, #tpu.memory_space<vmem>>, %arg7: memref<96x256xbf16, #tpu.memory_space<vmem>>, %arg8: memref<256x128xbf16, #tpu.memory_space<vmem>>, %arg9: memref<1x128xf32, #tpu.memory_space<vmem>>, %arg10: memref<32x128xbf16, #tpu.memory_space<vmem>>, %arg11: memref<128x128xbf16, #tpu.memory_space<vmem>>, %arg12: memref<1x128xf32, #tpu.memory_space<vmem>>, %arg13: memref<32x128xf32, #tpu.memory_space<vmem>>) attributes {dimension_semantics = [], scalar_prefetch = 0 : i64, scratch_operands = 0 : i64, tpu.core_type = #tpu.core_type<tc>} {
    %0 = tpu.iota {dimensions = array<i32: 0>} : vector<32x96xi32>
    %c0 = arith.constant 0 : index
    %c0_0 = arith.constant 0 : index
    %1 = vector.load %arg0[%c0, %c0_0] : memref<1x96xi32, #tpu.memory_space<vmem>>, vector<1x96xi32>
    %2 = vector.broadcast %1 : vector<1x96xi32> to vector<32x96xi32>
    %3 = arith.cmpi eq, %0, %2 : vector<32x96xi32>
    %cst = arith.constant 1.000000e+00 : f32
    %cst_1 = arith.constant 0.000000e+00 : f32
    %4 = vector.broadcast %cst : f32 to vector<32x96xf32>
    %5 = vector.broadcast %cst_1 : f32 to vector<32x96xf32>
    %6 = arith.select %3, %4, %5 : vector<32x96xi1>, vector<32x96xf32>
    %cst_2 = arith.constant 0.000000e+00 : f32
    %cst_3 = arith.constant -1.000000e+30 : f32
    %7 = vector.broadcast %cst_2 : f32 to vector<32x96xf32>
    %8 = vector.broadcast %cst_3 : f32 to vector<32x96xf32>
    %9 = arith.select %3, %7, %8 : vector<32x96xi1>, vector<32x96xf32>
    %10 = tpu.iota {dimensions = array<i32: 1>} : vector<96x32xi32>
    %c0_4 = arith.constant 0 : index
    %c0_5 = arith.constant 0 : index
    %11 = vector.load %arg1[%c0_4, %c0_5] : memref<96x1xi32, #tpu.memory_space<vmem>>, vector<96x1xi32>
    %12 = vector.broadcast %11 : vector<96x1xi32> to vector<96x32xi32>
    %13 = arith.cmpi eq, %10, %12 : vector<96x32xi32>
    %cst_6 = arith.constant 1.000000e+00 : f32
    %cst_7 = arith.constant 0.000000e+00 : f32
    %14 = vector.broadcast %cst_6 : f32 to vector<96x32xf32>
    %15 = vector.broadcast %cst_7 : f32 to vector<96x32xf32>
    %16 = arith.select %13, %14, %15 : vector<96x32xi1>, vector<96x32xf32>
    %c0_8 = arith.constant 0 : index
    %c0_9 = arith.constant 0 : index
    %17 = vector.load %arg2[%c0_8, %c0_9] : memref<96x384xbf16, #tpu.memory_space<vmem>>, vector<96x384xbf16>
    %c0_10 = arith.constant 0 : index
    %c0_11 = arith.constant 0 : index
    %18 = vector.load %arg3[%c0_10, %c0_11] : memref<384x128xbf16, #tpu.memory_space<vmem>>, vector<384x128xbf16>
    %cst_12 = arith.constant dense<0.000000e+00> : vector<96x128xf32>
    %19 = tpu.matmul %17, %18, %cst_12 {dimension_numbers = #tpu.dot_dimension_numbers<[1], [0], [0], [1], [0, 0, 1, 1], [], []>} : vector<96x384xbf16>, vector<384x128xbf16>, vector<96x128xf32> -> vector<96x128xf32>
    %c0_13 = arith.constant 0 : index
    %c0_14 = arith.constant 0 : index
    %20 = vector.load %arg4[%c0_13, %c0_14] : memref<1x128xf32, #tpu.memory_space<vmem>>, vector<1x128xf32>
    %21 = vector.broadcast %20 : vector<1x128xf32> to vector<96x128xf32>
    %22 = arith.addf %19, %21 : vector<96x128xf32>
    %cst_15 = arith.constant 0.000000e+00 : f32
    %23 = vector.broadcast %cst_15 : f32 to vector<96x128xf32>
    %24 = arith.cmpf oge, %22, %23 : vector<96x128xf32>
    %cst_16 = arith.constant 2.000000e-01 : f32
    %25 = vector.broadcast %cst_16 : f32 to vector<96x128xf32>
    %26 = arith.mulf %25, %22 : vector<96x128xf32>
    %27 = arith.select %24, %22, %26 : vector<96x128xi1>, vector<96x128xf32>
    %c0_17 = arith.constant 0 : index
    %c0_18 = arith.constant 0 : index
    %28 = vector.load %arg5[%c0_17, %c0_18] : memref<128x128xf32, #tpu.memory_space<vmem>>, vector<128x128xf32>
    %cst_19 = arith.constant dense<0.000000e+00> : vector<96x128xf32>
    %29 = tpu.matmul %27, %28, %cst_19 {dimension_numbers = #tpu.dot_dimension_numbers<[1], [0], [0], [1], [0, 0, 1, 1], [], []>} : vector<96x128xf32>, vector<128x128xf32>, vector<96x128xf32> -> vector<96x128xf32>
    %c0_20 = arith.constant 0 : index
    %c0_21 = arith.constant 0 : index
    %30 = vector.load %arg6[%c0_20, %c0_21] : memref<8x128xf32, #tpu.memory_space<vmem>>, vector<8x128xf32>
    %cst_22 = arith.constant 6.250000e-02 : f32
    %31 = vector.broadcast %cst_22 : f32 to vector<8x128xf32>
    %32 = arith.mulf %30, %31 : vector<8x128xf32>
    %cst_23 = arith.constant dense<0.000000e+00> : vector<8x96xf32>
    %33 = tpu.matmul %32, %29, %cst_23 {dimension_numbers = #tpu.dot_dimension_numbers<[1], [1], [0], [0], [0, 0, 1, 0], [], []>} : vector<8x128xf32>, vector<96x128xf32>, vector<8x96xf32> -> vector<8x96xf32>
    %cst_24 = arith.constant 0.000000e+00 : f32
    %34 = vector.broadcast %cst_24 : f32 to vector<32x128xf32>
    %35 = vector.extract_strided_slice %33 {offsets = [0, 0], sizes = [1, 96], strides = [1, 1]} : vector<8x96xf32> to vector<1x96xf32>
    %36 = vector.broadcast %35 : vector<1x96xf32> to vector<32x96xf32>
    %37 = arith.addf %9, %36 : vector<32x96xf32>
    %cst_25 = arith.constant dense<0xFF800000> : vector<32xf32>
    %38 = vector.multi_reduction <maximumf>, %37, %cst_25 [1] : vector<32x96xf32> to vector<32xf32>
    %39 = vector.shape_cast %38 : vector<32xf32> to vector<32x1xf32>
    %40 = vector.extract_strided_slice %30 {offsets = [0, 0], sizes = [1, 128], strides = [1, 1]} : vector<8x128xf32> to vector<1x128xf32>
    %41 = vector.broadcast %39 : vector<32x1xf32> to vector<32x128xf32>
    %42 = vector.broadcast %40 : vector<1x128xf32> to vector<32x128xf32>
    %43 = arith.mulf %41, %42 : vector<32x128xf32>
    %44 = arith.addf %34, %43 : vector<32x128xf32>
    %45 = vector.extract_strided_slice %33 {offsets = [1, 0], sizes = [1, 96], strides = [1, 1]} : vector<8x96xf32> to vector<1x96xf32>
    %46 = vector.broadcast %45 : vector<1x96xf32> to vector<32x96xf32>
    %47 = arith.addf %9, %46 : vector<32x96xf32>
    %cst_26 = arith.constant dense<0xFF800000> : vector<32xf32>
    %48 = vector.multi_reduction <maximumf>, %47, %cst_26 [1] : vector<32x96xf32> to vector<32xf32>
    %49 = vector.shape_cast %48 : vector<32xf32> to vector<32x1xf32>
    %50 = vector.extract_strided_slice %30 {offsets = [1, 0], sizes = [1, 128], strides = [1, 1]} : vector<8x128xf32> to vector<1x128xf32>
    %51 = vector.broadcast %49 : vector<32x1xf32> to vector<32x128xf32>
    %52 = vector.broadcast %50 : vector<1x128xf32> to vector<32x128xf32>
    %53 = arith.mulf %51, %52 : vector<32x128xf32>
    %54 = arith.addf %44, %53 : vector<32x128xf32>
    %55 = vector.extract_strided_slice %33 {offsets = [2, 0], sizes = [1, 96], strides = [1, 1]} : vector<8x96xf32> to vector<1x96xf32>
    %56 = vector.broadcast %55 : vector<1x96xf32> to vector<32x96xf32>
    %57 = arith.addf %9, %56 : vector<32x96xf32>
    %cst_27 = arith.constant dense<0xFF800000> : vector<32xf32>
    %58 = vector.multi_reduction <maximumf>, %57, %cst_27 [1] : vector<32x96xf32> to vector<32xf32>
    %59 = vector.shape_cast %58 : vector<32xf32> to vector<32x1xf32>
    %60 = vector.extract_strided_slice %30 {offsets = [2, 0], sizes = [1, 128], strides = [1, 1]} : vector<8x128xf32> to vector<1x128xf32>
    %61 = vector.broadcast %59 : vector<32x1xf32> to vector<32x128xf32>
    %62 = vector.broadcast %60 : vector<1x128xf32> to vector<32x128xf32>
    %63 = arith.mulf %61, %62 : vector<32x128xf32>
    %64 = arith.addf %54, %63 : vector<32x128xf32>
    %65 = vector.extract_strided_slice %33 {offsets = [3, 0], sizes = [1, 96], strides = [1, 1]} : vector<8x96xf32> to vector<1x96xf32>
    %66 = vector.broadcast %65 : vector<1x96xf32> to vector<32x96xf32>
    %67 = arith.addf %9, %66 : vector<32x96xf32>
    %cst_28 = arith.constant dense<0xFF800000> : vector<32xf32>
    %68 = vector.multi_reduction <maximumf>, %67, %cst_28 [1] : vector<32x96xf32> to vector<32xf32>
    %69 = vector.shape_cast %68 : vector<32xf32> to vector<32x1xf32>
    %70 = vector.extract_strided_slice %30 {offsets = [3, 0], sizes = [1, 128], strides = [1, 1]} : vector<8x128xf32> to vector<1x128xf32>
    %71 = vector.broadcast %69 : vector<32x1xf32> to vector<32x128xf32>
    %72 = vector.broadcast %70 : vector<1x128xf32> to vector<32x128xf32>
    %73 = arith.mulf %71, %72 : vector<32x128xf32>
    %74 = arith.addf %64, %73 : vector<32x128xf32>
    %75 = vector.extract_strided_slice %33 {offsets = [4, 0], sizes = [1, 96], strides = [1, 1]} : vector<8x96xf32> to vector<1x96xf32>
    %76 = vector.broadcast %75 : vector<1x96xf32> to vector<32x96xf32>
    %77 = arith.addf %9, %76 : vector<32x96xf32>
    %cst_29 = arith.constant dense<0xFF800000> : vector<32xf32>
    %78 = vector.multi_reduction <maximumf>, %77, %cst_29 [1] : vector<32x96xf32> to vector<32xf32>
    %79 = vector.shape_cast %78 : vector<32xf32> to vector<32x1xf32>
    %80 = vector.extract_strided_slice %30 {offsets = [4, 0], sizes = [1, 128], strides = [1, 1]} : vector<8x128xf32> to vector<1x128xf32>
    %81 = vector.broadcast %79 : vector<32x1xf32> to vector<32x128xf32>
    %82 = vector.broadcast %80 : vector<1x128xf32> to vector<32x128xf32>
    %83 = arith.mulf %81, %82 : vector<32x128xf32>
    %84 = arith.addf %74, %83 : vector<32x128xf32>
    %85 = vector.extract_strided_slice %33 {offsets = [5, 0], sizes = [1, 96], strides = [1, 1]} : vector<8x96xf32> to vector<1x96xf32>
    %86 = vector.broadcast %85 : vector<1x96xf32> to vector<32x96xf32>
    %87 = arith.addf %9, %86 : vector<32x96xf32>
    %cst_30 = arith.constant dense<0xFF800000> : vector<32xf32>
    %88 = vector.multi_reduction <maximumf>, %87, %cst_30 [1] : vector<32x96xf32> to vector<32xf32>
    %89 = vector.shape_cast %88 : vector<32xf32> to vector<32x1xf32>
    %90 = vector.extract_strided_slice %30 {offsets = [5, 0], sizes = [1, 128], strides = [1, 1]} : vector<8x128xf32> to vector<1x128xf32>
    %91 = vector.broadcast %89 : vector<32x1xf32> to vector<32x128xf32>
    %92 = vector.broadcast %90 : vector<1x128xf32> to vector<32x128xf32>
    %93 = arith.mulf %91, %92 : vector<32x128xf32>
    %94 = arith.addf %84, %93 : vector<32x128xf32>
    %95 = vector.extract_strided_slice %33 {offsets = [6, 0], sizes = [1, 96], strides = [1, 1]} : vector<8x96xf32> to vector<1x96xf32>
    %96 = vector.broadcast %95 : vector<1x96xf32> to vector<32x96xf32>
    %97 = arith.addf %9, %96 : vector<32x96xf32>
    %cst_31 = arith.constant dense<0xFF800000> : vector<32xf32>
    %98 = vector.multi_reduction <maximumf>, %97, %cst_31 [1] : vector<32x96xf32> to vector<32xf32>
    %99 = vector.shape_cast %98 : vector<32xf32> to vector<32x1xf32>
    %100 = vector.extract_strided_slice %30 {offsets = [6, 0], sizes = [1, 128], strides = [1, 1]} : vector<8x128xf32> to vector<1x128xf32>
    %101 = vector.broadcast %99 : vector<32x1xf32> to vector<32x128xf32>
    %102 = vector.broadcast %100 : vector<1x128xf32> to vector<32x128xf32>
    %103 = arith.mulf %101, %102 : vector<32x128xf32>
    %104 = arith.addf %94, %103 : vector<32x128xf32>
    %105 = vector.extract_strided_slice %33 {offsets = [7, 0], sizes = [1, 96], strides = [1, 1]} : vector<8x96xf32> to vector<1x96xf32>
    %106 = vector.broadcast %105 : vector<1x96xf32> to vector<32x96xf32>
    %107 = arith.addf %9, %106 : vector<32x96xf32>
    %cst_32 = arith.constant dense<0xFF800000> : vector<32xf32>
    %108 = vector.multi_reduction <maximumf>, %107, %cst_32 [1] : vector<32x96xf32> to vector<32xf32>
    %109 = vector.shape_cast %108 : vector<32xf32> to vector<32x1xf32>
    %110 = vector.extract_strided_slice %30 {offsets = [7, 0], sizes = [1, 128], strides = [1, 1]} : vector<8x128xf32> to vector<1x128xf32>
    %111 = vector.broadcast %109 : vector<32x1xf32> to vector<32x128xf32>
    %112 = vector.broadcast %110 : vector<1x128xf32> to vector<32x128xf32>
    %113 = arith.mulf %111, %112 : vector<32x128xf32>
    %114 = arith.addf %104, %113 : vector<32x128xf32>
    %cst_33 = arith.constant dense<0.000000e+00> : vector<96x128xf32>
    %115 = tpu.matmul %16, %114, %cst_33 {dimension_numbers = #tpu.dot_dimension_numbers<[1], [0], [0], [1], [0, 0, 1, 1], [], []>} : vector<96x32xf32>, vector<32x128xf32>, vector<96x128xf32> -> vector<96x128xf32>
    %116 = arith.subf %29, %115 : vector<96x128xf32>
    %117 = math.exp %116 : vector<96x128xf32>
    %cst_34 = arith.constant dense<0.000000e+00> : vector<32x128xf32>
    %118 = tpu.matmul %6, %117, %cst_34 {dimension_numbers = #tpu.dot_dimension_numbers<[1], [0], [0], [1], [0, 0, 1, 1], [], []>} : vector<32x96xf32>, vector<96x128xf32>, vector<32x128xf32> -> vector<32x128xf32>
    %cst_35 = arith.constant dense<0.000000e+00> : vector<96x128xf32>
    %119 = tpu.matmul %16, %118, %cst_35 {dimension_numbers = #tpu.dot_dimension_numbers<[1], [0], [0], [1], [0, 0, 1, 1], [], []>} : vector<96x32xf32>, vector<32x128xf32>, vector<96x128xf32> -> vector<96x128xf32>
    %cst_36 = arith.constant 1.000000e-16 : f32
    %120 = vector.broadcast %cst_36 : f32 to vector<96x128xf32>
    %121 = arith.addf %119, %120 : vector<96x128xf32>
    %122 = arith.divf %117, %121 : vector<96x128xf32>
    %c0_37 = arith.constant 0 : index
    %c0_38 = arith.constant 0 : index
    %123 = vector.load %arg7[%c0_37, %c0_38] : memref<96x256xbf16, #tpu.memory_space<vmem>>, vector<96x256xbf16>
    %c0_39 = arith.constant 0 : index
    %c0_40 = arith.constant 0 : index
    %124 = vector.load %arg8[%c0_39, %c0_40] : memref<256x128xbf16, #tpu.memory_space<vmem>>, vector<256x128xbf16>
    %cst_41 = arith.constant dense<0.000000e+00> : vector<96x128xf32>
    %125 = tpu.matmul %123, %124, %cst_41 {dimension_numbers = #tpu.dot_dimension_numbers<[1], [0], [0], [1], [0, 0, 1, 1], [], []>} : vector<96x256xbf16>, vector<256x128xbf16>, vector<96x128xf32> -> vector<96x128xf32>
    %c0_42 = arith.constant 0 : index
    %c0_43 = arith.constant 0 : index
    %126 = vector.load %arg9[%c0_42, %c0_43] : memref<1x128xf32, #tpu.memory_space<vmem>>, vector<1x128xf32>
    %127 = vector.broadcast %126 : vector<1x128xf32> to vector<96x128xf32>
    %128 = arith.addf %125, %127 : vector<96x128xf32>
    %129 = arith.mulf %122, %128 : vector<96x128xf32>
    %cst_44 = arith.constant dense<0.000000e+00> : vector<32x128xf32>
    %130 = tpu.matmul %6, %129, %cst_44 {dimension_numbers = #tpu.dot_dimension_numbers<[1], [0], [0], [1], [0, 0, 1, 1], [], []>} : vector<32x96xf32>, vector<96x128xf32>, vector<32x128xf32> -> vector<32x128xf32>
    %c0_45 = arith.constant 0 : index
    %c0_46 = arith.constant 0 : index
    %131 = vector.load %arg10[%c0_45, %c0_46] : memref<32x128xbf16, #tpu.memory_space<vmem>>, vector<32x128xbf16>
    %c0_47 = arith.constant 0 : index
    %c0_48 = arith.constant 0 : index
    %132 = vector.load %arg11[%c0_47, %c0_48] : memref<128x128xbf16, #tpu.memory_space<vmem>>, vector<128x128xbf16>
    %cst_49 = arith.constant dense<0.000000e+00> : vector<32x128xf32>
    %133 = tpu.matmul %131, %132, %cst_49 {dimension_numbers = #tpu.dot_dimension_numbers<[1], [0], [0], [1], [0, 0, 1, 1], [], []>} : vector<32x128xbf16>, vector<128x128xbf16>, vector<32x128xf32> -> vector<32x128xf32>
    %c0_50 = arith.constant 0 : index
    %c0_51 = arith.constant 0 : index
    %134 = vector.load %arg12[%c0_50, %c0_51] : memref<1x128xf32, #tpu.memory_space<vmem>>, vector<1x128xf32>
    %135 = vector.broadcast %134 : vector<1x128xf32> to vector<32x128xf32>
    %136 = arith.addf %133, %135 : vector<32x128xf32>
    %137 = arith.addf %130, %136 : vector<32x128xf32>
    %cst_52 = arith.constant 0.000000e+00 : f32
    %138 = vector.broadcast %cst_52 : f32 to vector<32x128xf32>
    %139 = arith.maximumf %137, %138 : vector<32x128xf32>
    %c0_53 = arith.constant 0 : index
    %c0_54 = arith.constant 0 : index
    %140 = vector.load %arg13[%c0_53, %c0_54] : memref<32x128xf32, #tpu.memory_space<vmem>>, vector<32x128xf32>
    tpu.vector_store %arg13[%c0_53, %c0_54], %139 {strides = array<i32>} : memref<32x128xf32, #tpu.memory_space<vmem>>, vector<32x128xf32>,
    return
  }
}

module attributes {stable_mosaic.version = 11 : i64} {
  func.func @_linear_kernel(%arg0: memref<16x128xbf16, #tpu.memory_space<vmem>>, %arg1: memref<128x32xbf16, #tpu.memory_space<vmem>>, %arg2: memref<1x32xf32, #tpu.memory_space<vmem>>, %arg3: memref<16x32xf32, #tpu.memory_space<vmem>>) attributes {dimension_semantics = [], scalar_prefetch = 0 : i64, scratch_operands = 0 : i64, tpu.core_type = #tpu.core_type<tc>} {
    %c0 = arith.constant 0 : index
    %c0_0 = arith.constant 0 : index
    %0 = vector.load %arg0[%c0, %c0_0] : memref<16x128xbf16, #tpu.memory_space<vmem>>, vector<16x128xbf16>
    %c0_1 = arith.constant 0 : index
    %c0_2 = arith.constant 0 : index
    %1 = vector.load %arg1[%c0_1, %c0_2] : memref<128x32xbf16, #tpu.memory_space<vmem>>, vector<128x32xbf16>
    %cst = arith.constant dense<0.000000e+00> : vector<16x32xf32>
    %2 = tpu.matmul %0, %1, %cst {dimension_numbers = #tpu.dot_dimension_numbers<[1], [0], [0], [1], [0, 0, 1, 1], [], []>} : vector<16x128xbf16>, vector<128x32xbf16>, vector<16x32xf32> -> vector<16x32xf32>
    %c0_3 = arith.constant 0 : index
    %c0_4 = arith.constant 0 : index
    %3 = vector.load %arg2[%c0_3, %c0_4] : memref<1x32xf32, #tpu.memory_space<vmem>>, vector<1x32xf32>
    %4 = vector.broadcast %3 : vector<1x32xf32> to vector<16x32xf32>
    %5 = arith.addf %2, %4 : vector<16x32xf32>
    %c0_5 = arith.constant 0 : index
    %c0_6 = arith.constant 0 : index
    %6 = vector.load %arg3[%c0_5, %c0_6] : memref<16x32xf32, #tpu.memory_space<vmem>>, vector<16x32xf32>
    tpu.vector_store %arg3[%c0_5, %c0_6], %5 {strides = array<i32>} : memref<16x32xf32, #tpu.memory_space<vmem>>, vector<16x32xf32>,
    return
  }
}

module attributes {stable_mosaic.version = 11 : i64} {
  func.func @_linear_kernel(%arg0: memref<32x128xbf16, #tpu.memory_space<vmem>>, %arg1: memref<128x32xbf16, #tpu.memory_space<vmem>>, %arg2: memref<1x32xf32, #tpu.memory_space<vmem>>, %arg3: memref<32x32xf32, #tpu.memory_space<vmem>>) attributes {dimension_semantics = [], scalar_prefetch = 0 : i64, scratch_operands = 0 : i64, tpu.core_type = #tpu.core_type<tc>} {
    %c0 = arith.constant 0 : index
    %c0_0 = arith.constant 0 : index
    %0 = vector.load %arg0[%c0, %c0_0] : memref<32x128xbf16, #tpu.memory_space<vmem>>, vector<32x128xbf16>
    %c0_1 = arith.constant 0 : index
    %c0_2 = arith.constant 0 : index
    %1 = vector.load %arg1[%c0_1, %c0_2] : memref<128x32xbf16, #tpu.memory_space<vmem>>, vector<128x32xbf16>
    %cst = arith.constant dense<0.000000e+00> : vector<32x32xf32>
    %2 = tpu.matmul %0, %1, %cst {dimension_numbers = #tpu.dot_dimension_numbers<[1], [0], [0], [1], [0, 0, 1, 1], [], []>} : vector<32x128xbf16>, vector<128x32xbf16>, vector<32x32xf32> -> vector<32x32xf32>
    %c0_3 = arith.constant 0 : index
    %c0_4 = arith.constant 0 : index
    %3 = vector.load %arg2[%c0_3, %c0_4] : memref<1x32xf32, #tpu.memory_space<vmem>>, vector<1x32xf32>
    %4 = vector.broadcast %3 : vector<1x32xf32> to vector<32x32xf32>
    %5 = arith.addf %2, %4 : vector<32x32xf32>
    %c0_5 = arith.constant 0 : index
    %c0_6 = arith.constant 0 : index
    %6 = vector.load %arg3[%c0_5, %c0_6] : memref<32x32xf32, #tpu.memory_space<vmem>>, vector<32x32xf32>
    tpu.vector_store %arg3[%c0_5, %c0_6], %5 {strides = array<i32>} : memref<32x32xf32, #tpu.memory_space<vmem>>, vector<32x32xf32>,
    return
  }
}

</mosaic_0001>

<bundles_post_ra>
// kernel: ingram_forward.11
= control target key start
LH: loop header
LB: loop body
LE: loop exit
PB: predicated region body
PF: predicated region fallthrough
CT: control target
= control target key end

     0   :  { %v117_v0 = vmov 0.0   ;;  %vm118_vm0 = vmmov 0   ;;  %vm45_vm1 = vcmask 261120   ;;  %s157_s1 = inlined_call_operand.vmem [shape: bf16[32,128], index: 1, kind: input, shape index: {}]   ;;  %s158_s0 = inlined_call_operand.vmem [shape: bf16[16,32], index: 0, kind: input, shape index: {}]   ;;  %s159_s2 = inlined_call_operand.vmem [shape: f32[1,128], index: 2, kind: input, shape index: {}]   ;;  %s160_s3 = inlined_call_operand.vmem [shape: f32[16,128], index: 3, kind: output, shape index: {}]  }
   0x1   :  { %104 = vmatprep.subr.bf16.mxu0 %v117_v0  ;;  %v114_v1 = vld [vmem:[%s157_s1] sm:$0xff]   ;;  %108 = vmatprep.mubr.msk.bf16.mxu0 %vm118_vm0, %v117_v0  ;;  %v115_v2 = vld [vmem:[%s157_s1 + $0x8] sm:$0xff]  }
   0x2   :  { %105 = vmatpush3.bf16.msra.mxu0 %v114_v1  ;;  %v116_v3 = vld [vmem:[%s158_s0] sm:$0xff]  }
   0x3   :  { %106 = vmatprep.subr.bf16.mxu0 %v117_v0  ;;  %v96_v4 = vld [vmem:[%s159_s2] ss:$0 sm:$0xff] }
   0x6   :  { %107 = vmatpush3.bf16.msra.mxu0 %v115_v2 }
   0x9   :  { %109 = vmatmul.mubr.msk.bf16.vlgmr.msra.gmra.mrb[0].mxu0 %vm45_vm1, %v116_v3 }
  0xdc   :  { %v83_v5 = vpop.f32.mrb[0].mxu0 }
  0xdd   :  { %v84_v6 = vadd.f32 %v96_v4, %v83_v5  ;;  %v110_v7 = vpop.f32.mrb[1].mxu0 }
  0xde   :  { %v86_v8 = vpop.f32.mrb[2].mxu0 }
  0xdf   :  { %90 = vst [vmem:[%s160_s3] sm:$0xff] %v84_v6  ;;  %v87_v9 = vadd.f32 %v96_v4, %v86_v8  ;;  %v111_v10 = vpop.f32.mrb[3].mxu0 }
  0xe1   :  { %91 = vst [vmem:[%s160_s3 + $0x8] sm:$0xff] %v87_v9 }

// kernel: ingram_forward.14
= control target key start
LH: loop header
LB: loop body
LE: loop exit
PB: predicated region body
PF: predicated region fallthrough
CT: control target
= control target key end

     0   :  { %v228_v3 = vmov 0.0   ;;  %v11_v8 = vlaneseq  ;;  %vm45_vm2 = vcmask 523264   ;;  %v229_v35 = vmov 0   ;;  %s308_s1 = inlined_call_operand.vmem [shape: f32[64,129], index: 1, kind: input, shape index: {}]   ;;  %s309_s0 = inlined_call_operand.vmem [shape: s32[1,64], index: 0, kind: input, shape index: {}]   ;;  %s310_s2 = inlined_call_operand.vmem [shape: f32[32,128], index: 2, kind: output, shape index: {}]  }
   0x1   :  { %v30_v0 = vld [vmem:[%s308_s1 + $0x8] sm:$0xff]  ;;  %v32_v1 = vld [vmem:[%s308_s1 + $0x18] sm:$0xff]  ;;  %v29_v2 = vld [vmem:[%s308_s1] sm:$0xff]  ;;  %122 = vmatprep.mubr.f32.mxu0 %v228_v3  ;;  %134 = vmatprep.mubr.f32.mxu1 %v228_v3 }
   0x2   :  { %v192_v4 = vpack.c.bf16 %v32_v1, %v30_v0  ;;  %v31_v5 = vld [vmem:[%s308_s1 + $0x10] sm:$0xff]  ;;  %v34_v6 = vld [vmem:[%s308_s1 + $0x28] sm:$0xff]  ;;  %v36_v7 = vld [vmem:[%s308_s1 + $0x38] sm:$0xff]  ;;  %v12_v19 = vshrl.u32 %v11_v8, 7  ;;  %219 = vset.pattern.permute.xlu1 %v229_v35  ;;  %218 = vset.pattern.permute.xlu0 %v229_v35 }
   0x3   :  { %v194_v9 = vpack.c.bf16 %v31_v5, %v29_v2  ;;  %v196_v10 = vpack.c.bf16 %v36_v7, %v34_v6  ;;  %v33_v11 = vld [vmem:[%s308_s1 + $0x20] sm:$0xff]  ;;  %v35_v12 = vld [vmem:[%s308_s1 + $0x30] sm:$0xff]  ;;  %v38_v13 = vld [vmem:[%s308_s1 + $0x48] sm:$0xff] }
   0x4   :  { %193 = vmatprep.subr.bf16.mxu0 %v192_v4  ;;  %208 = vmatprep.subr.bf16.mxu1 %v192_v4  ;;  %v40_v14 = vld [vmem:[%s308_s1 + $0x58] sm:$0xff]  ;;  %v198_v15 = vpack.c.bf16 %v35_v12, %v33_v11  ;;  %v37_v17 = vld [vmem:[%s308_s1 + $0x40] sm:$0xff]  ;;  %v39_v18 = vld [vmem:[%s308_s1 + $0x50] sm:$0xff]  ;;  %v14_v26 = vadd.s32 16, %v12_v19  ;;  %v13_v29 = vadd.s32 8, %v12_v19  ;;  %v15_v30 = vadd.s32 24, %v12_v19 }
   0x5   :  { %195 = vmatpush1.bf16.msra.mxu0 %v194_v9  ;;  %212 = vmatpush1.bf16.msra.mxu1 %v194_v9  ;;  %v200_v16 = vpack.c.bf16 %v40_v14, %v38_v13  ;;  %v42_v20 = vld [vmem:[%s308_s1 + $0x68] sm:$0xff]  ;;  %v44_v21 = vld [vmem:[%s308_s1 + $0x78] sm:$0xff]  ;;  %v202_v22 = vpack.c.bf16 %v39_v18, %v37_v17  ;;  %v41_v24 = vld [vmem:[%s308_s1 + $0x60] sm:$0xff] }
   0x6   :  { %197 = vmatprep.subr.bf16.mxu0 %v196_v10  ;;  %209 = vmatprep.subr.bf16.mxu1 %v196_v10  ;;  %v204_v23 = vpack.c.bf16 %v44_v21, %v42_v20  ;;  %v43_v25 = vld [vmem:[%s308_s1 + $0x70] sm:$0xff]  ;;  %v187_v27 = vld [vmem:[%s309_s0] ss:$0 sm:$0xff] }
   0x7   :  { %v206_v28 = vpack.c.bf16 %v43_v25, %v41_v24  ;;  %vm21_vm0 = vcmp.eq.s32.totalorder %v12_v19, %v187_v27  ;;  %vm23_vm1 = vcmp.eq.s32.totalorder %v14_v26, %v187_v27  ;;  %vm22_vm3 = vcmp.eq.s32.totalorder %v13_v29, %v187_v27 }
   0x8   :  { %v25_v31 = vsel %vm21_vm0, 1.0, %v228_v3  ;;  %v27_v32 = vsel %vm23_vm1, 1.0, %v228_v3  ;;  %vm24_vm4 = vcmp.eq.s32.totalorder %v15_v30, %v187_v27  ;;  %v26_v33 = vsel %vm22_vm3, 1.0, %v228_v3 }
   0x9   :  { %199 = vmatpush1.bf16.msra.mxu0 %v198_v15  ;;  %213 = vmatpush1.bf16.msra.mxu1 %v198_v15  ;;  %v28_v34 = vsel %vm24_vm4, 1.0, %v228_v3 }
   0xa   :  { %201 = vmatprep.subr.bf16.mxu0 %v200_v16  ;;  %210 = vmatprep.subr.bf16.mxu1 %v200_v16 }
   0xd   :  { %203 = vmatpush1.bf16.msra.mxu0 %v202_v22  ;;  %214 = vmatpush1.bf16.msra.mxu1 %v202_v22 }
   0xe   :  { %205 = vmatprep.subr.bf16.mxu0 %v204_v23  ;;  %211 = vmatprep.subr.bf16.mxu1 %v204_v23 }
  0x11   :  { %207 = vmatpush1.bf16.msra.mxu0 %v206_v28  ;;  %215 = vmatpush1.bf16.msra.mxu1 %v206_v28 }
  0x14   :  { %188 = vmatmul.mubr.msk.f32.vlgmr.msra.gmra.mrb[0].mxu0 %vm45_vm2, %v25_v31  ;;  %190 = vmatmul.mubr.msk.f32.vlgmr.msra.gmra.mrb[0].mxu1 %vm45_vm2, %v27_v32 }
  0x15   :  { %128 = vmatprep.mubr.f32.mxu0 %v228_v3  ;;  %140 = vmatprep.mubr.f32.mxu1 %v228_v3 }
  0x18   :  { %189 = vmatmul.mubr.msk.f32.gmra.mrb[2].mxu0 %vm45_vm2, %v26_v33  ;;  %191 = vmatmul.mubr.msk.f32.gmra.mrb[2].mxu1 %vm45_vm2, %v28_v34 }
  0xe7   :  { %v124_v36 = vpop.f32.mrb[0].mxu0  ;;  %v136_v37 = vpop.f32.mrb[0].mxu1 }
  0xe8   :  { %v126_v38 = vpop.f32.mrb[1].mxu0  ;;  %v138_v39 = vpop.f32.mrb[1].mxu1 }
  0xe9   :  { %v147_v40 = vadd.f32 1e-16, %v126_v38  ;;  %v149_v41 = vadd.f32 1e-16, %v138_v39 }
  0xeb   :  { %163 = vperm.xlu1 %219, %v149_v41   ;;  %v142_v42 = vpop.f32.mrb[2].mxu1  ;;  %153 = vperm.xlu0 %218, %v147_v40   ;;  %v130_v43 = vpop.f32.mrb[2].mxu0 }
  0xec   :  { %v132_v44 = vpop.f32.mrb[3].mxu0  ;;  %v144_v45 = vpop.f32.mrb[3].mxu1 }
  0xed   :  { %v148_v46 = vadd.f32 1e-16, %v132_v44  ;;  %v150_v47 = vadd.f32 1e-16, %v144_v45 }
  0xef   :  { %168 = vperm.xlu1 %219, %v150_v47   ;;  %158 = vperm.xlu0 %218, %v148_v46  }
 0x16a   :  { %v164_v48 = vpop.permute.xlu1 %163  ;;  %v154_v49 = vpop.permute.xlu0 %153 }
 0x16b   :  { %220 = vrcp.f32 %v164_v48 }
 0x16c   :  { %222 = vrcp.f32 %v154_v49 }
 0x16e   :  { %v169_v50 = vpop.permute.xlu1 %168  ;;  %v159_v51 = vpop.permute.xlu0 %158 }
 0x16f   :  { %224 = vrcp.f32 %v169_v50 }
 0x170   :  { %226 = vrcp.f32 %v159_v51 }
 0x175   :  { %v221_v52 = vpop.eup %220 }
 0x176   :  { %v223_v53 = vpop.eup %222  ;;  %v176_v54 = vmul.f32 %v221_v52, %v136_v37 }
 0x177   :  { %v172_v55 = vmul.f32 %v223_v53, %v124_v36 }
 0x178   :  { %181 = vst [vmem:[%s310_s2 + $0x10] sm:$0xff] %v176_v54 }
 0x179   :  { %v225_v56 = vpop.eup %224  ;;  %179 = vst [vmem:[%s310_s2] sm:$0xff] %v172_v55 }
 0x17a   :  { %v227_v57 = vpop.eup %226  ;;  %v178_v58 = vmul.f32 %v225_v56, %v142_v42 }
 0x17b   :  { %v174_v59 = vmul.f32 %v227_v57, %v130_v43 }
 0x17c   :  { %182 = vst [vmem:[%s310_s2 + $0x18] sm:$0xff] %v178_v58 }
 0x17d   :  { %180 = vst [vmem:[%s310_s2 + $0x8] sm:$0xff] %v174_v59 }

// kernel: ingram_forward.10
= control target key start
LH: loop header
LB: loop body
LE: loop exit
PB: predicated region body
PF: predicated region fallthrough
CT: control target
= control target key end

     0   :  { %vm52_vm0 = vcmask 261120   ;;  %s186_s1 = inlined_call_operand.vmem [shape: bf16[32,128], index: 1, kind: input, shape index: {}]   ;;  %s187_s0 = inlined_call_operand.vmem [shape: bf16[32,32], index: 0, kind: input, shape index: {}]   ;;  %s188_s2 = inlined_call_operand.vmem [shape: f32[1,128], index: 2, kind: input, shape index: {}]   ;;  %s189_s3 = inlined_call_operand.vmem [shape: f32[32,128], index: 3, kind: output, shape index: {}]  }
   0x1   :  { %v135_v0 = vld [vmem:[%s186_s1] sm:$0xff]   ;;  %v136_v1 = vld [vmem:[%s186_s1 + $0x8] sm:$0xff]  }
   0x2   :  { %127 = vmatprep.subr.bf16.mxu0 %v135_v0  ;;  %v137_v2 = vld [vmem:[%s187_s0] sm:$0xff]   ;;  %v138_v3 = vld [vmem:[%s187_s0 + $0x8] sm:$0xff]  }
   0x3   :  { %128 = vmatpush3.bf16.msra.mxu0 %v135_v0  ;;  %131 = vmatprep.mubr.msk.bf16.mxu0 %vm52_vm0, %v137_v2  ;;  %v116_v4 = vld [vmem:[%s188_s2] ss:$0 sm:$0xff] }
   0x4   :  { %129 = vmatprep.subr.bf16.mxu0 %v136_v1 }
   0x7   :  { %130 = vmatpush3.bf16.msra.mxu0 %v136_v1 }
   0xa   :  { %132 = vmatmul.mubr.msk.bf16.vlgmr.msra.gmra.mrb[0].mxu0 %vm52_vm0, %v138_v3 }
  0xdd   :  { %v133_v5 = vpop.f32.mrb[0].mxu0 }
  0xde   :  { %v102_v6 = vadd.f32 %v133_v5, %v116_v4  ;;  %v93_v7 = vpop.f32.mrb[1].mxu0 }
  0xdf   :  { %v94_v8 = vadd.f32 %v116_v4, %v93_v7  ;;  %v134_v9 = vpop.f32.mrb[2].mxu0 }
  0xe0   :  { %110 = vst [vmem:[%s189_s3 + $0x10] sm:$0xff] %v102_v6  ;;  %v105_v10 = vadd.f32 %v134_v9, %v116_v4  ;;  %v96_v11 = vpop.f32.mrb[3].mxu0 }
  0xe1   :  { %108 = vst [vmem:[%s189_s3] sm:$0xff] %v94_v8  ;;  %v97_v12 = vadd.f32 %v116_v4, %v96_v11 }
  0xe2   :  { %111 = vst [vmem:[%s189_s3 + $0x18] sm:$0xff] %v105_v10 }
  0xe3   :  { %109 = vst [vmem:[%s189_s3 + $0x8] sm:$0xff] %v97_v12 }

// kernel: ingram_forward.12
= control target key start
LH: loop header
LB: loop body
LE: loop exit
PB: predicated region body
PF: predicated region fallthrough
CT: control target
= control target key end

     0   :  { %vm1682_vm4 = vmmov 0   ;;  %vm491_vm7 = vcmask 261120   ;;  %vm646_vm8 = vcmask 130048   ;;  %s2141_s3 = inlined_call_operand.vmem [shape: bf16[256,128], index: 3, kind: input, shape index: {}]   ;;  %s2142_s2 = inlined_call_operand.vmem [shape: bf16[32,256], index: 2, kind: input, shape index: {}]   ;;  %s2143_s5 = inlined_call_operand.vmem [shape: f32[128,128], index: 5, kind: input, shape index: {}]   ;;  %s2144_s4 = inlined_call_operand.vmem [shape: f32[1,128], index: 4, kind: input, shape index: {}]   ;;  %s2145_s7 = inlined_call_operand.vmem [shape: f32[32,128], index: 7, kind: input, shape index: {}]   ;;  %s2146_s6 = inlined_call_operand.vmem [shape: f32[8,128], index: 6, kind: input, shape index: {}]   ;;  %s2147_s0 = inlined_call_operand.vmem [shape: s32[1,32], index: 0, kind: input, shape index: {}]   ;;  %s2148_s1 = inlined_call_operand.vmem [shape: s32[32,1], index: 1, kind: input, shape index: {}]   ;;  %s2149_s9 = inlined_call_operand.vmem [shape: bf16[128,128], index: 9, kind: input, shape index: {}]   ;;  %s2150_s8 = inlined_call_operand.vmem [shape: bf16[32,128], index: 8, kind: input, shape index: {}]   ;;  %s2151_s12 = inlined_call_operand.vmem [shape: bf16[128,128], index: 12, kind: input, shape index: {}]   ;;  %s2152_s11 = inlined_call_operand.vmem [shape: bf16[16,128], index: 11, kind: input, shape index: {}]   ;;  %s2153_s10 = inlined_call_operand.vmem [shape: f32[1,128], index: 10, kind: input, shape index: {}]   ;;  %s2154_s13 = inlined_call_operand.vmem [shape: f32[1,128], index: 13, kind: input, shape index: {}]   ;;  %s2155_s14 = inlined_call_operand.vmem [shape: f32[16,128], index: 14, kind: output, shape index: {}]  }
   0x1   :  { %v1624_v0 = vld [vmem:[%s2141_s3 + $0x40] sm:$0xff]   ;;  %v1626_v2 = vld [vmem:[%s2141_s3 + $0x48] sm:$0xff]   ;;  %v1628_v4 = vld [vmem:[%s2141_s3 + $0x50] sm:$0xff]  }
   0x2   :  { %v1625_v1 = vld [vmem:[%s2141_s3] sm:$0xff]   ;;  %1328 = vmatprep.subr.bf16.mxu0 %v1624_v0  ;;  %v1627_v3 = vld [vmem:[%s2141_s3 + $0x8] sm:$0xff]   ;;  %v1629_v5 = vld [vmem:[%s2141_s3 + $0x10] sm:$0xff]  }
   0x3   :  { %1329 = vmatpush3.bf16.msra.mxu0 %v1625_v1  ;;  %v1630_v6 = vld [vmem:[%s2141_s3 + $0x58] sm:$0xff]   ;;  %v1632_v8 = vld [vmem:[%s2141_s3 + $0x60] sm:$0xff]   ;;  %v1634_v10 = vld [vmem:[%s2141_s3 + $0x68] sm:$0xff]  }
   0x4   :  { %1330 = vmatprep.subr.bf16.mxu0 %v1626_v2  ;;  %v1631_v7 = vld [vmem:[%s2141_s3 + $0x18] sm:$0xff]   ;;  %v1633_v9 = vld [vmem:[%s2141_s3 + $0x20] sm:$0xff]   ;;  %v1635_v12 = vld [vmem:[%s2141_s3 + $0x28] sm:$0xff]  }
   0x5   :  { %v1642_v11 = vld [vmem:[%s2142_s2 + $0x4] ss:$8 sps:$4 sm:$0xff]   ;;  %v310_v15 = vld [vmem:[%s2143_s5 + $0x10] sm:$0xff]  ;;  %v311_v16 = vld [vmem:[%s2143_s5 + $0x18] sm:$0xff] }
   0x6   :  { %v308_v13 = vld [vmem:[%s2143_s5] sm:$0xff]  ;;  %279 = vmatprep.mubr.bf16.mxu0 %v1642_v11  ;;  %v309_v14 = vld [vmem:[%s2143_s5 + $0x8] sm:$0xff]  ;;  %v1636_v17 = vld [vmem:[%s2141_s3 + $0x70] sm:$0xff]   ;;  %v1559_v19 = vpack.c.bf16 %v311_v16, %v310_v15 }
   0x7   :  { %1331 = vmatpush3.bf16.msra.mxu0 %v1627_v3  ;;  %v1555_v18 = vpack.c.bf16 %v309_v14, %v308_v13  ;;  %v312_v20 = vld [vmem:[%s2143_s5 + $0x20] sm:$0xff]  ;;  %v313_v21 = vld [vmem:[%s2143_s5 + $0x28] sm:$0xff]  ;;  %v1637_v22 = vld [vmem:[%s2141_s3 + $0x30] sm:$0xff]  }
   0x8   :  { %1332 = vmatprep.subr.bf16.mxu0 %v1628_v4  ;;  %v1638_v23 = vld [vmem:[%s2141_s3 + $0x78] sm:$0xff]   ;;  %v1563_v24 = vpack.c.bf16 %v313_v21, %v312_v20  ;;  %v314_v25 = vld [vmem:[%s2143_s5 + $0x30] sm:$0xff]  ;;  %v316_v29 = vld [vmem:[%s2143_s5 + $0x40] sm:$0xff] }
   0x9   :  { %1556 = vmatprep.subr.bf16.mxu1 %v1555_v18  ;;  %v315_v26 = vld [vmem:[%s2143_s5 + $0x38] sm:$0xff]  ;;  %v317_v30 = vld [vmem:[%s2143_s5 + $0x48] sm:$0xff]  ;;  %v318_v34 = vld [vmem:[%s2143_s5 + $0x50] sm:$0xff] }
   0xa   :  { %1558 = vmatpush3.bf16.msra.mxu1 %v1555_v18  ;;  %v1639_v27 = vld [vmem:[%s2141_s3 + $0x38] sm:$0xff]   ;;  %v1567_v28 = vpack.c.bf16 %v315_v26, %v314_v25  ;;  %v1640_v31 = vld [vmem:[%s2142_s2] ss:$8 sps:$4 sm:$0xff]   ;;  %v1571_v33 = vpack.c.bf16 %v317_v30, %v316_v29  ;;  %v322_v41 = vld [vmem:[%s2143_s5 + $0x70] sm:$0xff] }
   0xb   :  { %1333 = vmatpush3.bf16.msra.mxu0 %v1629_v5  ;;  %1560 = vmatprep.subr.bf16.mxu1 %v1559_v19  ;;  %v1643_v32 = vld [vmem:[%s2142_s2 + $0x14] ss:$8 sps:$4 sm:$0xff]   ;;  %v1645_v37 = vld [vmem:[%s2142_s2 + $0x10] ss:$8 sps:$4 sm:$0xff]   ;;  %v320_v38 = vld [vmem:[%s2143_s5 + $0x60] sm:$0xff]  ;;  %v1681_v5 = vmov 0.0|0.0  }
   0xc   :  { %1334 = vmatprep.subr.bf16.mxu0 %v1630_v6  ;;  %v319_v35 = vld [vmem:[%s2143_s5 + $0x58] sm:$0xff]  ;;  %v321_v39 = vld [vmem:[%s2143_s5 + $0x68] sm:$0xff]  ;;  %v1274_v45 = vld [vmem:[%s2144_s4] ss:$0 sm:$0xff]  ;;  %v1683_v6 = vmov 0.0  }
   0xd   :  { %v1575_v36 = vpack.c.bf16 %v319_v35, %v318_v34  ;;  %v1579_v40 = vpack.c.bf16 %v321_v39, %v320_v38  ;;  %v323_v42 = vld [vmem:[%s2143_s5 + $0x78] sm:$0xff]  ;;  %v326_v15 = vld [vmem:[%s2145_s7 + $0x10] sm:$0xff]  ;;  %v1901_v21 = vld [vmem:[%s2146_s6] sm:$0xff] }
   0xe   :  { %1562 = vmatpush3.bf16.msra.mxu1 %v1559_v19  ;;  %v1583_v43 = vpack.c.bf16 %v323_v42, %v322_v41  ;;  %v327_v14 = vld [vmem:[%s2145_s7 + $0x18] sm:$0xff]  ;;  %v1910_v26 = vld [vmem:[%s2147_s0] ss:$0 sm:$0xff] }
   0xf   :  { %1335 = vmatpush3.bf16.msra.mxu0 %v1631_v7  ;;  %1564 = vmatprep.subr.bf16.mxu1 %v1563_v24  ;;  %v325_v7 = vld [vmem:[%s2145_s7 + $0x8] sm:$0xff] }
  0x10   :  { %1336 = vmatprep.subr.bf16.mxu0 %v1632_v8  ;;  %v324_v8 = vld [vmem:[%s2145_s7] sm:$0xff] }
  0x12   :  { %1566 = vmatpush3.bf16.msra.mxu1 %v1563_v24  ;;  %v48_v24 = vlaneseq }
  0x13   :  { %1337 = vmatpush3.bf16.msra.mxu0 %v1633_v9  ;;  %1568 = vmatprep.subr.bf16.mxu1 %v1567_v28 }
  0x14   :  { %1338 = vmatprep.subr.bf16.mxu0 %v1634_v10  ;;  %v1905_v25 = vshrl.u32 %v48_v24, 7 }
  0x16   :  { %1570 = vmatpush3.bf16.msra.mxu1 %v1567_v28  ;;  %vm56_vm5 = vcmp.eq.s32.totalorder %v1905_v25, %v1910_v26  ;;  %v508_v28 = vsub.s32 1, %v1905_v25  ;;  %v487_v29 = vsub.s32 0, %v1905_v25  ;;  %v628_v34 = vsub.s32 7, %v1905_v25 }
  0x17   :  { %1339 = vmatpush3.bf16.msra.mxu0 %v1635_v12  ;;  %1572 = vmatprep.subr.bf16.mxu1 %v1571_v33  ;;  %v548_v42 = vsub.s32 3, %v1905_v25 }
  0x18   :  { %1340 = vmatprep.subr.bf16.mxu0 %v1636_v17 }
  0x1a   :  { %1574 = vmatpush3.bf16.msra.mxu1 %v1571_v33  ;;  %v528_v33 = vsub.s32 2, %v1905_v25 }
  0x1b   :  { %1341 = vmatpush3.bf16.msra.mxu0 %v1637_v22  ;;  %1576 = vmatprep.subr.bf16.mxu1 %v1575_v36  ;;  %v414_v22 = vmul.f32 0.0625, %v1901_v21 }
  0x1c   :  { %1342 = vmatprep.subr.bf16.mxu0 %v1638_v23  ;;  %v1684_v23 = vmov 0  }
  0x1d   :  { %1623 = vset.pattern.permute.xlu1 %v1684_v23  ;;  %1622 = vset.pattern.permute.xlu0 %v1684_v23  ;;  %v66_v23 = vld [vmem:[%s2148_s1 + $0x10] sm:$0xff] }
  0x1e   :  { %1578 = vmatpush3.bf16.msra.mxu1 %v1575_v36 }
  0x1f   :  { %1343 = vmatpush3.bf16.msra.mxu0 %v1639_v27  ;;  %1580 = vmatprep.subr.bf16.mxu1 %v1579_v40  ;;  %v1913_v27 = vadd.s32 8, %v1905_v25 }
  0x20   :  { %1587 = vmatprep.subr.bf16.mxu0 %v1681_v5 }
  0x21   :  { %vm57_vm6 = vcmp.eq.s32.totalorder %v1913_v27, %v1910_v26  ;;  %v1649_v26 = vld [vmem:[%s2149_s9 + $0x18] sm:$0xff]   ;;  %v1650_v27 = vld [vmem:[%s2149_s9 + $0x20] sm:$0xff]  }
  0x22   :  { %280 = vmatmul.mubr.bf16.vlgmr.msra.gmra.mrb[0].mxu0 %v1640_v31  ;;  %1582 = vmatpush3.bf16.msra.mxu1 %v1579_v40  ;;  %v1685_v31 = vmov -1e+30  }
  0x23   :  { %287 = vmatprep.mubr.bf16.mxu0 %v1643_v32  ;;  %1584 = vmatprep.subr.bf16.mxu1 %v1583_v43  ;;  %v60_v32 = vsel %vm56_vm5, 0.0, %v1685_v31  ;;  %v61_v38 = vsel %vm57_vm6, 0.0, %v1685_v31 }
  0x26   :  { %1586 = vmatpush3.bf16.msra.mxu1 %v1583_v43 }
  0x2a   :  { %288 = vmatmul.mubr.bf16.gmra.mrb[4].mxu0 %v1645_v37 }
  0x2b   :  { %1470 = vmatprep.mubr.msk.f32.mxu0 %vm1682_vm4, %v1683_v6 }
  0xf5   :  { %v1344_v44 = vpop.f32.mrb[0].mxu0 }
  0xf6   :  { %v1345_v46 = vpop.f32.mrb[1].mxu0 }
  0xf7   :  { %v1346_v47 = vadd.f32 %v1345_v46, %v1344_v44  ;;  %v1347_v48 = vpop.f32.mrb[2].mxu0 }
  0xf8   :  { %v1348_v49 = vpop.f32.mrb[3].mxu0 }
  0xf9   :  { %v282_v50 = vadd.f32 %v1346_v47, %v1274_v45  ;;  %v1349_v51 = vadd.f32 %v1348_v49, %v1347_v48  ;;  %v568_v49 = vsub.s32 4, %v1905_v25 }
  0xfb   :  { %v285_v52 = vadd.f32 %v1349_v51, %v1274_v45  ;;  %vm296_vm0 = vcmp.ge.f32.partialorder %v282_v50, 0.0  ;;  %v300_v53 = vmul.f32 0.2, %v282_v50 }
  0xfd   :  { %v1350_v54 = vpop.f32.mrb[4].mxu0  ;;  %v304_v55 = vsel %vm296_vm0, %v282_v50, %v300_v53  ;;  %vm297_vm1 = vcmp.ge.f32.partialorder %v285_v52, 0.0  ;;  %v301_v56 = vmul.f32 0.2, %v285_v52 }
  0xfe   :  { %v1351_v57 = vpop.f32.mrb[5].mxu0  ;;  %1456 = vmatprep.mubr.f32.mxu1 %v304_v55 }
  0xff   :  { %v1352_v58 = vadd.f32 %v1351_v57, %v1350_v54  ;;  %v1353_v59 = vpop.f32.mrb[6].mxu0  ;;  %v305_v60 = vsel %vm297_vm1, %v285_v52, %v301_v56  ;;  %v588_v56 = vsub.s32 5, %v1905_v25 }
 0x100   :  { %v1354_v61 = vpop.f32.mrb[7].mxu0  ;;  %1457 = vmatmul.mubr.f32.vlgmr.msra.gmra.mrb[0].mxu1 %v305_v60 }
 0x101   :  { %v290_v62 = vadd.f32 %v1352_v58, %v1274_v45  ;;  %v1355_v63 = vadd.f32 %v1354_v61, %v1353_v59 }
 0x103   :  { %v293_v0 = vadd.f32 %v1355_v63, %v1274_v45  ;;  %vm298_vm2 = vcmp.ge.f32.partialorder %v290_v62, 0.0  ;;  %v302_v1 = vmul.f32 0.2, %v290_v62 }
 0x105   :  { %v306_v2 = vsel %vm298_vm2, %v290_v62, %v302_v1  ;;  %vm299_vm3 = vcmp.ge.f32.partialorder %v293_v0, 0.0  ;;  %v303_v3 = vmul.f32 0.2, %v293_v0  ;;  %v608_v62 = vsub.s32 6, %v1905_v25 }
 0x106   :  { %1459 = vmatprep.mubr.f32.mxu1 %v306_v2 }
 0x107   :  { %v307_v4 = vsel %vm299_vm3, %v293_v0, %v303_v3 }
 0x108   :  { %1460 = vmatmul.mubr.f32.gmra.mrb[2].mxu1 %v307_v4 }
 0x1d3   :  { %v1458_v9 = vpop.f32.mrb[0].mxu1 }
 0x1d4   :  { %v1880_v10 = vadd.f32 %v1458_v9, %v325_v7  ;;  %v394_v11 = vpop.f32.mrb[1].mxu1 }
 0x1d5   :  { %v1882_v12 = vadd.f32 %v394_v11, %v324_v8 }
 0x1d7   :  { %v1588_v13 = vpack.c.bf16 %v1880_v10, %v1882_v12 }
 0x1d9   :  { %1589 = vmatpush3.bf16.xpose.msra.mxu0 %v1588_v13 }
 0x1da   :  { %1590 = vmatprep.subr.bf16.mxu0 %v1681_v5 }
 0x1db   :  { %v1461_v16 = vpop.f32.mrb[2].mxu1 }
 0x1dc   :  { %v1892_v17 = vadd.f32 %v1461_v16, %v327_v14  ;;  %v404_v18 = vpop.f32.mrb[3].mxu1 }
 0x1dd   :  { %v1894_v19 = vadd.f32 %v404_v18, %v326_v15 }
 0x1df   :  { %v1591_v20 = vpack.c.bf16 %v1892_v17, %v1894_v19 }
 0x1e1   :  { %1592 = vmatpush3.bf16.xpose.msra.mxu0 %v1591_v20 }
 0x1e8   :  { %1471 = vmatmul.mubr.f32.vlgmr.msra.gmra.mrb[8].mxu0 %v414_v22  ;;  %v65_v22 = vld [vmem:[%s2148_s1 + $0x8] sm:$0xff] }
 0x2bb   :  { %v481_v30 = vpop.f32.mrb[8].mxu0 }
 0x2bc   :  { %v1472_v35 = vpop.f32.mrb[9].mxu0  ;;  %v509_v36 = vrot.slane %v481_v30, %v508_v28  ;;  %v488_v37 = vrot.slane %v481_v30, %v487_v29  ;;  %v529_v41 = vrot.slane %v481_v30, %v528_v33  ;;  %v629_v43 = vrot.slane %v481_v30, %v628_v34 }
 0x2bd   :  { %v549_v48 = vrot.slane %v481_v30, %v548_v42  ;;  %v569_v55 = vrot.slane %v481_v30, %v568_v49  ;;  %v589_v61 = vrot.slane %v481_v30, %v588_v56  ;;  %v609_v3 = vrot.slane %v481_v30, %v608_v62  ;;  %v64_v30 = vld [vmem:[%s2148_s1] sm:$0xff] }
 0x2be   :  { %v510_v39 = vadd.f32 %v509_v36, %v60_v32  ;;  %v489_v40 = vadd.f32 %v488_v37, %v60_v32  ;;  %v511_v46 = vadd.f32 %v509_v36, %v61_v38  ;;  %v490_v47 = vadd.f32 %v488_v37, %v61_v38 }
 0x2bf   :  { %v631_v50 = vadd.f32 %v629_v43, %v61_v38  ;;  %v531_v53 = vadd.f32 %v529_v41, %v61_v38  ;;  %v530_v54 = vadd.f32 %v529_v41, %v60_v32  ;;  %v551_v59 = vadd.f32 %v549_v48, %v61_v38 }
 0x2c0   :  { %v512_v44 = vsel %vm491_vm7, %v510_v39, -inf  ;;  %v492_v45 = vsel %vm491_vm7, %v489_v40, -inf  ;;  %v515_v51 = vsel %vm491_vm7, %v511_v46, -inf  ;;  %v495_v52 = vsel %vm491_vm7, %v490_v47, -inf }
 0x2c1   :  { %513 = vmax.xlane.f32.xlu1 %v512_v44  ;;  %493 = vmax.xlane.f32.xlu0 %v492_v45  ;;  %v535_v57 = vsel %vm491_vm7, %v531_v53, -inf  ;;  %v532_v58 = vsel %vm491_vm7, %v530_v54, -inf  ;;  %v550_v60 = vadd.f32 %v549_v48, %v60_v32  ;;  %v555_v63 = vsel %vm491_vm7, %v551_v59, -inf }
 0x2c2   :  { %v571_v1 = vadd.f32 %v569_v55, %v61_v38  ;;  %v570_v2 = vadd.f32 %v569_v55, %v60_v32  ;;  %v591_v7 = vadd.f32 %v589_v61, %v61_v38  ;;  %v590_v8 = vadd.f32 %v589_v61, %v60_v32 }
 0x2c3   :  { %v552_v0 = vsel %vm491_vm7, %v550_v60, -inf  ;;  %v611_v13 = vadd.f32 %v609_v3, %v61_v38  ;;  %v610_v14 = vadd.f32 %v609_v3, %v60_v32  ;;  %v630_v18 = vadd.f32 %v629_v43, %v60_v32  ;;  %v67_v32 = vld [vmem:[%s2148_s1 + $0x18] sm:$0xff] }
 0x2c4   :  { %v575_v4 = vsel %vm491_vm7, %v571_v1, -inf  ;;  %v572_v5 = vsel %vm491_vm7, %v570_v2, -inf  ;;  %v595_v9 = vsel %vm491_vm7, %v591_v7, -inf  ;;  %v592_v11 = vsel %vm491_vm7, %v590_v8, -inf }
 0x2c5   :  { %516 = vmax.xlane.f32.xlu1 %v515_v51  ;;  %496 = vmax.xlane.f32.xlu0 %v495_v52  ;;  %v615_v15 = vsel %vm491_vm7, %v611_v13, -inf  ;;  %v612_v16 = vsel %vm491_vm7, %v610_v14, -inf  ;;  %v632_v20 = vsel %vm491_vm7, %v630_v18, -inf  ;;  %v635_v31 = vsel %vm491_vm7, %v631_v50, -inf }
 0x2c6   :  { %v521_v35 = vrot.slane %v1901_v21, %v508_v28  ;;  %v501_v36 = vrot.slane %v1901_v21, %v487_v29  ;;  %v541_v47 = vrot.slane %v1901_v21, %v528_v33  ;;  %v561_v29 = vrot.slane %v1901_v21, %v548_v42 }
 0x2c7   :  { %v581_v60 = vrot.slane %v1901_v21, %v568_v49  ;;  %v601_v42 = vrot.slane %v1901_v21, %v588_v56  ;;  %v621_v49 = vrot.slane %v1901_v21, %v608_v62  ;;  %v641_v56 = vrot.slane %v1901_v21, %v628_v34 }
 0x2c9   :  { %536 = vmax.xlane.f32.xlu1 %v535_v57  ;;  %533 = vmax.xlane.f32.xlu0 %v532_v58 }
 0x2cd   :  { %556 = vmax.xlane.f32.xlu1 %v555_v63  ;;  %553 = vmax.xlane.f32.xlu0 %v552_v0 }
 0x2d1   :  { %576 = vmax.xlane.f32.xlu1 %v575_v4  ;;  %573 = vmax.xlane.f32.xlu0 %v572_v5 }
 0x2d5   :  { %596 = vmax.xlane.f32.xlu1 %v595_v9  ;;  %593 = vmax.xlane.f32.xlu0 %v592_v11 }
 0x2d9   :  { %616 = vmax.xlane.f32.xlu1 %v615_v15  ;;  %613 = vmax.xlane.f32.xlu0 %v612_v16 }
 0x2dd   :  { %633 = vmax.xlane.f32.xlu0 %v632_v20 }
 0x2ea   :  { %72 = vperm.xlu1 %1623, %v65_v22  }
 0x2ee   :  { %75 = vperm.xlu1 %1623, %v66_v23  }
 0x2f3   :  { %69 = vperm.xlu0 %1622, %v64_v30  }
 0x312   :  { %636 = vmax.xlane.f32.xlu1 %v635_v31 }
 0x323   :  { %78 = vperm.xlu1 %1623, %v67_v32   ;;  %v63_v32 = vand.u32 127, %v48_v24 }
 0x34e   :  { %v514_v37 = vpop.xlane.xlu1 %513  ;;  %v494_v38 = vpop.xlane.xlu0 %493 }
 0x34f   :  { %v522_v39 = vmul.f32 %v521_v35, %v514_v37  ;;  %v502_v40 = vmul.f32 %v501_v36, %v494_v38 }
 0x351   :  { %v524_v41 = vadd.f32 %v522_v39, %v502_v40 }
 0x352   :  { %v517_v43 = vpop.xlane.xlu1 %516  ;;  %v497_v44 = vpop.xlane.xlu0 %496 }
 0x353   :  { %v523_v45 = vmul.f32 %v521_v35, %v517_v43  ;;  %v503_v46 = vmul.f32 %v501_v36, %v497_v44  ;;  %v58_v44 = vsel %vm56_vm5, 1.0, %v1683_v6 }
 0x355   :  { %v525_v48 = vadd.f32 %v523_v45, %v503_v46 }
 0x356   :  { %v537_v50 = vpop.xlane.xlu1 %536  ;;  %v534_v28 = vpop.xlane.xlu0 %533 }
 0x357   :  { %v543_v51 = vmul.f32 %v541_v47, %v537_v50  ;;  %v542_v52 = vmul.f32 %v541_v47, %v534_v28 }
 0x359   :  { %v545_v53 = vadd.f32 %v543_v51, %v525_v48  ;;  %v544_v54 = vadd.f32 %v542_v52, %v524_v41 }
 0x35a   :  { %v557_v55 = vpop.xlane.xlu1 %556  ;;  %v554_v57 = vpop.xlane.xlu0 %553 }
 0x35b   :  { %v563_v58 = vmul.f32 %v561_v29, %v557_v55  ;;  %v562_v59 = vmul.f32 %v561_v29, %v554_v57 }
 0x35d   :  { %v565_v33 = vadd.f32 %v563_v58, %v545_v53  ;;  %v564_v61 = vadd.f32 %v562_v59, %v544_v54  ;;  %v2048_v59 = vsel %vm57_vm6, 1.0, %v1683_v6 }
 0x35e   :  { %v577_v63 = vpop.xlane.xlu1 %576  ;;  %v574_v0 = vpop.xlane.xlu0 %573 }
 0x35f   :  { %v583_v1 = vmul.f32 %v581_v60, %v577_v63  ;;  %v582_v2 = vmul.f32 %v581_v60, %v574_v0  ;;  %v1647_v60 = vld [vmem:[%s2149_s9 + $0x8] sm:$0xff]   ;;  %v1652_v63 = vld [vmem:[%s2149_s9 + $0x30] sm:$0xff]   ;;  %v1653_v0 = vld [vmem:[%s2149_s9 + $0x38] sm:$0xff]  }
 0x361   :  { %v585_v3 = vadd.f32 %v583_v1, %v565_v33  ;;  %v584_v4 = vadd.f32 %v582_v2, %v564_v61  ;;  %v1648_v33 = vld [vmem:[%s2149_s9 + $0x10] sm:$0xff]   ;;  %v1651_v61 = vld [vmem:[%s2149_s9 + $0x28] sm:$0xff]   ;;  %v1654_v1 = vld [vmem:[%s2150_s8] sm:$0xff]  }
 0x362   :  { %v597_v5 = vpop.xlane.xlu1 %596  ;;  %v594_v7 = vpop.xlane.xlu0 %593  ;;  %v1655_v2 = vld [vmem:[%s2150_s8 + $0x8] sm:$0xff]  }
 0x363   :  { %v603_v8 = vmul.f32 %v601_v42, %v597_v5  ;;  %v602_v9 = vmul.f32 %v601_v42, %v594_v7  ;;  %v1656_v5 = vld [vmem:[%s2151_s12] sm:$0xff]   ;;  %v1657_v7 = vld [vmem:[%s2151_s12 + $0x8] sm:$0xff]  }
 0x365   :  { %v605_v11 = vadd.f32 %v603_v8, %v585_v3  ;;  %v604_v13 = vadd.f32 %v602_v9, %v584_v4  ;;  %v1658_v8 = vld [vmem:[%s2151_s12 + $0x10] sm:$0xff]   ;;  %v1659_v9 = vld [vmem:[%s2151_s12 + $0x18] sm:$0xff]  }
 0x366   :  { %v617_v14 = vpop.xlane.xlu1 %616  ;;  %v614_v15 = vpop.xlane.xlu0 %613 }
 0x367   :  { %v623_v16 = vmul.f32 %v621_v49, %v617_v14  ;;  %v622_v18 = vmul.f32 %v621_v49, %v614_v15  ;;  %v1660_v49 = vld [vmem:[%s2151_s12 + $0x20] sm:$0xff]   ;;  %v1661_v15 = vld [vmem:[%s2151_s12 + $0x28] sm:$0xff]  }
 0x369   :  { %v625_v20 = vadd.f32 %v623_v16, %v605_v11  ;;  %v624_v22 = vadd.f32 %v622_v18, %v604_v13  ;;  %v1662_v18 = vld [vmem:[%s2151_s12 + $0x30] sm:$0xff]  }
 0x36a   :  { %v634_v23 = vpop.xlane.xlu0 %633  ;;  %v73_v36 = vpop.permute.xlu1 %72 }
 0x36b   :  { %v642_v30 = vmul.f32 %v641_v56, %v634_v23  ;;  %vm81_vm10 = vcmp.eq.s32.totalorder %v63_v32, %v73_v36  ;;  %v1305_v36 = vld [vmem:[%s2153_s10] ss:$0 sm:$0xff] }
 0x36c   :  { %v2006_v24 = vsel %vm81_vm10, 1.0, %v1683_v6 }
 0x36d   :  { %v644_v31 = vadd.f32 %v642_v30, %v624_v22 }
 0x36e   :  { %v76_v37 = vpop.permute.xlu1 %75 }
 0x36f   :  { %vm82_vm11 = vcmp.eq.s32.totalorder %v63_v32, %v76_v37 }
 0x370   :  { %v2009_v41 = vsel %vm82_vm11, 1.0, %v1683_v6 }
 0x372   :  { %v70_v35 = vpop.permute.xlu0 %69 }
 0x373   :  { %vm80_vm9 = vcmp.eq.s32.totalorder %v63_v32, %v70_v35 }
 0x374   :  { %v84_v62 = vsel %vm80_vm9, 1.0, %v1683_v6 }
 0x375   :  { %1477 = vmatprep.mubr.msk.f32.mxu1 %vm646_vm8, %v84_v62  ;;  %1498 = vmatprep.mubr.msk.f32.mxu0 %vm646_vm8, %v84_v62 }
 0x39f   :  { %v637_v38 = vpop.xlane.xlu1 %636 }
 0x3a0   :  { %v643_v21 = vmul.f32 %v641_v56, %v637_v38  ;;  %v1663_v56 = vld [vmem:[%s2151_s12 + $0x38] sm:$0xff]  }
 0x3a2   :  { %v645_v34 = vadd.f32 %v643_v21, %v625_v20  ;;  %v1664_v20 = vld [vmem:[%s2152_s11] sm:$0xff]  }
 0x3a3   :  { %v79_v40 = vpop.permute.xlu1 %78 }
 0x3a4   :  { %v1593_v39 = vpack.c.bf16 %v645_v34, %v644_v31  ;;  %vm83_vm12 = vcmp.eq.s32.totalorder %v63_v32, %v79_v40 }
 0x3a5   :  { %v2016_v43 = vsel %vm83_vm12, 1.0, %v1683_v6 }
 0x3a6   :  { %1594 = vmatprep.subr.bf16.mxu1 %v1593_v39 }
 0x3a7   :  { %1596 = vmatpush3.bf16.msra.mxu1 %v1593_v39 }
 0x3aa   :  { %1478 = vmatmul.mubr.msk.f32.vlgmr.msra.gmra.mrb[4].mxu1 %vm646_vm8, %v2006_v24 }
 0x3ab   :  { %1480 = vmatprep.mubr.msk.f32.mxu1 %vm646_vm8, %v2009_v41 }
 0x3ae   :  { %1481 = vmatmul.mubr.msk.f32.gmra.mrb[6].mxu1 %vm646_vm8, %v2016_v43 }
 0x3af   :  { %1491 = vmatprep.mubr.msk.f32.mxu1 %vm491_vm7, %v58_v44 }
 0x47d   :  { %v1479_v45 = vpop.f32.mrb[4].mxu1 }
 0x47e   :  { %v745_v46 = vsub.f32 %v1880_v10, %v1479_v45  ;;  %v725_v47 = vpop.f32.mrb[5].mxu1 }
 0x47f   :  { %v744_v48 = vsub.f32 %v1882_v12, %v725_v47 }
 0x480   :  { %v750_v50 = vmul.f32 1.442695, %v745_v46 }
 0x481   :  { %v748_v28 = vmul.f32 1.442695, %v744_v48  ;;  %v1482_v51 = vpop.f32.mrb[6].mxu1 }
 0x482   :  { %1665 = vpow2.f32 %v750_v50  ;;  %v747_v52 = vsub.f32 %v1892_v17, %v1482_v51  ;;  %v735_v29 = vpop.f32.mrb[7].mxu1 }
 0x483   :  { %1667 = vpow2.f32 %v748_v28  ;;  %v746_v53 = vsub.f32 %v1894_v19, %v735_v29  ;;  %v1646_v19 = vld [vmem:[%s2149_s9] sm:$0xff]  }
 0x484   :  { %v754_v25 = vmul.f32 1.442695, %v747_v52 }
 0x485   :  { %v752_v54 = vmul.f32 1.442695, %v746_v53 }
 0x486   :  { %1669 = vpow2.f32 %v754_v25 }
 0x487   :  { %1671 = vpow2.f32 %v752_v54 }
 0x48c   :  { %v2029_v55 = vpop.eup %1665 }
 0x48d   :  { %v2031_v10 = vpop.eup %1667 }
 0x48e   :  { %v1597_v12 = vpack.c.bf16 %v2029_v55, %v2031_v10 }
 0x490   :  { %v2035_v57 = vpop.eup %1669  ;;  %1598 = vmatprep.subr.bf16.mxu1 %v1597_v12 }
 0x491   :  { %v2037_v58 = vpop.eup %1671  ;;  %1600 = vmatpush3.bf16.msra.mxu1 %v1597_v12 }
 0x492   :  { %v1601_v17 = vpack.c.bf16 %v2035_v57, %v2037_v58 }
 0x494   :  { %1602 = vmatprep.subr.bf16.mxu1 %v1601_v17 }
 0x495   :  { %1604 = vmatpush3.bf16.msra.mxu1 %v1601_v17 }
 0x496   :  { %1504 = vmatprep.subr.bf16.mxu1 %v1646_v19 }
 0x498   :  { %1492 = vmatmul.mubr.msk.f32.vlgmr.msra.gmra.mrb[8].mxu1 %vm491_vm7, %v2048_v59 }
 0x499   :  { %1505 = vmatpush3.bf16.msra.mxu1 %v1646_v19  ;;  %1520 = vmatprep.mubr.bf16.mxu1 %v1654_v1 }
 0x49a   :  { %1506 = vmatprep.subr.bf16.mxu1 %v1647_v60 }
 0x49d   :  { %1507 = vmatpush3.bf16.msra.mxu1 %v1647_v60 }
 0x49e   :  { %1508 = vmatprep.subr.bf16.mxu1 %v1648_v33 }
 0x4a1   :  { %1509 = vmatpush3.bf16.msra.mxu1 %v1648_v33 }
 0x4a2   :  { %1510 = vmatprep.subr.bf16.mxu1 %v1649_v26 }
 0x4a5   :  { %1511 = vmatpush3.bf16.msra.mxu1 %v1649_v26 }
 0x4a6   :  { %1512 = vmatprep.subr.bf16.mxu1 %v1650_v27 }
 0x4a9   :  { %1513 = vmatpush3.bf16.msra.mxu1 %v1650_v27 }
 0x4aa   :  { %1514 = vmatprep.subr.bf16.mxu1 %v1651_v61 }
 0x4ad   :  { %1515 = vmatpush3.bf16.msra.mxu1 %v1651_v61 }
 0x4ae   :  { %1516 = vmatprep.subr.bf16.mxu1 %v1652_v63 }
 0x4b1   :  { %1517 = vmatpush3.bf16.msra.mxu1 %v1652_v63 }
 0x4b2   :  { %1518 = vmatprep.subr.bf16.mxu1 %v1653_v0 }
 0x4b5   :  { %1519 = vmatpush3.bf16.msra.mxu1 %v1653_v0 }
 0x4b8   :  { %1521 = vmatmul.mubr.bf16.vlgmr.msra.gmra.mrb[12].mxu1 %v1655_v2 }
 0x4b9   :  { %1552 = vmatprep.mubr.msk.f32.mxu1 %vm491_vm7, %v58_v44 }
 0x56b   :  { %v1493_v42 = vpop.f32.mrb[8].mxu1 }
 0x56c   :  { %v828_v3 = vpop.f32.mrb[9].mxu1 }
 0x56d   :  { %v1605_v4 = vpack.c.bf16 %v1493_v42, %v828_v3 }
 0x56f   :  { %1606 = vmatprep.subr.bf16.mxu0 %v1605_v4 }
 0x570   :  { %1608 = vmatpush3.bf16.msra.mxu0 %v1605_v4 }
 0x571   :  { %1524 = vmatprep.subr.bf16.mxu0 %v1683_v6 }
 0x573   :  { %1499 = vmatmul.mubr.msk.f32.vlgmr.msra.gmra.mrb[10].mxu0 %vm646_vm8, %v2006_v24 }
 0x574   :  { %1501 = vmatprep.mubr.msk.f32.mxu0 %vm646_vm8, %v2009_v41  ;;  %1525 = vmatpush3.bf16.msra.mxu0 %v1656_v5 }
 0x575   :  { %1526 = vmatprep.subr.bf16.mxu0 %v1683_v6 }
 0x577   :  { %1502 = vmatmul.mubr.msk.f32.gmra.mrb[12].mxu0 %vm646_vm8, %v2016_v43 }
 0x578   :  { %1540 = vmatprep.mubr.msk.bf16.mxu0 %vm1682_vm4, %v1683_v6  ;;  %1527 = vmatpush3.bf16.msra.mxu0 %v1657_v7 }
 0x579   :  { %1528 = vmatprep.subr.bf16.mxu0 %v1683_v6 }
 0x57c   :  { %1529 = vmatpush3.bf16.msra.mxu0 %v1658_v8 }
 0x57d   :  { %1530 = vmatprep.subr.bf16.mxu0 %v1683_v6 }
 0x580   :  { %1531 = vmatpush3.bf16.msra.mxu0 %v1659_v9 }
 0x581   :  { %1532 = vmatprep.subr.bf16.mxu0 %v1683_v6 }
 0x584   :  { %1533 = vmatpush3.bf16.msra.mxu0 %v1660_v49 }
 0x585   :  { %1534 = vmatprep.subr.bf16.mxu0 %v1683_v6 }
 0x588   :  { %1535 = vmatpush3.bf16.msra.mxu0 %v1661_v15 }
 0x589   :  { %1536 = vmatprep.subr.bf16.mxu0 %v1683_v6 }
 0x58b   :  { %v1522_v11 = vpop.f32.mrb[12].mxu1 }
 0x58c   :  { %v1051_v13 = vpop.f32.mrb[13].mxu1  ;;  %1537 = vmatpush3.bf16.msra.mxu0 %v1662_v18  ;;  %v1060_v48 = vadd.f32 %v1522_v11, %v1305_v36 }
 0x58d   :  { %v1523_v14 = vpop.f32.mrb[14].mxu1  ;;  %1538 = vmatprep.subr.bf16.mxu0 %v1683_v6  ;;  %v1052_v40 = vadd.f32 %v1305_v36, %v1051_v13 }
 0x58e   :  { %v1054_v16 = vpop.f32.mrb[15].mxu1  ;;  %v1063_v46 = vadd.f32 %v1523_v14, %v1305_v36 }
 0x58f   :  { %v1055_v34 = vadd.f32 %v1305_v36, %v1054_v16 }
 0x590   :  { %1539 = vmatpush3.bf16.msra.mxu0 %v1663_v56 }
 0x593   :  { %1541 = vmatmul.mubr.bf16.vlgmr.msra.gmra.mrb[16].mxu0 %v1664_v20 }
 0x646   :  { %v1500_v22 = vpop.f32.mrb[10].mxu0 }
 0x647   :  { %v909_v23 = vadd.f32 1e-16, %v1500_v22  ;;  %v903_v30 = vpop.f32.mrb[11].mxu0 }
 0x648   :  { %v904_v31 = vadd.f32 1e-16, %v903_v30 }
 0x649   :  { %1673 = vrcp.f32 %v909_v23 }
 0x64a   :  { %1675 = vrcp.f32 %v904_v31  ;;  %v1503_v32 = vpop.f32.mrb[12].mxu0 }
 0x64b   :  { %v919_v35 = vadd.f32 1e-16, %v1503_v32  ;;  %v913_v62 = vpop.f32.mrb[13].mxu0 }
 0x64c   :  { %v914_v6 = vadd.f32 1e-16, %v913_v62 }
 0x64d   :  { %1677 = vrcp.f32 %v919_v35 }
 0x64e   :  { %1679 = vrcp.f32 %v914_v6 }
 0x653   :  { %v1674_v37 = vpop.eup %1673 }
 0x654   :  { %v1676_v38 = vpop.eup %1675  ;;  %v925_v21 = vmul.f32 %v1674_v37, %v2029_v55  ;;  %v1316_v55 = vld [vmem:[%s2154_s13] ss:$0 sm:$0xff] }
 0x655   :  { %v923_v39 = vmul.f32 %v1676_v38, %v2031_v10 }
 0x656   :  { %v1067_v24 = vmul.f32 %v1055_v34, %v925_v21 }
 0x657   :  { %v1678_v41 = vpop.eup %1677  ;;  %v1066_v43 = vmul.f32 %v1052_v40, %v923_v39 }
 0x658   :  { %v1680_v44 = vpop.eup %1679  ;;  %v929_v45 = vmul.f32 %v1678_v41, %v2035_v57 }
 0x659   :  { %v927_v47 = vmul.f32 %v1680_v44, %v2037_v58  ;;  %v1609_v50 = vpack.c.bf16 %v1067_v24, %v1066_v43 }
 0x65a   :  { %v1069_v28 = vmul.f32 %v1063_v46, %v929_v45 }
 0x65b   :  { %v1068_v51 = vmul.f32 %v1060_v48, %v927_v47  ;;  %1610 = vmatprep.subr.bf16.mxu1 %v1609_v50 }
 0x65c   :  { %1612 = vmatpush3.bf16.msra.mxu1 %v1609_v50 }
 0x65d   :  { %v1613_v52 = vpack.c.bf16 %v1069_v28, %v1068_v51 }
 0x65f   :  { %1614 = vmatprep.subr.bf16.mxu1 %v1613_v52 }
 0x660   :  { %1616 = vmatpush3.bf16.msra.mxu1 %v1613_v52 }
 0x663   :  { %1553 = vmatmul.mubr.msk.f32.vlgmr.msra.gmra.mrb[10].mxu1 %vm491_vm7, %v2048_v59 }
 0x666   :  { %v1183_v29 = vpop.f32.mrb[16].mxu0 }
 0x667   :  { %v1542_v53 = vpop.f32.mrb[17].mxu0  ;;  %v1184_v12 = vadd.f32 %v1316_v55, %v1183_v29 }
 0x668   :  { %v1186_v25 = vpop.f32.mrb[18].mxu0 }
 0x669   :  { %v1543_v54 = vpop.f32.mrb[19].mxu0  ;;  %v1187_v10 = vadd.f32 %v1316_v55, %v1186_v25 }
 0x736   :  { %v1554_v57 = vpop.f32.mrb[10].mxu1 }
 0x737   :  { %v1262_v58 = vadd.f32 %v1554_v57, %v1187_v10  ;;  %v1256_v17 = vpop.f32.mrb[11].mxu1 }
 0x738   :  { %v1257_v19 = vadd.f32 %v1256_v17, %v1184_v12 }
 0x739   :  { %v1266_v60 = vmax.f32 %v1262_v58, 0.0 }
 0x73a   :  { %v1265_v33 = vmax.f32 %v1257_v19, 0.0 }
 0x73b   :  { %1268 = vst [vmem:[%s2155_s14 + $0x8] sm:$0xff] %v1266_v60 }
 0x73c   :  { %1267 = vst [vmem:[%s2155_s14] sm:$0xff] %v1265_v33 }

// kernel: ingram_forward.18
= control target key start
LH: loop header
LB: loop body
LE: loop exit
PB: predicated region body
PF: predicated region fallthrough
CT: control target
= control target key end

     0   :  { %v232_v1 = vmov 0.0   ;;  %vm233_vm0 = vmmov 0   ;;  %s299_s0 = inlined_call_operand.vmem [shape: bf16[16,128], index: 0, kind: input, shape index: {}]   ;;  %s300_s1 = inlined_call_operand.vmem [shape: bf16[128,32], index: 1, kind: input, shape index: {}]   ;;  %s301_s2 = inlined_call_operand.vmem [shape: f32[1,32], index: 2, kind: input, shape index: {}]   ;;  %s302_s3 = inlined_call_operand.hbm [shape: f32[16,32], index: 3, kind: output, shape index: {}]  }
   0x1   :  { %v199_v0 = vld [vmem:[%s300_s1] sm:$0xff]   ;;  %174 = vmatprep.subr.bf16.mxu0 %v232_v1  ;;  %v200_v2 = vld [vmem:[%s300_s1 + $0x8] sm:$0xff]   ;;  %190 = vmatprep.mubr.msk.bf16.mxu0 %vm233_vm0, %v232_v1  ;;  %v201_v3 = vld [vmem:[%s300_s1 + $0x10] sm:$0xff]  }
   0x2   :  { %175 = vmatpush3.bf16.msra.mxu0 %v199_v0 }
   0x3   :  { %176 = vmatprep.subr.bf16.mxu0 %v232_v1 }
   0x6   :  { %177 = vmatpush3.bf16.msra.mxu0 %v200_v2 }
   0x7   :  { %178 = vmatprep.subr.bf16.mxu0 %v232_v1 }
   0x8   :  { %8 = vsyncpa [#allocation3], 0  ;;  %v202_v4 = vld [vmem:[%s300_s1 + $0x18] sm:$0xff]   ;;  %v203_v5 = vld [vmem:[%s300_s1 + $0x20] sm:$0xff]   ;;  %s234_s5 = smov [#allocation2]   ;;  %vm136_vm1 = vcmask 261120  }
   0x9   :  { %v204_v6 = vld [vmem:[%s300_s1 + $0x28] sm:$0xff]   ;;  %v205_v7 = vld [vmem:[%s300_s1 + $0x30] sm:$0xff]   ;;  %v206_v8 = vld [vmem:[%s300_s1 + $0x38] sm:$0xff]   ;;  %s144_s6 = sshll.u32 %s234_s5, 4  ;;  %s145_s6 = int_to_ptr.vmem [resolvable:$true] %s144_s6 }
   0xa   :  { %179 = vmatpush3.bf16.msra.mxu0 %v201_v3  ;;  %v207_v9 = vld [vmem:[%s299_s0] sm:$0xff]   ;;  %s208_s1 = scalar_lea.vmem %s145_s6, 256  ;;  %p213_p1 = scmp.lt.s32.totalorder %s145_s6, %s145_s6 }
   0xb   :  { %180 = vmatprep.subr.bf16.mxu0 %v232_v1  ;;  %v155_v10 = vld [vmem:[%s301_s2] ss:$0 sm:$0xff]  ;;  %p209_p0 = scmp.ne.s32.totalorder %s145_s6, %s208_s1  ;;  %p214_p2 = scmp.lt.s32.totalorder %s208_s1, %s208_s1 }
   0xd   :  { %p215_p3 = por %p214_p2, %p213_p1 }
   0xe   :  { %181 = vmatpush3.bf16.msra.mxu0 %v202_v4 }
   0xf   :  { %182 = vmatprep.subr.bf16.mxu0 %v232_v1  ;;  %p216_p4 = pnand %p215_p3, %p209_p0 }
  0x12   :  { %183 = vmatpush3.bf16.msra.mxu0 %v203_v5 }
  0x13   :  { %184 = vmatprep.subr.bf16.mxu0 %v232_v1 }
  0x16   :  { %185 = vmatpush3.bf16.msra.mxu0 %v204_v6 }
  0x17   :  { %186 = vmatprep.subr.bf16.mxu0 %v232_v1 }
  0x1a   :  { %187 = vmatpush3.bf16.msra.mxu0 %v205_v7 }
  0x1b   :  { %188 = vmatprep.subr.bf16.mxu0 %v232_v1 }
  0x1e   :  { %189 = vmatpush3.bf16.msra.mxu0 %v206_v8 }
  0x21   :  { %191 = vmatmul.mubr.bf16.vlgmr.msra.gmra.mrb[0].mxu0 %v207_v9 }
  0xf4   :  { %v129_v11 = vpop.f32.mrb[0].mxu0 }
  0xf5   :  { %v130_v12 = vadd.f32 %v155_v10, %v129_v11  ;;  %v192_v13 = vpop.f32.mrb[1].mxu0 }
  0xf6   :  { %v132_v14 = vpop.f32.mrb[2].mxu0 }
  0xf7   :  { %137 = vst.msk [vmem:[#allocation2] sm:$0xff] %vm136_vm1, %v130_v12  ;;  %v133_v15 = vadd.f32 %v155_v10, %v132_v14  ;;  %v193_v16 = vpop.f32.mrb[3].mxu0 }
  0xf9   :  { %138 = vst.msk [vmem:[#allocation2 + $0x8] sm:$0xff] %vm136_vm1, %v133_v15 }
  0xfa   :  { %219 = shalt.err (!%p216_p4)
}
  0xfb   :  { %s220_s7 = scalar_lea.hbm %s302_s3, 256 }
  0xfc   :  { %p221_p5 = scmp.ne.s32.totalorder %s302_s3, %s220_s7  ;;  %p224_p6 = scmp.lt.u32.totalorder %s220_s7, %s302_s3 }
  0xfe   :  { %p226_p7 = pnand %p224_p6, %p221_p5 }
 0x100   :  { %229 = shalt.err (!%p226_p7)
}
 0x101   :  { %s235_s12 = smov 128   ;;  %s236_s13 = smov 8  }
 0x102   :  { %150 = dma.vmem_to_hbm [thread:$0]  %s145_s6, 256, %s302_s3, [#allocation3], %s235_s12, %s235_s12, %s236_s13  }
 0x103   :  { %230 = dma.done.wait [#allocation3], 256  }
 0x104   :  { %231 = vsyncadd [#allocation3], 4294967040 }
 0x105   :  { %154 = vsyncpa [#allocation3], 1 }

// kernel: ingram_forward.17
= control target key start
LH: loop header
LB: loop body
LE: loop exit
PB: predicated region body
PF: predicated region fallthrough
CT: control target
= control target key end

     0   :  { %s319_s0 = inlined_call_operand.vmem [shape: bf16[32,128], index: 0, kind: input, shape index: {}]   ;;  %s320_s1 = inlined_call_operand.vmem [shape: bf16[128,32], index: 1, kind: input, shape index: {}]   ;;  %s321_s2 = inlined_call_operand.vmem [shape: f32[1,32], index: 2, kind: input, shape index: {}]   ;;  %s322_s3 = inlined_call_operand.hbm [shape: f32[32,32], index: 3, kind: output, shape index: {}]  }
   0x1   :  { %v217_v0 = vld [vmem:[%s320_s1] sm:$0xff]   ;;  %v218_v1 = vld [vmem:[%s320_s1 + $0x8] sm:$0xff]   ;;  %v219_v2 = vld [vmem:[%s320_s1 + $0x10] sm:$0xff]  }
   0x2   :  { %194 = vmatprep.subr.bf16.mxu0 %v217_v0  ;;  %v220_v3 = vld [vmem:[%s320_s1 + $0x18] sm:$0xff]   ;;  %v225_v4 = vld [vmem:[%s319_s0] sm:$0xff]  }
   0x3   :  { %195 = vmatpush3.bf16.msra.mxu0 %v217_v0  ;;  %210 = vmatprep.mubr.bf16.mxu0 %v225_v4 }
   0x4   :  { %196 = vmatprep.subr.bf16.mxu0 %v218_v1 }
   0x7   :  { %197 = vmatpush3.bf16.msra.mxu0 %v218_v1 }
   0x8   :  { %198 = vmatprep.subr.bf16.mxu0 %v219_v2 }
   0x9   :  { %8 = vsyncpa [#allocation3], 0  ;;  %v221_v5 = vld [vmem:[%s320_s1 + $0x20] sm:$0xff]   ;;  %v222_v6 = vld [vmem:[%s320_s1 + $0x28] sm:$0xff]   ;;  %vm152_vm0 = vcmask 261120   ;;  %s251_s7 = smov [#allocation2]  }
   0xa   :  { %v223_v7 = vld [vmem:[%s320_s1 + $0x30] sm:$0xff]   ;;  %v224_v8 = vld [vmem:[%s320_s1 + $0x38] sm:$0xff]   ;;  %v226_v9 = vld [vmem:[%s319_s0 + $0x8] sm:$0xff]   ;;  %s162_s8 = sshll.u32 %s251_s7, 4  ;;  %s163_s8 = int_to_ptr.vmem [resolvable:$true] %s162_s8 }
   0xb   :  { %199 = vmatpush3.bf16.msra.mxu0 %v219_v2  ;;  %v173_v10 = vld [vmem:[%s321_s2] ss:$0 sm:$0xff]  ;;  %s227_s0 = scalar_lea.vmem %s163_s8, 512  ;;  %p232_p1 = scmp.lt.s32.totalorder %s163_s8, %s163_s8 }
   0xc   :  { %200 = vmatprep.subr.bf16.mxu0 %v220_v3  ;;  %p228_p0 = scmp.ne.s32.totalorder %s163_s8, %s227_s0  ;;  %p233_p2 = scmp.lt.s32.totalorder %s227_s0, %s227_s0 }
   0xe   :  { %p234_p3 = por %p233_p2, %p232_p1 }
   0xf   :  { %201 = vmatpush3.bf16.msra.mxu0 %v220_v3 }
  0x10   :  { %202 = vmatprep.subr.bf16.mxu0 %v221_v5  ;;  %p235_p4 = pnand %p234_p3, %p228_p0 }
  0x13   :  { %203 = vmatpush3.bf16.msra.mxu0 %v221_v5 }
  0x14   :  { %204 = vmatprep.subr.bf16.mxu0 %v222_v6 }
  0x17   :  { %205 = vmatpush3.bf16.msra.mxu0 %v222_v6 }
  0x18   :  { %206 = vmatprep.subr.bf16.mxu0 %v223_v7 }
  0x1b   :  { %207 = vmatpush3.bf16.msra.mxu0 %v223_v7 }
  0x1c   :  { %208 = vmatprep.subr.bf16.mxu0 %v224_v8 }
  0x1f   :  { %209 = vmatpush3.bf16.msra.mxu0 %v224_v8 }
  0x22   :  { %211 = vmatmul.mubr.bf16.vlgmr.msra.gmra.mrb[0].mxu0 %v226_v9 }
  0xf5   :  { %v212_v11 = vpop.f32.mrb[0].mxu0 }
  0xf6   :  { %v146_v12 = vadd.f32 %v212_v11, %v173_v10  ;;  %v137_v13 = vpop.f32.mrb[1].mxu0 }
  0xf7   :  { %v138_v14 = vadd.f32 %v173_v10, %v137_v13  ;;  %v213_v15 = vpop.f32.mrb[2].mxu0 }
  0xf8   :  { %155 = vst.msk [vmem:[#allocation2 + $0x10] sm:$0xff] %vm152_vm0, %v146_v12  ;;  %v149_v16 = vadd.f32 %v213_v15, %v173_v10  ;;  %v140_v17 = vpop.f32.mrb[3].mxu0 }
  0xf9   :  { %153 = vst.msk [vmem:[#allocation2] sm:$0xff] %vm152_vm0, %v138_v14  ;;  %v141_v18 = vadd.f32 %v173_v10, %v140_v17 }
  0xfa   :  { %156 = vst.msk [vmem:[#allocation2 + $0x18] sm:$0xff] %vm152_vm0, %v149_v16 }
  0xfb   :  { %154 = vst.msk [vmem:[#allocation2 + $0x8] sm:$0xff] %vm152_vm0, %v141_v18 }
  0xfc   :  { %238 = shalt.err (!%p235_p4)
}
  0xfd   :  { %s239_s9 = scalar_lea.hbm %s322_s3, 512 }
  0xfe   :  { %p240_p5 = scmp.ne.s32.totalorder %s322_s3, %s239_s9  ;;  %p243_p6 = scmp.lt.u32.totalorder %s239_s9, %s322_s3 }
 0x100   :  { %p245_p7 = pnand %p243_p6, %p240_p5 }
 0x102   :  { %248 = shalt.err (!%p245_p7)
}
 0x103   :  { %s252_s14 = smov 128   ;;  %s253_s15 = smov 8  }
 0x104   :  { %168 = dma.vmem_to_hbm [thread:$0]  %s163_s8, 512, %s322_s3, [#allocation3], %s252_s14, %s252_s14, %s253_s15  }
 0x105   :  { %249 = dma.done.wait [#allocation3], 512  }
 0x106   :  { %250 = vsyncadd [#allocation3], 4294966784 }
 0x107   :  { %172 = vsyncpa [#allocation3], 1 }

// kernel: ingram_forward.15
= control target key start
LH: loop header
LB: loop body
LE: loop exit
PB: predicated region body
PF: predicated region fallthrough
CT: control target
= control target key end

     0   :  { %vm2953_vm12 = vmmov 0   ;;  %vm1128_vm13 = vcmask 261120   ;;  %s3870_s3 = inlined_call_operand.vmem [shape: bf16[384,128], index: 3, kind: input, shape index: {}]   ;;  %s3871_s2 = inlined_call_operand.vmem [shape: bf16[96,384], index: 2, kind: input, shape index: {}]   ;;  %s3872_s5 = inlined_call_operand.vmem [shape: f32[128,128], index: 5, kind: input, shape index: {}]   ;;  %s3873_s4 = inlined_call_operand.vmem [shape: f32[1,128], index: 4, kind: input, shape index: {}]   ;;  %s3874_s1 = inlined_call_operand.vmem [shape: s32[96,1], index: 1, kind: input, shape index: {}]   ;;  %s3875_s6 = inlined_call_operand.vmem [shape: f32[8,128], index: 6, kind: input, shape index: {}]   ;;  %s3876_s0 = inlined_call_operand.vmem [shape: s32[1,96], index: 0, kind: input, shape index: {}]   ;;  %s3877_s8 = inlined_call_operand.vmem [shape: bf16[256,128], index: 8, kind: input, shape index: {}]   ;;  %s3878_s7 = inlined_call_operand.vmem [shape: bf16[96,256], index: 7, kind: input, shape index: {}]   ;;  %s3879_s11 = inlined_call_operand.vmem [shape: bf16[128,128], index: 11, kind: input, shape index: {}]   ;;  %s3880_s10 = inlined_call_operand.vmem [shape: bf16[32,128], index: 10, kind: input, shape index: {}]   ;;  %s3881_s9 = inlined_call_operand.vmem [shape: f32[1,128], index: 9, kind: input, shape index: {}]   ;;  %s3882_s12 = inlined_call_operand.vmem [shape: f32[1,128], index: 12, kind: input, shape index: {}]   ;;  %s3883_s13 = inlined_call_operand.vmem [shape: f32[32,128], index: 13, kind: output, shape index: {}]  }
   0x1   :  { %v2812_v0 = vld [vmem:[%s3870_s3 + $0x40] sm:$0xff]   ;;  %v2815_v3 = vld [vmem:[%s3870_s3 + $0x48] sm:$0xff]   ;;  %v2818_v6 = vld [vmem:[%s3870_s3 + $0x50] sm:$0xff]  }
   0x2   :  { %v2813_v1 = vld [vmem:[%s3870_s3] sm:$0xff]   ;;  %2221 = vmatprep.subr.bf16.mxu0 %v2812_v0  ;;  %v2816_v4 = vld [vmem:[%s3870_s3 + $0x8] sm:$0xff]   ;;  %v2819_v7 = vld [vmem:[%s3870_s3 + $0x10] sm:$0xff]  }
   0x3   :  { %v2814_v2 = vld [vmem:[%s3870_s3 + $0x80] sm:$0xff]   ;;  %2222 = vmatpush3.bf16.msra.mxu0 %v2813_v1  ;;  %v2817_v5 = vld [vmem:[%s3870_s3 + $0x88] sm:$0xff]   ;;  %v2820_v8 = vld [vmem:[%s3870_s3 + $0x90] sm:$0xff]  }
   0x4   :  { %2454 = vmatprep.subr.bf16.mxu1 %v2814_v2  ;;  %2223 = vmatprep.subr.bf16.mxu0 %v2815_v3  ;;  %v2821_v9 = vld [vmem:[%s3870_s3 + $0x58] sm:$0xff]   ;;  %v2824_v12 = vld [vmem:[%s3870_s3 + $0x60] sm:$0xff]   ;;  %v2827_v15 = vld [vmem:[%s3870_s3 + $0x68] sm:$0xff]  }
   0x5   :  { %2455 = vmatpush3.bf16.msra.mxu1 %v2814_v2  ;;  %v2822_v10 = vld [vmem:[%s3870_s3 + $0x18] sm:$0xff]   ;;  %v2826_v13 = vld [vmem:[%s3870_s3 + $0xa0] sm:$0xff]   ;;  %v2829_v16 = vld [vmem:[%s3870_s3 + $0xa8] sm:$0xff]  }
   0x6   :  { %2456 = vmatprep.subr.bf16.mxu1 %v2817_v5  ;;  %v2823_v11 = vld [vmem:[%s3870_s3 + $0x98] sm:$0xff]   ;;  %v2825_v14 = vld [vmem:[%s3870_s3 + $0x20] sm:$0xff]   ;;  %v2828_v17 = vld [vmem:[%s3870_s3 + $0x28] sm:$0xff]  }
   0x7   :  { %2224 = vmatpush3.bf16.msra.mxu0 %v2816_v4  ;;  %v2830_v18 = vld [vmem:[%s3870_s3 + $0x70] sm:$0xff]   ;;  %v2833_v21 = vld [vmem:[%s3870_s3 + $0x78] sm:$0xff]   ;;  %v2836_v26 = vld [vmem:[%s3871_s2] ss:$12 sps:$4 sm:$0xff]  }
   0x8   :  { %2225 = vmatprep.subr.bf16.mxu0 %v2818_v6  ;;  %v2831_v19 = vld [vmem:[%s3870_s3 + $0x30] sm:$0xff]   ;;  %v2835_v22 = vld [vmem:[%s3870_s3 + $0xb8] sm:$0xff]   ;;  %v2840_v28 = vld [vmem:[%s3871_s2 + $0x20] ss:$12 sps:$4 sm:$0xff]  }
   0x9   :  { %2457 = vmatpush3.bf16.msra.mxu1 %v2817_v5  ;;  %v2832_v20 = vld [vmem:[%s3870_s3 + $0xb0] sm:$0xff]   ;;  %v2834_v25 = vld [vmem:[%s3870_s3 + $0x38] sm:$0xff]   ;;  %v658_v31 = vld [vmem:[%s3872_s5] sm:$0xff] }
   0xa   :  { %2458 = vmatprep.subr.bf16.mxu1 %v2820_v8  ;;  %v2838_v23 = vld [vmem:[%s3871_s2 + $0x4] ss:$12 sps:$4 sm:$0xff]   ;;  %v2839_v24 = vld [vmem:[%s3871_s2 + $0x8] ss:$12 sps:$4 sm:$0xff]   ;;  %v661_v36 = vld [vmem:[%s3872_s5 + $0x18] sm:$0xff] }
   0xb   :  { %2226 = vmatpush3.bf16.msra.mxu0 %v2819_v7  ;;  %492 = vmatprep.mubr.bf16.mxu0 %v2838_v23  ;;  %v2841_v27 = vld [vmem:[%s3871_s2 + $0x1c] ss:$12 sps:$4 sm:$0xff]   ;;  %v2847_v29 = vld [vmem:[%s3871_s2 + $0x38] ss:$12 sps:$4 sm:$0xff]   ;;  %v660_v33 = vld [vmem:[%s3872_s5 + $0x10] sm:$0xff] }
   0xc   :  { %2227 = vmatprep.subr.bf16.mxu0 %v2821_v9  ;;  %2470 = vmatprep.mubr.bf16.mxu1 %v2839_v24  ;;  %v2843_v30 = vld [vmem:[%s3871_s2 + $0x18] ss:$12 sps:$4 sm:$0xff]   ;;  %v659_v32 = vld [vmem:[%s3872_s5 + $0x8] sm:$0xff]  ;;  %v2844_v34 = vld [vmem:[%s3871_s2 + $0x34] ss:$12 sps:$4 sm:$0xff]   ;;  %v2695_v38 = vpack.c.bf16 %v661_v36, %v660_v33 }
   0xd   :  { %2459 = vmatpush3.bf16.msra.mxu1 %v2820_v8  ;;  %v2691_v35 = vpack.c.bf16 %v659_v32, %v658_v31  ;;  %v2848_v37 = vld [vmem:[%s3871_s2 + $0x50] ss:$12 sps:$4 sm:$0xff]   ;;  %v662_v39 = vld [vmem:[%s3872_s5 + $0x20] sm:$0xff]  ;;  %v663_v40 = vld [vmem:[%s3872_s5 + $0x28] sm:$0xff] }
   0xe   :  { %2460 = vmatprep.subr.bf16.mxu1 %v2823_v11  ;;  %v2855_v41 = vld [vmem:[%s3871_s2 + $0x68] ss:$12 sps:$4 sm:$0xff]   ;;  %v2699_v42 = vpack.c.bf16 %v663_v40, %v662_v39  ;;  %v665_v44 = vld [vmem:[%s3872_s5 + $0x38] sm:$0xff]  ;;  %v2856_v48 = vld [vmem:[%s3871_s2 + $0x80] ss:$12 sps:$4 sm:$0xff]  }
   0xf   :  { %2228 = vmatpush3.bf16.msra.mxu0 %v2822_v10  ;;  %v664_v43 = vld [vmem:[%s3872_s5 + $0x30] sm:$0xff]  ;;  %v2849_v46 = vld [vmem:[%s3871_s2 + $0x4c] ss:$12 sps:$4 sm:$0xff]   ;;  %v666_v49 = vld [vmem:[%s3872_s5 + $0x40] sm:$0xff] }
  0x10   :  { %2229 = vmatprep.subr.bf16.mxu0 %v2824_v12  ;;  %v2846_v45 = vld [vmem:[%s3871_s2 + $0x30] ss:$12 sps:$4 sm:$0xff]   ;;  %v2703_v47 = vpack.c.bf16 %v665_v44, %v664_v43  ;;  %v667_v50 = vld [vmem:[%s3872_s5 + $0x48] sm:$0xff]  ;;  %v2859_v56 = vld [vmem:[%s3871_s2 + $0x78] ss:$12 sps:$4 sm:$0xff]  }
  0x11   :  { %2461 = vmatpush3.bf16.msra.mxu1 %v2823_v11  ;;  %v2707_v51 = vpack.c.bf16 %v667_v50, %v666_v49  ;;  %v2851_v52 = vld [vmem:[%s3871_s2 + $0x48] ss:$12 sps:$4 sm:$0xff]   ;;  %v2852_v53 = vld [vmem:[%s3871_s2 + $0x64] ss:$12 sps:$4 sm:$0xff]   ;;  %v2854_v54 = vld [vmem:[%s3871_s2 + $0x60] ss:$12 sps:$4 sm:$0xff]  }
  0x12   :  { %2462 = vmatprep.subr.bf16.mxu1 %v2826_v13  ;;  %v2857_v55 = vld [vmem:[%s3871_s2 + $0x7c] ss:$12 sps:$4 sm:$0xff]   ;;  %v668_v57 = vld [vmem:[%s3872_s5 + $0x50] sm:$0xff]  ;;  %v670_v60 = vld [vmem:[%s3872_s5 + $0x60] sm:$0xff] }
  0x13   :  { %2230 = vmatpush3.bf16.msra.mxu0 %v2825_v14  ;;  %v669_v58 = vld [vmem:[%s3872_s5 + $0x58] sm:$0xff]  ;;  %v671_v61 = vld [vmem:[%s3872_s5 + $0x68] sm:$0xff]  ;;  %v672_v63 = vld [vmem:[%s3872_s5 + $0x70] sm:$0xff] }
  0x14   :  { %2231 = vmatprep.subr.bf16.mxu0 %v2827_v15  ;;  %v2711_v59 = vpack.c.bf16 %v669_v58, %v668_v57  ;;  %v2715_v62 = vpack.c.bf16 %v671_v61, %v670_v60  ;;  %v673_v0 = vld [vmem:[%s3872_s5 + $0x78] sm:$0xff]  ;;  %v3204_v4 = vld [vmem:[%s3873_s4] ss:$0 sm:$0xff] }
  0x15   :  { %2463 = vmatpush3.bf16.msra.mxu1 %v2826_v13  ;;  %v2719_v1 = vpack.c.bf16 %v673_v0, %v672_v63 }
  0x16   :  { %2464 = vmatprep.subr.bf16.mxu1 %v2829_v16 }
  0x17   :  { %2232 = vmatpush3.bf16.msra.mxu0 %v2828_v17 }
  0x18   :  { %2233 = vmatprep.subr.bf16.mxu0 %v2830_v18 }
  0x19   :  { %2465 = vmatpush3.bf16.msra.mxu1 %v2829_v16 }
  0x1a   :  { %2466 = vmatprep.subr.bf16.mxu1 %v2832_v20 }
  0x1b   :  { %2234 = vmatpush3.bf16.msra.mxu0 %v2831_v19 }
  0x1c   :  { %2235 = vmatprep.subr.bf16.mxu0 %v2833_v21 }
  0x1d   :  { %2467 = vmatpush3.bf16.msra.mxu1 %v2832_v20 }
  0x1e   :  { %2468 = vmatprep.subr.bf16.mxu1 %v2835_v22 }
  0x1f   :  { %2236 = vmatpush3.bf16.msra.mxu0 %v2834_v25 }
  0x21   :  { %2469 = vmatpush3.bf16.msra.mxu1 %v2835_v22 }
  0x22   :  { %493 = vmatmul.mubr.bf16.vlgmr.msra.gmra.mrb[0].mxu0 %v2836_v26  ;;  %2692 = vmatprep.subr.bf16.mxu1 %v2691_v35 }
  0x23   :  { %500 = vmatprep.mubr.bf16.mxu0 %v2841_v27 }
  0x24   :  { %2471 = vmatmul.mubr.bf16.vlgmr.msra.gmra.mrb[0].mxu1 %v2840_v28 }
  0x25   :  { %2474 = vmatprep.mubr.bf16.mxu1 %v2847_v29  ;;  %2694 = vmatpush3.bf16.msra.mxu1 %v2691_v35 }
  0x26   :  { %2696 = vmatprep.subr.bf16.mxu1 %v2695_v38 }
  0x29   :  { %2698 = vmatpush3.bf16.msra.mxu1 %v2695_v38 }
  0x2a   :  { %501 = vmatmul.mubr.bf16.gmra.mrb[4].mxu0 %v2843_v30  ;;  %2700 = vmatprep.subr.bf16.mxu1 %v2699_v42 }
  0x2b   :  { %508 = vmatprep.mubr.bf16.mxu0 %v2844_v34 }
  0x2c   :  { %2475 = vmatmul.mubr.bf16.gmra.mrb[4].mxu1 %v2848_v37 }
  0x2d   :  { %2478 = vmatprep.mubr.bf16.mxu1 %v2855_v41  ;;  %2702 = vmatpush3.bf16.msra.mxu1 %v2699_v42 }
  0x2e   :  { %2704 = vmatprep.subr.bf16.mxu1 %v2703_v47 }
  0x31   :  { %2706 = vmatpush3.bf16.msra.mxu1 %v2703_v47 }
  0x32   :  { %509 = vmatmul.mubr.bf16.gmra.mrb[8].mxu0 %v2846_v45  ;;  %2708 = vmatprep.subr.bf16.mxu1 %v2707_v51 }
  0x33   :  { %516 = vmatprep.mubr.bf16.mxu0 %v2849_v46 }
  0x34   :  { %2479 = vmatmul.mubr.bf16.gmra.mrb[8].mxu1 %v2856_v48 }
  0x35   :  { %2710 = vmatpush3.bf16.msra.mxu1 %v2707_v51 }
  0x36   :  { %2712 = vmatprep.subr.bf16.mxu1 %v2711_v59 }
  0x39   :  { %2714 = vmatpush3.bf16.msra.mxu1 %v2711_v59 }
  0x3a   :  { %517 = vmatmul.mubr.bf16.gmra.mrb[12].mxu0 %v2851_v52  ;;  %2716 = vmatprep.subr.bf16.mxu1 %v2715_v62 }
  0x3b   :  { %524 = vmatprep.mubr.bf16.mxu0 %v2852_v53 }
  0x3d   :  { %2718 = vmatpush3.bf16.msra.mxu1 %v2715_v62 }
  0x3e   :  { %2720 = vmatprep.subr.bf16.mxu1 %v2719_v1 }
  0x41   :  { %2722 = vmatpush3.bf16.msra.mxu1 %v2719_v1 }
  0x42   :  { %525 = vmatmul.mubr.bf16.gmra.mrb[16].mxu0 %v2854_v54 }
  0x43   :  { %532 = vmatprep.mubr.bf16.mxu0 %v2857_v55 }
  0x4a   :  { %533 = vmatmul.mubr.bf16.gmra.mrb[20].mxu0 %v2859_v56 }
  0xf5   :  { %v2237_v2 = vpop.f32.mrb[0].mxu0 }
  0xf6   :  { %v2238_v3 = vpop.f32.mrb[1].mxu0 }
  0xf7   :  { %v2239_v5 = vadd.f32 %v2238_v3, %v2237_v2  ;;  %v2472_v6 = vpop.f32.mrb[0].mxu1  ;;  %v2240_v7 = vpop.f32.mrb[2].mxu0 }
  0xf8   :  { %v575_v8 = vpop.f32.mrb[1].mxu1  ;;  %v2241_v9 = vpop.f32.mrb[3].mxu0 }
  0xf9   :  { %v495_v10 = vadd.f32 %v2239_v5, %v3204_v4  ;;  %v2242_v11 = vadd.f32 %v2241_v9, %v2240_v7  ;;  %v2473_v12 = vpop.f32.mrb[2].mxu1 }
  0xfa   :  { %v578_v13 = vpop.f32.mrb[3].mxu1 }
  0xfb   :  { %v576_v14 = vadd.f32 %v575_v8, %v495_v10  ;;  %v498_v15 = vadd.f32 %v2242_v11, %v3204_v4 }
  0xfd   :  { %v634_v16 = vmul.f32 0.2, %v576_v14  ;;  %v579_v17 = vadd.f32 %v578_v13, %v498_v15  ;;  %v2243_v18 = vpop.f32.mrb[4].mxu0  ;;  %vm622_vm0 = vcmp.ge.f32.partialorder %v576_v14, 0.0 }
  0xfe   :  { %v2244_v19 = vpop.f32.mrb[5].mxu0 }
  0xff   :  { %vm623_vm1 = vcmp.ge.f32.partialorder %v579_v17, 0.0  ;;  %v635_v20 = vmul.f32 0.2, %v579_v17  ;;  %v2245_v21 = vadd.f32 %v2244_v19, %v2243_v18  ;;  %v2246_v22 = vpop.f32.mrb[6].mxu0  ;;  %v646_v23 = vsel %vm622_vm0, %v576_v14, %v634_v16  ;;  %v2476_v24 = vpop.f32.mrb[4].mxu1 }
 0x100   :  { %v2247_v25 = vpop.f32.mrb[7].mxu0  ;;  %2514 = vmatprep.mubr.f32.mxu1 %v646_v23  ;;  %v591_v26 = vpop.f32.mrb[5].mxu1 }
 0x101   :  { %v647_v27 = vsel %vm623_vm1, %v579_v17, %v635_v20  ;;  %v503_v28 = vadd.f32 %v2245_v21, %v3204_v4  ;;  %v2248_v29 = vadd.f32 %v2247_v25, %v2246_v22  ;;  %v2477_v30 = vpop.f32.mrb[6].mxu1  ;;  %vm879_vm1 = vcmask 785408  }
 0x102   :  { %2515 = vmatmul.mubr.f32.vlgmr.msra.gmra.mrb[12].mxu1 %v647_v27  ;;  %v594_v31 = vpop.f32.mrb[7].mxu1 }
 0x103   :  { %v584_v32 = vadd.f32 %v2472_v6, %v503_v28  ;;  %v506_v33 = vadd.f32 %v2248_v29, %v3204_v4 }
 0x105   :  { %v587_v34 = vadd.f32 %v2473_v12, %v506_v33  ;;  %v2249_v35 = vpop.f32.mrb[8].mxu0  ;;  %vm624_vm2 = vcmp.ge.f32.partialorder %v584_v32, 0.0  ;;  %v636_v36 = vmul.f32 0.2, %v584_v32 }
 0x106   :  { %v2250_v37 = vpop.f32.mrb[9].mxu0 }
 0x107   :  { %v2251_v38 = vadd.f32 %v2250_v37, %v2249_v35  ;;  %v2252_v39 = vpop.f32.mrb[10].mxu0  ;;  %v648_v40 = vsel %vm624_vm2, %v584_v32, %v636_v36  ;;  %vm625_vm3 = vcmp.ge.f32.partialorder %v587_v34, 0.0  ;;  %v637_v41 = vmul.f32 0.2, %v587_v34  ;;  %v3210_v42 = vpop.f32.mrb[8].mxu1 }
 0x108   :  { %v2253_v43 = vpop.f32.mrb[11].mxu0  ;;  %2517 = vmatprep.mubr.f32.mxu1 %v648_v40  ;;  %v607_v44 = vpop.f32.mrb[9].mxu1  ;;  %v2952_v36 = vmov 0.0|0.0   ;;  %v2954_v37 = vmov 0.0   ;;  %v69_v40 = vld [vmem:[%s3874_s1] sm:$0xff] }
 0x109   :  { %v511_v45 = vadd.f32 %v2251_v38, %v3204_v4  ;;  %v2254_v46 = vadd.f32 %v2253_v43, %v2252_v39  ;;  %v649_v47 = vsel %vm625_vm3, %v587_v34, %v637_v41  ;;  %v2481_v48 = vpop.f32.mrb[10].mxu1  ;;  %2723 = vmatprep.subr.bf16.mxu0 %v2952_v36  ;;  %2556 = vmatprep.mubr.msk.f32.mxu0 %vm2953_vm12, %v2954_v37  ;;  %v2955_v38 = vmov 0   ;;  %v71_v39 = vld [vmem:[%s3874_s1 + $0x10] sm:$0xff]  ;;  %v72_v41 = vld [vmem:[%s3874_s1 + $0x18] sm:$0xff]  ;;  %v74_v43 = vld [vmem:[%s3874_s1 + $0x28] sm:$0xff] }
 0x10a   :  { %2518 = vmatmul.mubr.f32.gmra.mrb[14].mxu1 %v649_v47  ;;  %v610_v49 = vpop.f32.mrb[11].mxu1  ;;  %2811 = vset.pattern.permute.xlu1 %v2955_v38 }
 0x10b   :  { %v592_v50 = vadd.f32 %v591_v26, %v511_v45  ;;  %v514_v51 = vadd.f32 %v2254_v46, %v3204_v4  ;;  %2810 = vset.pattern.permute.xlu0 %v2955_v38  ;;  %v76_v45 = vld [vmem:[%s3874_s1 + $0x38] sm:$0xff]  ;;  %v77_v46 = vld [vmem:[%s3874_s1 + $0x40] sm:$0xff] }
 0x10c   :  { %82 = vperm.xlu0 %2810, %v69_v40  }
 0x10d   :  { %v638_v52 = vmul.f32 0.2, %v592_v50  ;;  %v595_v53 = vadd.f32 %v594_v31, %v514_v51  ;;  %v2255_v54 = vpop.f32.mrb[12].mxu0  ;;  %vm626_vm4 = vcmp.ge.f32.partialorder %v592_v50, 0.0 }
 0x10e   :  { %v2256_v55 = vpop.f32.mrb[13].mxu0 }
 0x10f   :  { %v639_v56 = vmul.f32 0.2, %v595_v53  ;;  %v2257_v57 = vadd.f32 %v2256_v55, %v2255_v54  ;;  %v2258_v58 = vpop.f32.mrb[14].mxu0  ;;  %v650_v59 = vsel %vm626_vm4, %v592_v50, %v638_v52  ;;  %vm627_vm5 = vcmp.ge.f32.partialorder %v595_v53, 0.0 }
 0x110   :  { %v2259_v60 = vpop.f32.mrb[15].mxu0  ;;  %2520 = vmatprep.mubr.f32.mxu1 %v650_v59 }
 0x111   :  { %v519_v61 = vadd.f32 %v2257_v57, %v3204_v4  ;;  %v2260_v62 = vadd.f32 %v2259_v60, %v2258_v58  ;;  %v651_v63 = vsel %vm627_vm5, %v595_v53, %v639_v56 }
 0x112   :  { %2521 = vmatmul.mubr.f32.gmra.mrb[16].mxu1 %v651_v63 }
 0x113   :  { %v600_v0 = vadd.f32 %v2476_v24, %v519_v61  ;;  %v522_v1 = vadd.f32 %v2260_v62, %v3204_v4 }
 0x115   :  { %v603_v2 = vadd.f32 %v2477_v30, %v522_v1  ;;  %v2261_v3 = vpop.f32.mrb[16].mxu0  ;;  %vm628_vm6 = vcmp.ge.f32.partialorder %v600_v0, 0.0  ;;  %v640_v5 = vmul.f32 0.2, %v600_v0  ;;  %v3288_v1 = vld [vmem:[%s3875_s6] sm:$0xff] }
 0x116   :  { %v2262_v6 = vpop.f32.mrb[17].mxu0 }
 0x117   :  { %v2263_v7 = vadd.f32 %v2262_v6, %v2261_v3  ;;  %v2264_v8 = vpop.f32.mrb[18].mxu0  ;;  %v652_v9 = vsel %vm628_vm6, %v600_v0, %v640_v5  ;;  %vm629_vm7 = vcmp.ge.f32.partialorder %v603_v2, 0.0  ;;  %v641_v10 = vmul.f32 0.2, %v603_v2 }
 0x118   :  { %v2265_v11 = vpop.f32.mrb[19].mxu0  ;;  %2523 = vmatprep.mubr.f32.mxu1 %v652_v9  ;;  %v45_v3 = vlaneseq  ;;  %v3304_v9 = vld [vmem:[%s3876_s0] ss:$0 sm:$0xff] }
 0x119   :  { %v527_v12 = vadd.f32 %v2263_v7, %v3204_v4  ;;  %v2266_v13 = vadd.f32 %v2265_v11, %v2264_v8  ;;  %v653_v14 = vsel %vm629_vm7, %v603_v2, %v641_v10  ;;  %v800_v2 = vmul.f32 0.0625, %v3288_v1 }
 0x11a   :  { %2524 = vmatmul.mubr.f32.gmra.mrb[18].mxu1 %v653_v14  ;;  %v3291_v5 = vand.u32 127, %v45_v3  ;;  %v3299_v8 = vshrl.u32 %v45_v3, 7  ;;  %v2956_v14 = vmov -1e+30  }
 0x11b   :  { %v608_v15 = vadd.f32 %v607_v44, %v527_v12  ;;  %v530_v16 = vadd.f32 %v2266_v13, %v3204_v4  ;;  %v75_v44 = vld [vmem:[%s3874_s1 + $0x30] sm:$0xff] }
 0x11c   :  { %v3307_v10 = vadd.s32 8, %v3299_v8  ;;  %vm55_vm15 = vcmp.eq.s32.totalorder %v3299_v8, %v3304_v9  ;;  %v906_v11 = vsub.s32 1, %v3299_v8  ;;  %v873_v12 = vsub.s32 0, %v3299_v8 }
 0x11d   :  { %v642_v17 = vmul.f32 0.2, %v608_v15  ;;  %v611_v18 = vadd.f32 %v610_v49, %v530_v16  ;;  %v2267_v19 = vpop.f32.mrb[20].mxu0  ;;  %vm630_vm8 = vcmp.ge.f32.partialorder %v608_v15, 0.0  ;;  %v938_v16 = vsub.s32 2, %v3299_v8 }
 0x11e   :  { %v2268_v20 = vpop.f32.mrb[21].mxu0  ;;  %vm56_vm0 = vcmp.eq.s32.totalorder %v3307_v10, %v3304_v9  ;;  %v2879_v10 = vld [vmem:[%s3878_s7 + $0x14] ss:$8 sps:$4 sm:$0xff]  }
 0x11f   :  { %v643_v21 = vmul.f32 0.2, %v611_v18  ;;  %v2269_v22 = vadd.f32 %v2268_v20, %v2267_v19  ;;  %v2270_v23 = vpop.f32.mrb[22].mxu0  ;;  %v654_v24 = vsel %vm630_vm8, %v608_v15, %v642_v17  ;;  %vm631_vm9 = vcmp.ge.f32.partialorder %v611_v18, 0.0 }
 0x120   :  { %v2271_v25 = vpop.f32.mrb[23].mxu0  ;;  %2526 = vmatprep.mubr.f32.mxu1 %v654_v24  ;;  %v3320_v15 = vsel %vm55_vm15, 0.0, %v2956_v14  ;;  %v3332_v20 = vsel %vm56_vm0, 0.0, %v2956_v14  ;;  %v3340_v24 = vadd.s32 16, %v3299_v8 }
 0x121   :  { %v535_v26 = vadd.f32 %v2269_v22, %v3204_v4  ;;  %v2272_v27 = vadd.f32 %v2271_v25, %v2270_v23  ;;  %v655_v28 = vsel %vm631_vm9, %v611_v18, %v643_v21  ;;  %v3337_v23 = vadd.s32 24, %v3299_v8 }
 0x122   :  { %2527 = vmatmul.mubr.f32.gmra.mrb[20].mxu1 %v655_v28  ;;  %vm57_vm3 = vcmp.eq.s32.totalorder %v3340_v24, %v3304_v9  ;;  %v2881_v24 = vld [vmem:[%s3878_s7 + $0x10] ss:$8 sps:$4 sm:$0xff]  }
 0x123   :  { %v616_v29 = vadd.f32 %v3210_v42, %v535_v26  ;;  %v538_v30 = vadd.f32 %v2272_v27, %v3204_v4  ;;  %v70_v4 = vld [vmem:[%s3874_s1 + $0x8] sm:$0xff]  ;;  %v73_v42 = vld [vmem:[%s3874_s1 + $0x20] sm:$0xff]  ;;  %vm58_vm2 = vcmp.eq.s32.totalorder %v3337_v23, %v3304_v9  ;;  %v2887_v23 = vld [vmem:[%s3878_s7 + $0x30] ss:$8 sps:$4 sm:$0xff]  }
 0x124   :  { %85 = vperm.xlu1 %2811, %v70_v4   ;;  %v2884_v9 = vld [vmem:[%s3878_s7 + $0x20] ss:$8 sps:$4 sm:$0xff]  }
 0x125   :  { %v619_v31 = vadd.f32 %v2481_v48, %v538_v30  ;;  %vm632_vm10 = vcmp.ge.f32.partialorder %v616_v29, 0.0  ;;  %v644_v32 = vmul.f32 0.2, %v616_v29 }
 0x127   :  { %v656_v33 = vsel %vm632_vm10, %v616_v29, %v644_v32  ;;  %vm633_vm11 = vcmp.ge.f32.partialorder %v619_v31, 0.0  ;;  %v645_v34 = vmul.f32 0.2, %v619_v31 }
 0x128   :  { %2529 = vmatprep.mubr.f32.mxu1 %v656_v33  ;;  %88 = vperm.xlu1 %2811, %v71_v39  }
 0x129   :  { %v657_v35 = vsel %vm633_vm11, %v619_v31, %v645_v34  ;;  %v3360_v34 = vsel %vm58_vm2, 0.0, %v2956_v14 }
 0x12a   :  { %2530 = vmatmul.mubr.f32.gmra.mrb[22].mxu1 %v657_v35  ;;  %v3365_v35 = vsel %vm57_vm3, 0.0, %v2956_v14  ;;  %v1034_v14 = vsub.s32 5, %v3299_v8 }
 0x12c   :  { %91 = vperm.xlu1 %2811, %v72_v41  }
 0x130   :  { %94 = vperm.xlu1 %2811, %v73_v42  }
 0x134   :  { %97 = vperm.xlu1 %2811, %v74_v43  }
 0x138   :  { %100 = vperm.xlu1 %2811, %v75_v44  }
 0x13c   :  { %103 = vperm.xlu1 %2811, %v76_v45  }
 0x140   :  { %106 = vperm.xlu1 %2811, %v77_v46   ;;  %v1002_v46 = vsub.s32 4, %v3299_v8 }
 0x18b   :  { %v83_v6 = vpop.permute.xlu0 %82 }
 0x18c   :  { %vm117_vm14 = vcmp.eq.s32.totalorder %v3291_v5, %v83_v6 }
 0x18d   :  { %v3295_v7 = vsel %vm117_vm14, 1.0, %v2954_v37 }
 0x1d5   :  { %v3249_v47 = vpop.f32.mrb[12].mxu1 }
 0x1d6   :  { %v3251_v48 = vpop.f32.mrb[13].mxu1 }
 0x1d7   :  { %v2724_v49 = vpack.c.bf16 %v3249_v47, %v3251_v48 }
 0x1d9   :  { %2725 = vmatpush3.bf16.xpose.msra.mxu0 %v2724_v49 }
 0x1da   :  { %2726 = vmatprep.subr.bf16.mxu0 %v2952_v36 }
 0x1dd   :  { %v3255_v50 = vpop.f32.mrb[14].mxu1 }
 0x1de   :  { %v3257_v51 = vpop.f32.mrb[15].mxu1 }
 0x1df   :  { %v2727_v52 = vpack.c.bf16 %v3255_v50, %v3257_v51 }
 0x1e1   :  { %2728 = vmatpush3.bf16.xpose.msra.mxu0 %v2727_v52 }
 0x1e2   :  { %2729 = vmatprep.subr.bf16.mxu0 %v2952_v36 }
 0x1e5   :  { %v3261_v53 = vpop.f32.mrb[16].mxu1 }
 0x1e6   :  { %v3263_v54 = vpop.f32.mrb[17].mxu1 }
 0x1e7   :  { %v2730_v55 = vpack.c.bf16 %v3261_v53, %v3263_v54 }
 0x1e9   :  { %2731 = vmatpush3.bf16.xpose.msra.mxu0 %v2730_v55 }
 0x1ea   :  { %2732 = vmatprep.subr.bf16.mxu0 %v2952_v36 }
 0x1ed   :  { %v3267_v56 = vpop.f32.mrb[18].mxu1 }
 0x1ee   :  { %v3269_v57 = vpop.f32.mrb[19].mxu1 }
 0x1ef   :  { %v2733_v58 = vpack.c.bf16 %v3267_v56, %v3269_v57 }
 0x1f1   :  { %2734 = vmatpush3.bf16.xpose.msra.mxu0 %v2733_v58 }
 0x1f2   :  { %2735 = vmatprep.subr.bf16.mxu0 %v2952_v36 }
 0x1f5   :  { %v3273_v59 = vpop.f32.mrb[20].mxu1 }
 0x1f6   :  { %v3275_v60 = vpop.f32.mrb[21].mxu1 }
 0x1f7   :  { %v2736_v61 = vpack.c.bf16 %v3273_v59, %v3275_v60 }
 0x1f9   :  { %2737 = vmatpush3.bf16.xpose.msra.mxu0 %v2736_v61 }
 0x1fa   :  { %2738 = vmatprep.subr.bf16.mxu0 %v2952_v36  ;;  %v970_v36 = vsub.s32 3, %v3299_v8 }
 0x1fd   :  { %v3279_v62 = vpop.f32.mrb[22].mxu1 }
 0x1fe   :  { %v3281_v63 = vpop.f32.mrb[23].mxu1 }
 0x1ff   :  { %v2739_v0 = vpack.c.bf16 %v3279_v62, %v3281_v63 }
 0x201   :  { %2740 = vmatpush3.bf16.xpose.msra.mxu0 %v2739_v0 }
 0x208   :  { %2557 = vmatmul.mubr.f32.vlgmr.msra.gmra.mrb[24].mxu0 %v800_v2 }
 0x209   :  { %2567 = vmatprep.mubr.msk.f32.mxu0 %vm1128_vm13, %v3295_v7 }
 0x2db   :  { %v3315_v13 = vpop.f32.mrb[24].mxu0 }
 0x2dc   :  { %v2558_v17 = vpop.f32.mrb[25].mxu0  ;;  %v907_v18 = vrot.slane %v3315_v13, %v906_v11  ;;  %v874_v19 = vrot.slane %v3315_v13, %v873_v12  ;;  %v939_v25 = vrot.slane %v3315_v13, %v938_v16  ;;  %v971_v41 = vrot.slane %v3315_v13, %v970_v36 }
 0x2dd   :  { %v1003_v61 = vrot.slane %v3315_v13, %v1002_v46 }
 0x2de   :  { %v908_v21 = vadd.f32 %v907_v18, %v3320_v15  ;;  %v875_v22 = vadd.f32 %v874_v19, %v3320_v15  ;;  %v909_v28 = vadd.f32 %v907_v18, %v3332_v20  ;;  %v876_v29 = vadd.f32 %v874_v19, %v3332_v20 }
 0x2df   :  { %v941_v32 = vadd.f32 %v939_v25, %v3332_v20  ;;  %v940_v33 = vadd.f32 %v939_v25, %v3320_v15  ;;  %v878_v39 = vadd.f32 %v874_v19, %v3360_v34  ;;  %v877_v40 = vadd.f32 %v874_v19, %v3365_v35 }
 0x2e0   :  { %v912_v26 = vsel %vm879_vm1, %v908_v21, -inf  ;;  %v880_v27 = vsel %vm879_vm1, %v875_v22, -inf  ;;  %v915_v30 = vsel %vm879_vm1, %v909_v28, -inf  ;;  %v883_v31 = vsel %vm879_vm1, %v876_v29, -inf }
 0x2e1   :  { %913 = vmax.xlane.f32.xlu1 %v912_v26  ;;  %881 = vmax.xlane.f32.xlu0 %v880_v27  ;;  %v947_v38 = vsel %vm879_vm1, %v941_v32, -inf  ;;  %v944_v4 = vsel %vm879_vm1, %v940_v33, -inf  ;;  %v889_v42 = vsel %vm879_vm1, %v878_v39, -inf  ;;  %v886_v43 = vsel %vm879_vm1, %v877_v40, -inf }
 0x2e2   :  { %v911_v44 = vadd.f32 %v907_v18, %v3360_v34  ;;  %v910_v45 = vadd.f32 %v907_v18, %v3365_v35  ;;  %v973_v55 = vadd.f32 %v971_v41, %v3332_v20  ;;  %v972_v58 = vadd.f32 %v971_v41, %v3320_v15 }
 0x2e3   :  { %v943_v3 = vadd.f32 %v939_v25, %v3360_v34  ;;  %v942_v6 = vadd.f32 %v939_v25, %v3365_v35  ;;  %v1005_v19 = vadd.f32 %v1003_v61, %v3332_v20  ;;  %v1004_v21 = vadd.f32 %v1003_v61, %v3320_v15 }
 0x2e4   :  { %v921_v49 = vsel %vm879_vm1, %v911_v44, -inf  ;;  %v918_v52 = vsel %vm879_vm1, %v910_v45, -inf  ;;  %v979_v0 = vsel %vm879_vm1, %v973_v55, -inf  ;;  %v976_v2 = vsel %vm879_vm1, %v972_v58, -inf }
 0x2e5   :  { %916 = vmax.xlane.f32.xlu1 %v915_v30  ;;  %884 = vmax.xlane.f32.xlu0 %v883_v31  ;;  %v953_v17 = vsel %vm879_vm1, %v943_v3, -inf  ;;  %v950_v18 = vsel %vm879_vm1, %v942_v6, -inf  ;;  %v1035_v22 = vrot.slane %v3315_v13, %v1034_v14  ;;  %v1011_v25 = vsel %vm879_vm1, %v1005_v19, -inf }
 0x2e6   :  { %v1008_v26 = vsel %vm879_vm1, %v1004_v21, -inf  ;;  %v975_v27 = vadd.f32 %v971_v41, %v3360_v34  ;;  %v974_v28 = vadd.f32 %v971_v41, %v3365_v35  ;;  %v1066_v29 = vsub.s32 6, %v3299_v8 }
 0x2e7   :  { %v1037_v32 = vadd.f32 %v1035_v22, %v3332_v20  ;;  %v1036_v33 = vadd.f32 %v1035_v22, %v3320_v15  ;;  %v1007_v40 = vadd.f32 %v1003_v61, %v3360_v34  ;;  %v1006_v41 = vadd.f32 %v1003_v61, %v3365_v35 }
 0x2e8   :  { %v985_v30 = vsel %vm879_vm1, %v975_v27, -inf  ;;  %v982_v31 = vsel %vm879_vm1, %v974_v28, -inf  ;;  %v1039_v61 = vadd.f32 %v1035_v22, %v3360_v34  ;;  %v79_v28 = vld [vmem:[%s3874_s1 + $0x50] sm:$0xff] }
 0x2e9   :  { %948 = vmax.xlane.f32.xlu1 %v947_v38  ;;  %945 = vmax.xlane.f32.xlu0 %v944_v4  ;;  %v1067_v38 = vrot.slane %v3315_v13, %v1066_v29  ;;  %v1043_v4 = vsel %vm879_vm1, %v1037_v32, -inf  ;;  %v1040_v39 = vsel %vm879_vm1, %v1036_v33, -inf  ;;  %v1014_v44 = vsel %vm879_vm1, %v1006_v41, -inf }
 0x2ea   :  { %v927_v41 = vrot.slane %v3288_v1, %v906_v11 }
 0x2eb   :  { %v1069_v45 = vadd.f32 %v1067_v38, %v3332_v20  ;;  %v1071_v19 = vadd.f32 %v1067_v38, %v3360_v34  ;;  %v1070_v21 = vadd.f32 %v1067_v38, %v3365_v35 }
 0x2ed   :  { %890 = vmax.xlane.f32.xlu1 %v889_v42  ;;  %887 = vmax.xlane.f32.xlu0 %v886_v43  ;;  %v1098_v42 = vsub.s32 7, %v3299_v8  ;;  %v1017_v43 = vsel %vm879_vm1, %v1007_v40, -inf  ;;  %v1075_v55 = vsel %vm879_vm1, %v1069_v45, -inf  ;;  %v2863_v8 = vld [vmem:[%s3877_s8 + $0x8] sm:$0xff]  }
 0x2f1   :  { %922 = vmax.xlane.f32.xlu1 %v921_v49  ;;  %919 = vmax.xlane.f32.xlu0 %v918_v52  ;;  %v1068_v49 = vadd.f32 %v1067_v38, %v3320_v15  ;;  %v1099_v52 = vrot.slane %v3315_v13, %v1098_v42 }
 0x2f3   :  { %v1072_v58 = vsel %vm879_vm1, %v1068_v49, -inf  ;;  %v1101_v6 = vadd.f32 %v1099_v52, %v3332_v20  ;;  %v1103_v20 = vadd.f32 %v1099_v52, %v3360_v34  ;;  %v80_v34 = vld [vmem:[%s3874_s1 + $0x58] sm:$0xff] }
 0x2f5   :  { %980 = vmax.xlane.f32.xlu1 %v979_v0  ;;  %977 = vmax.xlane.f32.xlu0 %v976_v2  ;;  %v1038_v0 = vadd.f32 %v1035_v22, %v3365_v35  ;;  %v1049_v2 = vsel %vm879_vm1, %v1039_v61, -inf  ;;  %v1107_v13 = vsel %vm879_vm1, %v1101_v6, -inf  ;;  %v1081_v22 = vsel %vm879_vm1, %v1071_v19, -inf }
 0x2f7   :  { %v1046_v3 = vsel %vm879_vm1, %v1038_v0, -inf }
 0x2f9   :  { %954 = vmax.xlane.f32.xlu1 %v953_v17  ;;  %951 = vmax.xlane.f32.xlu0 %v950_v18  ;;  %v1100_v17 = vadd.f32 %v1099_v52, %v3320_v15  ;;  %v1102_v15 = vadd.f32 %v1099_v52, %v3365_v35  ;;  %v3450_v35 = vpop.permute.xlu1 %85 }
 0x2fa   :  { %vm118_vm4 = vcmp.eq.s32.totalorder %v3291_v5, %v3450_v35 }
 0x2fb   :  { %v1104_v18 = vsel %vm879_vm1, %v1100_v17, -inf  ;;  %v1110_v27 = vsel %vm879_vm1, %v1102_v15, -inf  ;;  %v991_v15 = vrot.slane %v3288_v1, %v970_v36  ;;  %v1023_v36 = vrot.slane %v3288_v1, %v1002_v46 }
 0x2fd   :  { %1012 = vmax.xlane.f32.xlu1 %v1011_v25  ;;  %1009 = vmax.xlane.f32.xlu0 %v1008_v26  ;;  %v1078_v25 = vsel %vm879_vm1, %v1070_v21, -inf  ;;  %v1113_v26 = vsel %vm879_vm1, %v1103_v20, -inf }
 0x301   :  { %986 = vmax.xlane.f32.xlu1 %v985_v30  ;;  %983 = vmax.xlane.f32.xlu0 %v982_v31  ;;  %v78_v30 = vld [vmem:[%s3874_s1 + $0x48] sm:$0xff]  ;;  %v3452_v31 = vpop.permute.xlu1 %88 }
 0x302   :  { %vm119_vm5 = vcmp.eq.s32.totalorder %v3291_v5, %v3452_v31 }
 0x305   :  { %1044 = vmax.xlane.f32.xlu1 %v1043_v4  ;;  %1041 = vmax.xlane.f32.xlu0 %v1040_v39  ;;  %v3454_v32 = vpop.permute.xlu1 %91 }
 0x306   :  { %vm120_vm6 = vcmp.eq.s32.totalorder %v3291_v5, %v3454_v32 }
 0x307   :  { %v3509_v35 = vsel %vm120_vm6, 1.0, %v2954_v37 }
 0x309   :  { %1018 = vmax.xlane.f32.xlu1 %v1017_v43  ;;  %1015 = vmax.xlane.f32.xlu0 %v1014_v44  ;;  %v3456_v33 = vpop.permute.xlu1 %94  ;;  %v895_v43 = vrot.slane %v3288_v1, %v873_v12 }
 0x30a   :  { %vm121_vm7 = vcmp.eq.s32.totalorder %v3291_v5, %v3456_v33 }
 0x30b   :  { %v3512_v31 = vsel %vm121_vm7, 1.0, %v2954_v37 }
 0x30d   :  { %1076 = vmax.xlane.f32.xlu1 %v1075_v55  ;;  %1073 = vmax.xlane.f32.xlu0 %v1072_v58  ;;  %v3458_v38 = vpop.permute.xlu1 %97 }
 0x30e   :  { %vm122_vm8 = vcmp.eq.s32.totalorder %v3291_v5, %v3458_v38 }
 0x30f   :  { %v3523_v32 = vsel %vm122_vm8, 1.0, %v2954_v37 }
 0x311   :  { %1050 = vmax.xlane.f32.xlu1 %v1049_v2  ;;  %1047 = vmax.xlane.f32.xlu0 %v1046_v3  ;;  %v3460_v4 = vpop.permute.xlu1 %100  ;;  %v959_v3 = vrot.slane %v3288_v1, %v938_v16 }
 0x312   :  { %vm123_vm9 = vcmp.eq.s32.totalorder %v3291_v5, %v3460_v4 }
 0x315   :  { %1108 = vmax.xlane.f32.xlu1 %v1107_v13  ;;  %1105 = vmax.xlane.f32.xlu0 %v1104_v18  ;;  %v3462_v39 = vpop.permute.xlu1 %103 }
 0x316   :  { %vm124_vm10 = vcmp.eq.s32.totalorder %v3291_v5, %v3462_v39 }
 0x317   :  { %v3537_v4 = vsel %vm124_vm10, 1.0, %v2954_v37 }
 0x319   :  { %1082 = vmax.xlane.f32.xlu1 %v1081_v22  ;;  %1079 = vmax.xlane.f32.xlu0 %v1078_v25  ;;  %v3464_v40 = vpop.permute.xlu1 %106 }
 0x31a   :  { %vm125_vm11 = vcmp.eq.s32.totalorder %v3291_v5, %v3464_v40 }
 0x31d   :  { %1114 = vmax.xlane.f32.xlu1 %v1113_v26  ;;  %1111 = vmax.xlane.f32.xlu0 %v1110_v27 }
 0x32e   :  { %112 = vperm.xlu1 %2811, %v79_v28  }
 0x333   :  { %109 = vperm.xlu0 %2810, %v78_v30  }
 0x337   :  { %115 = vperm.xlu0 %2810, %v80_v34  }
 0x36e   :  { %v914_v44 = vpop.xlane.xlu1 %913  ;;  %v882_v45 = vpop.xlane.xlu0 %881 }
 0x36f   :  { %v928_v49 = vmul.f32 %v927_v41, %v914_v44  ;;  %v896_v52 = vmul.f32 %v895_v43, %v882_v45 }
 0x371   :  { %v932_v55 = vadd.f32 %v928_v49, %v896_v52 }
 0x372   :  { %v917_v58 = vpop.xlane.xlu1 %916  ;;  %v885_v61 = vpop.xlane.xlu0 %884 }
 0x373   :  { %v929_v0 = vmul.f32 %v927_v41, %v917_v58  ;;  %v897_v2 = vmul.f32 %v895_v43, %v885_v61 }
 0x375   :  { %v933_v6 = vadd.f32 %v929_v0, %v897_v2 }
 0x376   :  { %v949_v17 = vpop.xlane.xlu1 %948  ;;  %v946_v11 = vpop.xlane.xlu0 %945 }
 0x377   :  { %v961_v13 = vmul.f32 %v959_v3, %v949_v17  ;;  %v960_v18 = vmul.f32 %v959_v3, %v946_v11 }
 0x379   :  { %v965_v19 = vadd.f32 %v961_v13, %v933_v6  ;;  %v964_v12 = vadd.f32 %v960_v18, %v932_v55 }
 0x37a   :  { %v891_v21 = vpop.xlane.xlu1 %890  ;;  %v888_v22 = vpop.xlane.xlu0 %887 }
 0x37b   :  { %v899_v26 = vmul.f32 %v895_v43, %v891_v21  ;;  %v898_v27 = vmul.f32 %v895_v43, %v888_v22 }
 0x37e   :  { %v923_v25 = vpop.xlane.xlu1 %922  ;;  %v920_v20 = vpop.xlane.xlu0 %919 }
 0x37f   :  { %v931_v28 = vmul.f32 %v927_v41, %v923_v25  ;;  %v930_v30 = vmul.f32 %v927_v41, %v920_v20 }
 0x381   :  { %v935_v16 = vadd.f32 %v931_v28, %v899_v26  ;;  %v934_v34 = vadd.f32 %v930_v30, %v898_v27 }
 0x382   :  { %v981_v44 = vpop.xlane.xlu1 %980  ;;  %v978_v45 = vpop.xlane.xlu0 %977 }
 0x383   :  { %v993_v49 = vmul.f32 %v991_v15, %v981_v44  ;;  %v992_v52 = vmul.f32 %v991_v15, %v978_v45 }
 0x385   :  { %v997_v58 = vadd.f32 %v993_v49, %v965_v19  ;;  %v996_v55 = vadd.f32 %v992_v52, %v964_v12 }
 0x386   :  { %v955_v61 = vpop.xlane.xlu1 %954  ;;  %v952_v0 = vpop.xlane.xlu0 %951 }
 0x387   :  { %v963_v2 = vmul.f32 %v959_v3, %v955_v61  ;;  %v962_v6 = vmul.f32 %v959_v3, %v952_v0  ;;  %v1055_v3 = vrot.slane %v3288_v1, %v1034_v14 }
 0x389   :  { %v967_v17 = vadd.f32 %v963_v2, %v935_v16  ;;  %v966_v43 = vadd.f32 %v962_v6, %v934_v34 }
 0x38a   :  { %v1013_v11 = vpop.xlane.xlu1 %1012  ;;  %v1010_v41 = vpop.xlane.xlu0 %1009 }
 0x38b   :  { %v1025_v13 = vmul.f32 %v1023_v36, %v1013_v11  ;;  %v1024_v18 = vmul.f32 %v1023_v36, %v1010_v41 }
 0x38d   :  { %v1029_v21 = vadd.f32 %v1025_v13, %v997_v58  ;;  %v1028_v22 = vadd.f32 %v1024_v18, %v996_v55 }
 0x38e   :  { %v987_v25 = vpop.xlane.xlu1 %986  ;;  %v984_v20 = vpop.xlane.xlu0 %983 }
 0x38f   :  { %v995_v19 = vmul.f32 %v991_v15, %v987_v25  ;;  %v994_v12 = vmul.f32 %v991_v15, %v984_v20  ;;  %v1087_v15 = vrot.slane %v3288_v1, %v1066_v29 }
 0x391   :  { %v999_v26 = vadd.f32 %v995_v19, %v967_v17  ;;  %v998_v27 = vadd.f32 %v994_v12, %v966_v43 }
 0x392   :  { %v1045_v28 = vpop.xlane.xlu1 %1044  ;;  %v1042_v46 = vpop.xlane.xlu0 %1041 }
 0x393   :  { %v1057_v30 = vmul.f32 %v1055_v3, %v1045_v28  ;;  %v1056_v16 = vmul.f32 %v1055_v3, %v1042_v46 }
 0x395   :  { %v1061_v34 = vadd.f32 %v1057_v30, %v1029_v21  ;;  %v1060_v44 = vadd.f32 %v1056_v16, %v1028_v22 }
 0x396   :  { %v1019_v45 = vpop.xlane.xlu1 %1018  ;;  %v1016_v49 = vpop.xlane.xlu0 %1015 }
 0x397   :  { %v1027_v52 = vmul.f32 %v1023_v36, %v1019_v45  ;;  %v1026_v58 = vmul.f32 %v1023_v36, %v1016_v49  ;;  %v1119_v36 = vrot.slane %v3288_v1, %v1098_v42 }
 0x399   :  { %v1031_v55 = vadd.f32 %v1027_v52, %v999_v26  ;;  %v1030_v61 = vadd.f32 %v1026_v58, %v998_v27 }
 0x39a   :  { %v1077_v0 = vpop.xlane.xlu1 %1076  ;;  %v1074_v14 = vpop.xlane.xlu0 %1073 }
 0x39b   :  { %v1089_v2 = vmul.f32 %v1087_v15, %v1077_v0  ;;  %v1088_v6 = vmul.f32 %v1087_v15, %v1074_v14  ;;  %v3540_v0 = vsel %vm125_vm11, 1.0, %v2954_v37 }
 0x39d   :  { %v1093_v17 = vadd.f32 %v1089_v2, %v1061_v34  ;;  %v1092_v43 = vadd.f32 %v1088_v6, %v1060_v44  ;;  %v3568_v6 = vsel %vm55_vm15, 1.0, %v2954_v37 }
 0x39e   :  { %v1051_v11 = vpop.xlane.xlu1 %1050  ;;  %v1048_v41 = vpop.xlane.xlu0 %1047  ;;  %2609 = vmatprep.mubr.msk.f32.mxu1 %vm879_vm1, %v3568_v6 }
 0x39f   :  { %v1059_v13 = vmul.f32 %v1055_v3, %v1051_v11  ;;  %v1058_v18 = vmul.f32 %v1055_v3, %v1048_v41  ;;  %v2864_v11 = vld [vmem:[%s3877_s8 + $0x50] sm:$0xff]  }
 0x3a0   :  { %v2865_v41 = vld [vmem:[%s3877_s8 + $0x10] sm:$0xff]  }
 0x3a1   :  { %v1063_v21 = vadd.f32 %v1059_v13, %v1031_v55  ;;  %v1062_v22 = vadd.f32 %v1058_v18, %v1030_v61  ;;  %v3498_v55 = vsel %vm119_vm5, 1.0, %v2954_v37  ;;  %v3526_v61 = vsel %vm123_vm9, 1.0, %v2954_v37  ;;  %v2866_v13 = vld [vmem:[%s3877_s8 + $0x58] sm:$0xff]  }
 0x3a2   :  { %v1109_v25 = vpop.xlane.xlu1 %1108  ;;  %v1106_v29 = vpop.xlane.xlu0 %1105  ;;  %v2867_v18 = vld [vmem:[%s3877_s8 + $0x18] sm:$0xff]  }
 0x3a3   :  { %v1121_v20 = vmul.f32 %v1119_v36, %v1109_v25  ;;  %v1120_v19 = vmul.f32 %v1119_v36, %v1106_v29  ;;  %v2871_v25 = vld [vmem:[%s3877_s8 + $0x28] sm:$0xff]  }
 0x3a4   :  { %v2878_v29 = vld [vmem:[%s3878_s7 + $0x4] ss:$8 sps:$4 sm:$0xff]  }
 0x3a5   :  { %v1125_v12 = vadd.f32 %v1121_v20, %v1093_v17  ;;  %v1124_v26 = vadd.f32 %v1120_v19, %v1092_v43  ;;  %v2861_v17 = vld [vmem:[%s3877_s8] sm:$0xff]   ;;  %v2862_v43 = vld [vmem:[%s3877_s8 + $0x48] sm:$0xff]   ;;  %v2872_v20 = vld [vmem:[%s3877_s8 + $0x70] sm:$0xff]  }
 0x3a6   :  { %v1083_v27 = vpop.xlane.xlu1 %1082  ;;  %v1080_v28 = vpop.xlane.xlu0 %1079  ;;  %v2873_v19 = vld [vmem:[%s3877_s8 + $0x30] sm:$0xff]  }
 0x3a7   :  { %v1091_v46 = vmul.f32 %v1087_v15, %v1083_v27  ;;  %v1090_v30 = vmul.f32 %v1087_v15, %v1080_v28  ;;  %v2741_v16 = vpack.c.bf16 %v1125_v12, %v1124_v26  ;;  %v3495_v15 = vsel %vm118_vm4, 1.0, %v2954_v37  ;;  %v2874_v12 = vld [vmem:[%s3877_s8 + $0x78] sm:$0xff]   ;;  %v2876_v27 = vld [vmem:[%s3878_s7] ss:$8 sps:$4 sm:$0xff]  }
 0x3a8   :  { %v2875_v26 = vld [vmem:[%s3877_s8 + $0x38] sm:$0xff]  }
 0x3a9   :  { %v1095_v34 = vadd.f32 %v1091_v46, %v1063_v21  ;;  %v1094_v44 = vadd.f32 %v1090_v30, %v1062_v22  ;;  %2742 = vmatprep.subr.bf16.mxu0 %v2741_v16  ;;  %v2869_v21 = vld [vmem:[%s3877_s8 + $0x20] sm:$0xff]   ;;  %v2870_v22 = vld [vmem:[%s3877_s8 + $0x68] sm:$0xff]  }
 0x3aa   :  { %v1115_v3 = vpop.xlane.xlu1 %1114  ;;  %2744 = vmatpush3.bf16.msra.mxu0 %v2741_v16  ;;  %v1112_v45 = vpop.xlane.xlu0 %1111 }
 0x3ab   :  { %v1123_v1 = vmul.f32 %v1119_v36, %v1115_v3  ;;  %v1122_v42 = vmul.f32 %v1119_v36, %v1112_v45  ;;  %v2868_v36 = vld [vmem:[%s3877_s8 + $0x60] sm:$0xff]  }
 0x3ad   :  { %v1127_v49 = vadd.f32 %v1123_v1, %v1095_v34  ;;  %v1126_v52 = vadd.f32 %v1122_v42, %v1094_v44 }
 0x3ae   :  { %v113_v38 = vpop.permute.xlu1 %112 }
 0x3af   :  { %v2745_v58 = vpack.c.bf16 %v1127_v49, %v1126_v52  ;;  %vm127_vm14 = vcmp.eq.s32.totalorder %v3291_v5, %v113_v38 }
 0x3b0   :  { %v3552_v14 = vsel %vm127_vm14, 1.0, %v2954_v37 }
 0x3b1   :  { %2746 = vmatprep.subr.bf16.mxu0 %v2745_v58 }
 0x3b2   :  { %2748 = vmatpush3.bf16.msra.mxu0 %v2745_v58  ;;  %v110_v33 = vpop.permute.xlu0 %109 }
 0x3b3   :  { %vm126_vm12 = vcmp.eq.s32.totalorder %v3291_v5, %v110_v33 }
 0x3b4   :  { %v3549_v40 = vsel %vm126_vm12, 1.0, %v2954_v37 }
 0x3b5   :  { %2568 = vmatmul.mubr.msk.f32.vlgmr.msra.gmra.mrb[26].mxu0 %vm1128_vm13, %v3495_v15 }
 0x3b6   :  { %2570 = vmatprep.mubr.msk.f32.mxu0 %vm1128_vm13, %v3498_v55  ;;  %v116_v39 = vpop.permute.xlu0 %115 }
 0x3b7   :  { %vm128_vm4 = vcmp.eq.s32.totalorder %v3291_v5, %v116_v39  ;;  %v2860_v5 = vld [vmem:[%s3877_s8 + $0x40] sm:$0xff]  }
 0x3b8   :  { %v3560_v2 = vsel %vm128_vm4, 1.0, %v2954_v37  ;;  %2376 = vmatprep.subr.bf16.mxu0 %v2860_v5 }
 0x3b9   :  { %2571 = vmatmul.mubr.msk.f32.gmra.mrb[28].mxu0 %vm1128_vm13, %v3509_v35 }
 0x3ba   :  { %2573 = vmatprep.mubr.msk.f32.mxu0 %vm1128_vm13, %v3512_v31  ;;  %2377 = vmatpush3.bf16.msra.mxu0 %v2861_v17 }
 0x3bb   :  { %2378 = vmatprep.subr.bf16.mxu0 %v2862_v43 }
 0x3bd   :  { %2574 = vmatmul.mubr.msk.f32.gmra.mrb[30].mxu0 %vm1128_vm13, %v3523_v32 }
 0x3be   :  { %2576 = vmatprep.mubr.msk.f32.mxu0 %vm1128_vm13, %v3526_v61  ;;  %2379 = vmatpush3.bf16.msra.mxu0 %v2863_v8 }
 0x3bf   :  { %2380 = vmatprep.subr.bf16.mxu0 %v2864_v11 }
 0x3c1   :  { %2577 = vmatmul.mubr.msk.f32.gmra.mrb[32].mxu0 %vm1128_vm13, %v3537_v4 }
 0x3c2   :  { %2579 = vmatprep.mubr.msk.f32.mxu0 %vm1128_vm13, %v3540_v0  ;;  %2381 = vmatpush3.bf16.msra.mxu0 %v2865_v41 }
 0x3c3   :  { %2382 = vmatprep.subr.bf16.mxu0 %v2866_v13 }
 0x3c5   :  { %2580 = vmatmul.mubr.msk.f32.gmra.mrb[34].mxu0 %vm1128_vm13, %v3549_v40 }
 0x3c6   :  { %2582 = vmatprep.mubr.msk.f32.mxu0 %vm1128_vm13, %v3552_v14  ;;  %2383 = vmatpush3.bf16.msra.mxu0 %v2867_v18 }
 0x3c7   :  { %2384 = vmatprep.subr.bf16.mxu0 %v2868_v36 }
 0x3c9   :  { %2583 = vmatmul.mubr.msk.f32.gmra.mrb[36].mxu0 %vm1128_vm13, %v3560_v2 }
 0x3ca   :  { %2385 = vmatpush3.bf16.msra.mxu0 %v2869_v21  ;;  %1811 = vmatprep.mubr.bf16.mxu0 %v2878_v29 }
 0x3cb   :  { %2386 = vmatprep.subr.bf16.mxu0 %v2870_v22 }
 0x3ce   :  { %2387 = vmatpush3.bf16.msra.mxu0 %v2871_v25 }
 0x3cf   :  { %2388 = vmatprep.subr.bf16.mxu0 %v2872_v20 }
 0x3d2   :  { %2389 = vmatpush3.bf16.msra.mxu0 %v2873_v19 }
 0x3d3   :  { %2390 = vmatprep.subr.bf16.mxu0 %v2874_v12 }
 0x3d6   :  { %2391 = vmatpush3.bf16.msra.mxu0 %v2875_v26 }
 0x3d9   :  { %1812 = vmatmul.mubr.bf16.vlgmr.msra.gmra.mrb[40].mxu0 %v2876_v27 }
 0x3da   :  { %1819 = vmatprep.mubr.bf16.mxu0 %v2879_v10 }
 0x3e1   :  { %1820 = vmatmul.mubr.bf16.gmra.mrb[44].mxu0 %v2881_v24  ;;  %v2902_v24 = vld [vmem:[%s3880_s10] sm:$0xff]  }
 0x488   :  { %v2569_v28 = vpop.f32.mrb[26].mxu0 }
 0x489   :  { %v1291_v46 = vsub.f32 %v3249_v47, %v2569_v28  ;;  %v1231_v30 = vpop.f32.mrb[27].mxu0 }
 0x48a   :  { %v1290_v16 = vsub.f32 %v3251_v48, %v1231_v30 }
 0x48b   :  { %v1304_v34 = vmul.f32 1.442695, %v1291_v46 }
 0x48c   :  { %v1302_v44 = vmul.f32 1.442695, %v1290_v16  ;;  %v2572_v3 = vpop.f32.mrb[28].mxu0 }
 0x48d   :  { %2904 = vpow2.f32 %v1304_v34  ;;  %v1293_v45 = vsub.f32 %v3255_v50, %v2572_v3  ;;  %v1241_v1 = vpop.f32.mrb[29].mxu0 }
 0x48e   :  { %2906 = vpow2.f32 %v1302_v44  ;;  %v1292_v42 = vsub.f32 %v3257_v51, %v1241_v1  ;;  %v3678_v1 = vsel %vm56_vm0, 1.0, %v2954_v37 }
 0x48f   :  { %v1308_v49 = vmul.f32 1.442695, %v1293_v45 }
 0x490   :  { %v1306_v52 = vmul.f32 1.442695, %v1292_v42  ;;  %v2575_v58 = vpop.f32.mrb[30].mxu0  ;;  %v3684_v42 = vsel %vm57_vm3, 1.0, %v2954_v37 }
 0x491   :  { %2908 = vpow2.f32 %v1308_v49  ;;  %v1295_v33 = vsub.f32 %v3261_v53, %v2575_v58  ;;  %v1251_v47 = vpop.f32.mrb[31].mxu0  ;;  %v3694_v49 = vsel %vm58_vm2, 1.0, %v2954_v37  ;;  %v2882_v37 = vld [vmem:[%s3878_s7 + $0x24] ss:$8 sps:$4 sm:$0xff]   ;;  %v2890_v58 = vld [vmem:[%s3878_s7 + $0x40] ss:$8 sps:$4 sm:$0xff]  }
 0x492   :  { %2910 = vpow2.f32 %v1306_v52  ;;  %v1294_v48 = vsub.f32 %v3263_v54, %v1251_v47  ;;  %1827 = vmatprep.mubr.bf16.mxu0 %v2882_v37  ;;  %v2888_v52 = vld [vmem:[%s3878_s7 + $0x44] ss:$8 sps:$4 sm:$0xff]   ;;  %v2893_v47 = vld [vmem:[%s3878_s7 + $0x50] ss:$8 sps:$4 sm:$0xff]  }
 0x493   :  { %v1312_v38 = vmul.f32 1.442695, %v1295_v33  ;;  %1828 = vmatmul.mubr.bf16.gmra.mrb[48].mxu0 %v2884_v9  ;;  %v2891_v33 = vld [vmem:[%s3878_s7 + $0x54] ss:$8 sps:$4 sm:$0xff]   ;;  %v2903_v37 = vld [vmem:[%s3880_s10 + $0x8] sm:$0xff]  }
 0x494   :  { %v1310_v39 = vmul.f32 1.442695, %v1294_v48  ;;  %v2578_v5 = vpop.f32.mrb[32].mxu0 }
 0x495   :  { %2912 = vpow2.f32 %v1312_v38  ;;  %v1297_v50 = vsub.f32 %v3267_v56, %v2578_v5  ;;  %v1261_v17 = vpop.f32.mrb[33].mxu0 }
 0x496   :  { %2914 = vpow2.f32 %v1310_v39  ;;  %v1296_v51 = vsub.f32 %v3269_v57, %v1261_v17 }
 0x497   :  { %v3634_v43 = vpop.eup %2904  ;;  %v1316_v8 = vmul.f32 1.442695, %v1297_v50 }
 0x498   :  { %v3636_v11 = vpop.eup %2906  ;;  %v1314_v53 = vmul.f32 1.442695, %v1296_v51  ;;  %v2581_v41 = vpop.f32.mrb[34].mxu0 }
 0x499   :  { %2916 = vpow2.f32 %v1316_v8  ;;  %v1299_v54 = vsub.f32 %v3273_v59, %v2581_v41  ;;  %v1271_v13 = vpop.f32.mrb[35].mxu0  ;;  %v2749_v18 = vpack.c.bf16 %v3634_v43, %v3636_v11 }
 0x49a   :  { %2918 = vpow2.f32 %v1314_v53  ;;  %v1298_v56 = vsub.f32 %v3275_v60, %v1271_v13 }
 0x49b   :  { %v3642_v36 = vpop.eup %2908  ;;  %v1320_v57 = vmul.f32 1.442695, %v1299_v54  ;;  %2750 = vmatprep.subr.bf16.mxu1 %v2749_v18 }
 0x49c   :  { %v3644_v21 = vpop.eup %2910  ;;  %v1318_v22 = vmul.f32 1.442695, %v1298_v56  ;;  %v2584_v25 = vpop.f32.mrb[36].mxu0  ;;  %2752 = vmatpush3.bf16.msra.mxu1 %v2749_v18  ;;  %v2894_v18 = vld [vmem:[%s3879_s11] sm:$0xff]   ;;  %v2895_v56 = vld [vmem:[%s3879_s11 + $0x8] sm:$0xff]  }
 0x49d   :  { %2920 = vpow2.f32 %v1320_v57  ;;  %v1301_v29 = vsub.f32 %v3279_v62, %v2584_v25  ;;  %v1281_v59 = vpop.f32.mrb[37].mxu0  ;;  %v2753_v20 = vpack.c.bf16 %v3642_v36, %v3644_v21  ;;  %v2896_v57 = vld [vmem:[%s3879_s11 + $0x10] sm:$0xff]  }
 0x49e   :  { %2922 = vpow2.f32 %v1318_v22  ;;  %v1300_v19 = vsub.f32 %v3281_v63, %v1281_v59  ;;  %v2899_v59 = vld [vmem:[%s3879_s11 + $0x28] sm:$0xff]  }
 0x49f   :  { %v3650_v60 = vpop.eup %2912  ;;  %v1324_v12 = vmul.f32 1.442695, %v1301_v29  ;;  %2754 = vmatprep.subr.bf16.mxu1 %v2753_v20 }
 0x4a0   :  { %v3652_v26 = vpop.eup %2914  ;;  %v1322_v27 = vmul.f32 1.442695, %v1300_v19  ;;  %2756 = vmatpush3.bf16.msra.mxu1 %v2753_v20 }
 0x4a1   :  { %2924 = vpow2.f32 %v1324_v12  ;;  %v2757_v28 = vpack.c.bf16 %v3650_v60, %v3652_v26  ;;  %v2900_v12 = vld [vmem:[%s3879_s11 + $0x30] sm:$0xff]  }
 0x4a2   :  { %2926 = vpow2.f32 %v1322_v27 }
 0x4a3   :  { %v3656_v62 = vpop.eup %2916  ;;  %2758 = vmatprep.subr.bf16.mxu1 %v2757_v28 }
 0x4a4   :  { %v3658_v46 = vpop.eup %2918  ;;  %2760 = vmatpush3.bf16.msra.mxu1 %v2757_v28 }
 0x4a5   :  { %v2761_v63 = vpack.c.bf16 %v3656_v62, %v3658_v46 }
 0x4a7   :  { %v3662_v30 = vpop.eup %2920  ;;  %2762 = vmatprep.subr.bf16.mxu1 %v2761_v63 }
 0x4a8   :  { %v3664_v16 = vpop.eup %2922  ;;  %2764 = vmatpush3.bf16.msra.mxu1 %v2761_v63 }
 0x4a9   :  { %v2765_v34 = vpack.c.bf16 %v3662_v30, %v3664_v16 }
 0x4ab   :  { %v3668_v44 = vpop.eup %2924  ;;  %2766 = vmatprep.subr.bf16.mxu1 %v2765_v34 }
 0x4ac   :  { %v3670_v3 = vpop.eup %2926  ;;  %2768 = vmatpush3.bf16.msra.mxu1 %v2765_v34  ;;  %v2392_v48 = vpop.f32.mrb[40].mxu0  ;;  %v2901_v34 = vld [vmem:[%s3879_s11 + $0x38] sm:$0xff]  }
 0x4ad   :  { %v2769_v45 = vpack.c.bf16 %v3668_v44, %v3670_v3  ;;  %v2393_v38 = vpop.f32.mrb[41].mxu0 }
 0x4ae   :  { %v3730_v39 = vadd.f32 %v2393_v38, %v2392_v48  ;;  %v2395_v5 = vpop.f32.mrb[42].mxu0 }
 0x4af   :  { %2770 = vmatprep.subr.bf16.mxu1 %v2769_v45  ;;  %v2396_v50 = vpop.f32.mrb[43].mxu0 }
 0x4b0   :  { %2772 = vmatpush3.bf16.msra.mxu1 %v2769_v45  ;;  %v3732_v17 = vadd.f32 %v2396_v50, %v2395_v5 }
 0x4b3   :  { %2610 = vmatmul.mubr.msk.f32.vlgmr.msra.gmra.mrb[24].mxu1 %vm879_vm1, %v3678_v1 }
 0x4b4   :  { %2612 = vmatprep.mubr.msk.f32.mxu1 %vm879_vm1, %v3684_v42 }
 0x4b7   :  { %2613 = vmatmul.mubr.msk.f32.gmra.mrb[26].mxu1 %vm879_vm1, %v3694_v49 }
 0x4b8   :  { %2623 = vmatprep.mubr.msk.f32.mxu1 %vm1128_vm13, %v3295_v7  ;;  %v2885_v7 = vld [vmem:[%s3878_s7 + $0x34] ss:$8 sps:$4 sm:$0xff]  }
 0x4b9   :  { %1835 = vmatprep.mubr.bf16.mxu0 %v2885_v7 }
 0x4ba   :  { %1836 = vmatmul.mubr.bf16.gmra.mrb[52].mxu0 %v2887_v23 }
 0x4bb   :  { %1843 = vmatprep.mubr.bf16.mxu0 %v2888_v52 }
 0x4c2   :  { %1844 = vmatmul.mubr.bf16.gmra.mrb[56].mxu0 %v2890_v58 }
 0x4c3   :  { %1851 = vmatprep.mubr.bf16.mxu0 %v2891_v33 }
 0x4ca   :  { %1852 = vmatmul.mubr.bf16.gmra.mrb[60].mxu0 %v2893_v47 }
 0x586   :  { %v2611_v51 = vpop.f32.mrb[24].mxu1 }
 0x587   :  { %v1404_v8 = vpop.f32.mrb[25].mxu1 }
 0x588   :  { %v2773_v53 = vpack.c.bf16 %v2611_v51, %v1404_v8 }
 0x58a   :  { %v2614_v41 = vpop.f32.mrb[26].mxu1  ;;  %2774 = vmatprep.subr.bf16.mxu1 %v2773_v53 }
 0x58b   :  { %v1414_v54 = vpop.f32.mrb[27].mxu1  ;;  %2776 = vmatpush3.bf16.msra.mxu1 %v2773_v53 }
 0x58c   :  { %v2777_v13 = vpack.c.bf16 %v2614_v41, %v1414_v54 }
 0x58e   :  { %2778 = vmatprep.subr.bf16.mxu1 %v2777_v13 }
 0x58f   :  { %2780 = vmatpush3.bf16.msra.mxu1 %v2777_v13 }
 0x590   :  { %2641 = vmatprep.subr.bf16.mxu1 %v2894_v18 }
 0x592   :  { %2624 = vmatmul.mubr.msk.f32.vlgmr.msra.gmra.mrb[28].mxu1 %vm1128_vm13, %v3495_v15  ;;  %v2398_v15 = vpop.f32.mrb[44].mxu0 }
 0x593   :  { %2626 = vmatprep.mubr.msk.f32.mxu1 %vm1128_vm13, %v3498_v55  ;;  %2642 = vmatpush3.bf16.msra.mxu1 %v2894_v18  ;;  %v2399_v55 = vpop.f32.mrb[45].mxu0 }
 0x594   :  { %2643 = vmatprep.subr.bf16.mxu1 %v2895_v56 }
 0x596   :  { %2627 = vmatmul.mubr.msk.f32.gmra.mrb[30].mxu1 %vm1128_vm13, %v3509_v35  ;;  %v3765_v35 = vadd.f32 %v2399_v55, %v2398_v15 }
 0x597   :  { %2629 = vmatprep.mubr.msk.f32.mxu1 %vm1128_vm13, %v3512_v31  ;;  %2644 = vmatpush3.bf16.msra.mxu1 %v2895_v56  ;;  %v2401_v31 = vpop.f32.mrb[46].mxu0 }
 0x598   :  { %2645 = vmatprep.subr.bf16.mxu1 %v2896_v57 }
 0x59a   :  { %2630 = vmatmul.mubr.msk.f32.gmra.mrb[32].mxu1 %vm1128_vm13, %v3523_v32  ;;  %v2402_v32 = vpop.f32.mrb[47].mxu0 }
 0x59b   :  { %2632 = vmatprep.mubr.msk.f32.mxu1 %vm1128_vm13, %v3526_v61  ;;  %2646 = vmatpush3.bf16.msra.mxu1 %v2896_v57  ;;  %v3767_v61 = vadd.f32 %v2402_v32, %v2401_v31  ;;  %v3811_v31 = vld [vmem:[%s3881_s9] ss:$0 sm:$0xff] }
 0x59e   :  { %2633 = vmatmul.mubr.msk.f32.gmra.mrb[34].mxu1 %vm1128_vm13, %v3537_v4  ;;  %v2897_v4 = vld [vmem:[%s3879_s11 + $0x18] sm:$0xff]  }
 0x59f   :  { %2635 = vmatprep.mubr.msk.f32.mxu1 %vm1128_vm13, %v3540_v0  ;;  %2647 = vmatprep.subr.bf16.mxu1 %v2897_v4  ;;  %v2404_v0 = vpop.f32.mrb[48].mxu0 }
 0x5a0   :  { %2648 = vmatpush3.bf16.msra.mxu1 %v2897_v4 }
 0x5a2   :  { %2636 = vmatmul.mubr.msk.f32.gmra.mrb[36].mxu1 %vm1128_vm13, %v3549_v40  ;;  %v2405_v40 = vpop.f32.mrb[49].mxu0 }
 0x5a3   :  { %2638 = vmatprep.mubr.msk.f32.mxu1 %vm1128_vm13, %v3552_v14  ;;  %v2898_v14 = vld [vmem:[%s3879_s11 + $0x20] sm:$0xff]   ;;  %v2407_v22 = vpop.f32.mrb[50].mxu0 }
 0x5a4   :  { %2649 = vmatprep.subr.bf16.mxu1 %v2898_v14  ;;  %v2408_v25 = vpop.f32.mrb[51].mxu0 }
 0x5a5   :  { %2650 = vmatpush3.bf16.msra.mxu1 %v2898_v14  ;;  %v3777_v29 = vadd.f32 %v2408_v25, %v2407_v22  ;;  %v2410_v20 = vpop.f32.mrb[52].mxu0  ;;  %v1817_v22 = vadd.f32 %v3732_v17, %v3811_v31  ;;  %v1825_v17 = vadd.f32 %v3767_v61, %v3811_v31 }
 0x5a6   :  { %2639 = vmatmul.mubr.msk.f32.gmra.mrb[38].mxu1 %vm1128_vm13, %v3560_v2  ;;  %v3775_v2 = vadd.f32 %v2405_v40, %v2404_v0  ;;  %2651 = vmatprep.subr.bf16.mxu1 %v2899_v59  ;;  %v2411_v19 = vpop.f32.mrb[53].mxu0 }
 0x5a7   :  { %v3785_v27 = vadd.f32 %v2411_v19, %v2410_v20  ;;  %v2413_v28 = vpop.f32.mrb[54].mxu0  ;;  %2657 = vmatprep.mubr.bf16.mxu1 %v2902_v24  ;;  %v1814_v20 = vadd.f32 %v3730_v39, %v3811_v31  ;;  %v1822_v39 = vadd.f32 %v3765_v35, %v3811_v31  ;;  %v1833_v61 = vadd.f32 %v3777_v29, %v3811_v31 }
 0x5a8   :  { %v2414_v63 = vpop.f32.mrb[55].mxu0 }
 0x5a9   :  { %2652 = vmatpush3.bf16.msra.mxu1 %v2899_v59  ;;  %v3790_v45 = vadd.f32 %v2414_v63, %v2413_v28  ;;  %v2416_v10 = vpop.f32.mrb[56].mxu0 }
 0x5aa   :  { %2653 = vmatprep.subr.bf16.mxu1 %v2900_v12  ;;  %v2417_v9 = vpop.f32.mrb[57].mxu0 }
 0x5ab   :  { %v3798_v7 = vadd.f32 %v2417_v9, %v2416_v10  ;;  %v2419_v23 = vpop.f32.mrb[58].mxu0  ;;  %v1841_v29 = vadd.f32 %v3790_v45, %v3811_v31 }
 0x5ac   :  { %v2420_v52 = vpop.f32.mrb[59].mxu0 }
 0x5ad   :  { %2654 = vmatpush3.bf16.msra.mxu1 %v2900_v12  ;;  %v3802_v58 = vadd.f32 %v2420_v52, %v2419_v23  ;;  %v2422_v33 = vpop.f32.mrb[60].mxu0 }
 0x5ae   :  { %2655 = vmatprep.subr.bf16.mxu1 %v2901_v34  ;;  %v2423_v47 = vpop.f32.mrb[61].mxu0 }
 0x5af   :  { %v3804_v48 = vadd.f32 %v2423_v47, %v2422_v33  ;;  %v2425_v38 = vpop.f32.mrb[62].mxu0 }
 0x5b0   :  { %v2426_v5 = vpop.f32.mrb[63].mxu0 }
 0x5b1   :  { %2656 = vmatpush3.bf16.msra.mxu1 %v2901_v34  ;;  %v3806_v50 = vadd.f32 %v2426_v5, %v2425_v38 }
 0x5b4   :  { %2658 = vmatmul.mubr.bf16.vlgmr.msra.gmra.mrb[40].mxu1 %v2903_v37 }
 0x5b5   :  { %2685 = vmatprep.mubr.msk.f32.mxu1 %vm879_vm1, %v3568_v6 }
 0x665   :  { %v2625_v51 = vpop.f32.mrb[28].mxu1 }
 0x666   :  { %v1495_v8 = vadd.f32 1e-16, %v2625_v51  ;;  %v1489_v53 = vpop.f32.mrb[29].mxu1 }
 0x667   :  { %v1490_v41 = vadd.f32 1e-16, %v1489_v53  ;;  %v1830_v53 = vadd.f32 %v3775_v2, %v3811_v31 }
 0x668   :  { %2928 = vrcp.f32 %v1495_v8 }
 0x669   :  { %2930 = vrcp.f32 %v1490_v41  ;;  %v2628_v54 = vpop.f32.mrb[30].mxu1 }
 0x66a   :  { %v1505_v13 = vadd.f32 1e-16, %v2628_v54  ;;  %v1499_v6 = vpop.f32.mrb[31].mxu1 }
 0x66b   :  { %v1500_v18 = vadd.f32 1e-16, %v1499_v6 }
 0x66c   :  { %2932 = vrcp.f32 %v1505_v13 }
 0x66d   :  { %2934 = vrcp.f32 %v1500_v18  ;;  %v2631_v56 = vpop.f32.mrb[32].mxu1 }
 0x66e   :  { %v1515_v57 = vadd.f32 1e-16, %v2631_v56  ;;  %v1509_v15 = vpop.f32.mrb[33].mxu1 }
 0x66f   :  { %v1510_v55 = vadd.f32 1e-16, %v1509_v15 }
 0x670   :  { %2936 = vrcp.f32 %v1515_v57 }
 0x671   :  { %2938 = vrcp.f32 %v1510_v55  ;;  %v2634_v32 = vpop.f32.mrb[34].mxu1 }
 0x672   :  { %v2929_v4 = vpop.eup %2928  ;;  %v1525_v0 = vadd.f32 1e-16, %v2634_v32  ;;  %v1519_v40 = vpop.f32.mrb[35].mxu1 }
 0x673   :  { %v2931_v14 = vpop.eup %2930  ;;  %v1520_v25 = vadd.f32 1e-16, %v1519_v40  ;;  %v1551_v59 = vmul.f32 %v2929_v4, %v3634_v43 }
 0x674   :  { %2940 = vrcp.f32 %v1525_v0  ;;  %v1549_v19 = vmul.f32 %v2931_v14, %v3636_v11  ;;  %v1846_v0 = vadd.f32 %v3798_v7, %v3811_v31 }
 0x675   :  { %2942 = vrcp.f32 %v1520_v25  ;;  %v2637_v12 = vpop.f32.mrb[36].mxu1  ;;  %v1861_v28 = vmul.f32 %v1817_v22, %v1551_v59 }
 0x676   :  { %v2933_v63 = vpop.eup %2932  ;;  %v1535_v34 = vadd.f32 1e-16, %v2637_v12  ;;  %v1529_v10 = vpop.f32.mrb[37].mxu1  ;;  %v1860_v24 = vmul.f32 %v1814_v20, %v1549_v19 }
 0x677   :  { %v2935_v37 = vpop.eup %2934  ;;  %v1530_v9 = vadd.f32 1e-16, %v1529_v10  ;;  %v1555_v43 = vmul.f32 %v2933_v63, %v3642_v36 }
 0x678   :  { %2944 = vrcp.f32 %v1535_v34  ;;  %v2781_v23 = vpack.c.bf16 %v1861_v28, %v1860_v24  ;;  %v1553_v11 = vmul.f32 %v2935_v37, %v3644_v21 }
 0x679   :  { %2946 = vrcp.f32 %v1530_v9  ;;  %v2640_v52 = vpop.f32.mrb[38].mxu1  ;;  %v1863_v33 = vmul.f32 %v1825_v17, %v1555_v43 }
 0x67a   :  { %v2937_v47 = vpop.eup %2936  ;;  %v1545_v38 = vadd.f32 1e-16, %v2640_v52  ;;  %v1539_v5 = vpop.f32.mrb[39].mxu1  ;;  %2782 = vmatprep.subr.bf16.mxu1 %v2781_v23  ;;  %v1862_v51 = vmul.f32 %v1822_v39, %v1553_v11 }
 0x67b   :  { %v2939_v8 = vpop.eup %2938  ;;  %v1540_v36 = vadd.f32 1e-16, %v1539_v5  ;;  %2784 = vmatpush3.bf16.msra.mxu1 %v2781_v23  ;;  %v1559_v35 = vmul.f32 %v2937_v47, %v3650_v60  ;;  %v1838_v60 = vadd.f32 %v3785_v27, %v3811_v31 }
 0x67c   :  { %2948 = vrcp.f32 %v1545_v38  ;;  %v2785_v21 = vpack.c.bf16 %v1863_v33, %v1862_v51  ;;  %v1557_v41 = vmul.f32 %v2939_v8, %v3652_v26 }
 0x67d   :  { %2950 = vrcp.f32 %v1540_v36  ;;  %v1865_v54 = vmul.f32 %v1833_v61, %v1559_v35 }
 0x67e   :  { %v2941_v13 = vpop.eup %2940  ;;  %2786 = vmatprep.subr.bf16.mxu1 %v2785_v21  ;;  %v1864_v6 = vmul.f32 %v1830_v53, %v1557_v41 }
 0x67f   :  { %v2943_v18 = vpop.eup %2942  ;;  %v1563_v56 = vmul.f32 %v2941_v13, %v3656_v62  ;;  %2788 = vmatpush3.bf16.msra.mxu1 %v2785_v21  ;;  %v1849_v62 = vadd.f32 %v3802_v58, %v3811_v31 }
 0x680   :  { %v2789_v2 = vpack.c.bf16 %v1865_v54, %v1864_v6  ;;  %v1561_v57 = vmul.f32 %v2943_v18, %v3658_v46 }
 0x681   :  { %v1867_v15 = vmul.f32 %v1841_v29, %v1563_v56 }
 0x682   :  { %v2945_v26 = vpop.eup %2944  ;;  %2790 = vmatprep.subr.bf16.mxu1 %v2789_v2  ;;  %v1866_v55 = vmul.f32 %v1838_v60, %v1561_v57 }
 0x683   :  { %v2947_v32 = vpop.eup %2946  ;;  %v1567_v4 = vmul.f32 %v2945_v26, %v3662_v30  ;;  %2792 = vmatpush3.bf16.msra.mxu1 %v2789_v2  ;;  %v1857_v30 = vadd.f32 %v3806_v50, %v3811_v31 }
 0x684   :  { %v1565_v45 = vmul.f32 %v2947_v32, %v3664_v16  ;;  %v2793_v27 = vpack.c.bf16 %v1867_v15, %v1866_v55  ;;  %v1854_v16 = vadd.f32 %v3804_v48, %v3811_v31  ;;  %v2206_v31 = vld [vmem:[%s3882_s12] ss:$0 sm:$0xff] }
 0x685   :  { %v1869_v40 = vmul.f32 %v1849_v62, %v1567_v4 }
 0x686   :  { %v2949_v14 = vpop.eup %2948  ;;  %v1868_v46 = vmul.f32 %v1846_v0, %v1565_v45  ;;  %2794 = vmatprep.subr.bf16.mxu1 %v2793_v27 }
 0x687   :  { %v2951_v22 = vpop.eup %2950  ;;  %v1571_v25 = vmul.f32 %v2949_v14, %v3668_v44  ;;  %2796 = vmatpush3.bf16.msra.mxu1 %v2793_v27  ;;  %v2659_v44 = vpop.f32.mrb[40].mxu1 }
 0x688   :  { %v1569_v58 = vmul.f32 %v2951_v22, %v3670_v3  ;;  %v2797_v59 = vpack.c.bf16 %v1869_v40, %v1868_v46  ;;  %v1993_v3 = vpop.f32.mrb[41].mxu1 }
 0x689   :  { %v1871_v20 = vmul.f32 %v1857_v30, %v1571_v25  ;;  %v2660_v48 = vpop.f32.mrb[42].mxu1  ;;  %v1994_v28 = vadd.f32 %v2206_v31, %v1993_v3 }
 0x68a   :  { %v1870_v7 = vmul.f32 %v1854_v16, %v1569_v58  ;;  %2798 = vmatprep.subr.bf16.mxu1 %v2797_v59  ;;  %v1996_v50 = vpop.f32.mrb[43].mxu1  ;;  %v2005_v24 = vadd.f32 %v2660_v48, %v2206_v31 }
 0x68b   :  { %2800 = vmatpush3.bf16.msra.mxu1 %v2797_v59  ;;  %v1997_v12 = vadd.f32 %v2206_v31, %v1996_v50 }
 0x68c   :  { %v2801_v19 = vpack.c.bf16 %v1871_v20, %v1870_v7 }
 0x68e   :  { %2802 = vmatprep.subr.bf16.mxu1 %v2801_v19 }
 0x68f   :  { %2804 = vmatpush3.bf16.msra.mxu1 %v2801_v19 }
 0x692   :  { %2686 = vmatmul.mubr.msk.f32.vlgmr.msra.gmra.mrb[44].mxu1 %vm879_vm1, %v3678_v1 }
 0x693   :  { %2688 = vmatprep.mubr.msk.f32.mxu1 %vm879_vm1, %v3684_v42  ;;  %v2002_v42 = vadd.f32 %v2659_v44, %v2206_v31 }
 0x696   :  { %2689 = vmatmul.mubr.msk.f32.gmra.mrb[46].mxu1 %vm879_vm1, %v3694_v49 }
 0x765   :  { %v2687_v63 = vpop.f32.mrb[44].mxu1 }
 0x766   :  { %v2080_v34 = vadd.f32 %v2687_v63, %v1997_v12  ;;  %v2074_v10 = vpop.f32.mrb[45].mxu1 }
 0x767   :  { %v2075_v1 = vadd.f32 %v2074_v10, %v1994_v28 }
 0x768   :  { %v2094_v37 = vmax.f32 %v2080_v34, 0.0 }
 0x769   :  { %v2093_v17 = vmax.f32 %v2075_v1, 0.0  ;;  %v2690_v9 = vpop.f32.mrb[46].mxu1 }
 0x76a   :  { %2098 = vst [vmem:[%s3883_s13 + $0x8] sm:$0xff] %v2094_v37  ;;  %v2090_v49 = vadd.f32 %v2690_v9, %v2005_v24  ;;  %v2084_v43 = vpop.f32.mrb[47].mxu1 }
 0x76b   :  { %2097 = vst [vmem:[%s3883_s13] sm:$0xff] %v2093_v17  ;;  %v2085_v39 = vadd.f32 %v2084_v43, %v2002_v42 }
 0x76c   :  { %v2096_v23 = vmax.f32 %v2090_v49, 0.0 }
 0x76d   :  { %v2095_v11 = vmax.f32 %v2085_v39, 0.0 }
 0x76e   :  { %2100 = vst [vmem:[%s3883_s13 + $0x18] sm:$0xff] %v2096_v23 }
 0x76f   :  { %2099 = vst [vmem:[%s3883_s13 + $0x10] sm:$0xff] %v2095_v11 }

</bundles_post_ra>
